<compile_context>
chip_gen: v7x
topology: tpu7x:2x2x1
jax: 0.10.0
libtpu: 0.0.40
codegen_flags: <defaults>
</compile_context>

<pallas_src>
import jax
import jax.numpy as jnp
from jax.experimental import pallas as pl
from jax.experimental.pallas import tpu as pltpu

# ---- module hyper-parameters (small but structurally faithful) ----
NUM_JOINTS = 29           # kwargs['NUM_JOINTS']
K_PAD = 32                # padded joint count (29 -> 32, 4 sublane tiles)
DEPTH_DIM = 16            # kwargs['EXTRA']['DEPTH_DIM']
HEIGHT_DIM = 16           # kwargs['HEATMAP_SIZE'][0]
WIDTH_DIM = 16            # kwargs['HEATMAP_SIZE'][1]
FEAT_DIM = 128            # stands in for the 2048-d HRNet feature (must be 128)
IN_CH = 32                # channels of the synthetic backbone input feature map
FOCAL_LENGTH = 1000.0
INPUT_SIZE = 256.0
DEPTH_FACTOR = 2.0        # bbox_3d_shape[2] * 1e-3

HW = HEIGHT_DIM * WIDTH_DIM                 # 256
DHW = DEPTH_DIM * HEIGHT_DIM * WIDTH_DIM    # 4096
IDX_COLS = 8                                # soft-argmax index matrix (3 used)

# packed output slab layout: (B, OUT_ROWS, 128)
#   rows 0..K_PAD-1 : per-joint  [0:3]=uvd  [3:6]=xyz(root-rel)  [6]=maxvals
OUT_ROWS = 40
ROW_DEC = 32      # raw decoder row: delta_shape 0:10 | phi 10:56 | cam 56 | sigma_logit 57:86
ROW_PRED = 33     # dec + init:      pred_shape 0:10 | ...        | pred_camera 56
ROW_SIG = 34      # sigmoid(dec):    sigma at 57:86
ROW_CROOT = 35    # camera_root at 0:3
ROW_FEAT = 36     # x0 feature (128 lanes)


# ---------------------------------------------------------------------------
# Fused kernel: backbone stand-in + heatmap head + decoders + camera lifting
# ---------------------------------------------------------------------------
def _fused_kernel(x_chw_ref, x_hwc_ref, w_hm_ref, w_feat_ref, b_feat_ref,
                  w_dec_ref, b_dec_ref, init_vec_ref, idx_ref,
                  out_ref, hm_ref):
    # zero the packed output slab (everything not explicitly written stays 0)
    out_ref[...] = jnp.zeros_like(out_ref)

    # ---- synthetic backbone: 1x1 conv -> heatmap logits --------------------
    # hm[k, d*H*W + h*W + w] = sum_c w_hm[c, k*D + d] * x[c, h*W + w]
    # w_hm_ref is pre-arranged as (D, K_PAD, C); each depth slice is one small
    # matmul written straight into its lane block of the VMEM scratch, so the
    # (K, D*H*W) layout is produced without any transpose or HBM round-trip.
    x_chw = x_chw_ref[0]                                        # (C, HW)
    for d in range(DEPTH_DIM):                                  # static unroll
        hm_ref[:, d * HW:(d + 1) * HW] = jnp.dot(
            w_hm_ref[d], x_chw, preferred_element_type=jnp.float32)

    h = hm_ref[...]                                             # (K_PAD, DHW)

    # ---- norm_heatmap('softmax') over the flattened voxel axis -------------
    m = jnp.max(h, axis=-1, keepdims=True)                      # (K_PAD, 1)
    e = jnp.exp(h - m)
    s = jnp.sum(e, axis=-1, keepdims=True)                      # (K_PAD, 1)
    r = pl.reciprocal(s, approx=False)                          # exact 1/s
    p = e * r                                                   # softmax heatmap
    out_ref[0, 0:K_PAD, 6:7] = r                                # maxvals == 1/s

    # ---- soft-argmax: single matmul with the (w/W, h/H, d/D) index matrix --
    coords = jnp.dot(p, idx_ref[...],
                     preferred_element_type=jnp.float32)        # (K_PAD, 8)
    uvd = coords[:, 0:3] - 0.5                                  # pred_uvd
    out_ref[0, 0:K_PAD, 0:3] = uvd

    # ---- global feature: GAP (ones-row matmul on the MXU) + fc -------------
    x_hwc = x_hwc_ref[0]                                        # (HW, C)
    ones_row = jnp.full((1, HW), 1.0 / HW, dtype=jnp.float32)
    pooled = jnp.dot(ones_row, x_hwc,
                     preferred_element_type=jnp.float32)        # (1, C)
    x0 = jnp.dot(pooled, w_feat_ref[...],
                 preferred_element_type=jnp.float32) + b_feat_ref[...]   # (1, F)
    out_ref[0, ROW_FEAT:ROW_FEAT + 1, :] = x0

    # ---- fused decoders: [decshape | decphi | deccam | decsigma] -----------
    dec = jnp.dot(x0, w_dec_ref[...],
                  preferred_element_type=jnp.float32) + b_dec_ref[...]   # (1, 128)
    pred = dec + init_vec_ref[...]        # + init_shape (cols 0:10), + init_cam (col 56)
    sig = 1.0 / (1.0 + jnp.exp(-dec))     # sigmoid; sigma lanes sliced in wrapper
    out_ref[0, ROW_DEC:ROW_DEC + 1, :] = dec
    out_ref[0, ROW_PRED:ROW_PRED + 1, :] = pred
    out_ref[0, ROW_SIG:ROW_SIG + 1, :] = sig

    # ---- uvd -> camera-space xyz (root-relative) + camera root -------------
    cam = pred[:, 56:57]                                        # pred_camera (1,1)
    cam_depth = FOCAL_LENGTH / (INPUT_SIZE * cam + 1e-9)        # (1,1)
    z = uvd[:, 2:3]                                             # (K_PAD, 1)
    xy = uvd[:, 0:2] * (INPUT_SIZE / FOCAL_LENGTH) * (z * DEPTH_FACTOR + cam_depth)
    xy = xy * (1.0 / DEPTH_FACTOR)                              # (K_PAD, 2)

    out_ref[0, 0:K_PAD, 3:5] = xy - xy[0:1, :]                  # root-relative xy
    out_ref[0, 0:K_PAD, 5:6] = z - z[0:1, :]                    # root-relative z
    out_ref[0, ROW_CROOT:ROW_CROOT + 1, 0:2] = xy[0:1, :] * DEPTH_FACTOR
    out_ref[0, ROW_CROOT:ROW_CROOT + 1, 2:3] = z[0:1, :] * DEPTH_FACTOR + cam_depth


def fused_forward(x_chw, x_hwc, w_hm_d, w_feat, b_feat, w_dec, b_dec,
                  init_vec, idx):
    B, C, hw = x_chw.shape
    F = w_feat.shape[1]
    assert hw == HW and F == 128 and FEAT_DIM == 128

    return pl.pallas_call(
        _fused_kernel,
        out_shape=jax.ShapeDtypeStruct((B, OUT_ROWS, 128), jnp.float32),
        grid_spec=pltpu.PrefetchScalarGridSpec(
            num_scalar_prefetch=0,
            grid=(B,),
            in_specs=[
                pl.BlockSpec((1, C, HW), lambda b: (b, 0, 0)),        # x (C, HW)
                pl.BlockSpec((1, HW, C), lambda b: (b, 0, 0)),        # x (HW, C)
                pl.BlockSpec((DEPTH_DIM, K_PAD, C), lambda b: (0, 0, 0)),
                pl.BlockSpec((C, F), lambda b: (0, 0)),               # w_feat
                pl.BlockSpec((1, F), lambda b: (0, 0)),               # b_feat
                pl.BlockSpec((F, 128), lambda b: (0, 0)),             # combined dec W
                pl.BlockSpec((1, 128), lambda b: (0, 0)),             # combined dec b
                pl.BlockSpec((1, 128), lambda b: (0, 0)),             # init_shape/init_cam
                pl.BlockSpec((DHW, IDX_COLS), lambda b: (0, 0)),      # soft-argmax idx
            ],
            out_specs=pl.BlockSpec((1, OUT_ROWS, 128), lambda b: (b, 0, 0)),
            scratch_shapes=[pltpu.VMEM((K_PAD, DHW), jnp.float32)],   # heatmap stays in VMEM
        ),
        compiler_params=pltpu.CompilerParams(
            dimension_semantics=("parallel",)),                       # v7x: 2 TCs over batch
    )(x_chw, x_hwc, w_hm_d, w_feat, b_feat, w_dec, b_dec, init_vec, idx)


# ---------------------------------------------------------------------------
# Parameter construction (deterministic, synthetic)
# ---------------------------------------------------------------------------
def make_params(key):
    ks = jax.random.split(key, 10)
    KD = NUM_JOINTS * DEPTH_DIM
    params = {
        # synthetic backbone stand-in
        "w_hm": jax.random.normal(ks[0], (IN_CH, KD), jnp.float32) * 0.05,
        "w_feat": jax.random.normal(ks[1], (IN_CH, FEAT_DIM), jnp.float32) * 0.05,
        "b_feat": jax.random.normal(ks[2], (1, FEAT_DIM), jnp.float32) * 0.01,
        # decoders (decshape ->10, decphi ->46, deccam ->1, decsigma ->29)
        "w_shape": jax.random.normal(ks[3], (FEAT_DIM, 10), jnp.float32) * 0.02,
        "b_shape": jax.random.normal(ks[4], (1, 10), jnp.float32) * 0.01,
        "w_phi": jax.random.normal(ks[5], (FEAT_DIM, 46), jnp.float32) * 0.02,
        "b_phi": jax.random.normal(ks[6], (1, 46), jnp.float32) * 0.01,
        "w_cam": jax.random.normal(ks[7], (FEAT_DIM, 1), jnp.float32) * 0.02,
        "b_cam": jnp.zeros((1, 1), jnp.float32),
        "w_sigma": jax.random.normal(ks[8], (FEAT_DIM, 29), jnp.float32) * 0.02,
        "b_sigma": jax.random.normal(ks[9], (1, 29), jnp.float32) * 0.01,
        # registered buffers (stand-ins for h36m_mean_beta / init_cam)
        "init_shape": jnp.linspace(-0.5, 0.5, 10, dtype=jnp.float32).reshape(1, 10),
        "init_cam": jnp.array([[0.9]], jnp.float32),
    }
    # soft-argmax index matrix: cols (w/W, h/H, d/D) for flat idx d*H*W + h*W + w
    flat = jnp.arange(DHW, dtype=jnp.int32)
    w_idx = (flat % WIDTH_DIM).astype(jnp.float32) / float(WIDTH_DIM)
    h_idx = ((flat // WIDTH_DIM) % HEIGHT_DIM).astype(jnp.float32) / float(HEIGHT_DIM)
    d_idx = (flat // (HEIGHT_DIM * WIDTH_DIM)).astype(jnp.float32) / float(DEPTH_DIM)
    idx = jnp.stack([w_idx, h_idx, d_idx], axis=1)                 # (DHW, 3)
    params["idx"] = jnp.pad(idx, ((0, 0), (0, IDX_COLS - 3)))      # (DHW, 8)
    return params


# ---------------------------------------------------------------------------
# Forward (thin glue + output unpacking)
# ---------------------------------------------------------------------------
def hrnet_smpl_cam_forward(x, params):
    B, C, H, W = x.shape
    hw = H * W
    x_chw = x.reshape(B, C, hw)                                   # free reshape
    x_hwc = jnp.transpose(x, (0, 2, 3, 1)).reshape(B, hw, C)      # for GAP path

    # 1x1-conv weight rearranged to (D, K_PAD, C): row (d, k) = w_hm[:, k*D+d]
    w_hm_d = params["w_hm"].T.reshape(NUM_JOINTS, DEPTH_DIM, C)
    w_hm_d = jnp.transpose(w_hm_d, (1, 0, 2))                     # (D, 29, C)
    w_hm_d = jnp.pad(w_hm_d, ((0, 0), (0, K_PAD - NUM_JOINTS), (0, 0)))

    F = params["w_feat"].shape[1]
    zw = jnp.zeros((F, 128 - 86), jnp.float32)
    zb = jnp.zeros((1, 128 - 86), jnp.float32)
    w_dec = jnp.concatenate([params["w_shape"], params["w_phi"],
                             params["w_cam"], params["w_sigma"], zw], axis=1)
    b_dec = jnp.concatenate([params["b_shape"], params["b_phi"],
                             params["b_cam"], params["b_sigma"], zb], axis=1)
    init_vec = jnp.concatenate([params["init_shape"],
                                jnp.zeros((1, 46), jnp.float32),
                                params["init_cam"],
                                jnp.zeros((1, 128 - 57), jnp.float32)], axis=1)

    slab = fused_forward(x_chw, x_hwc, w_hm_d, params["w_feat"], params["b_feat"],
                         w_dec, b_dec, init_vec, params["idx"])   # (B, 40, 128)

    joints = slab[:, :NUM_JOINTS, :]                              # drop padded joints
    pred_uvd = joints[:, :, 0:3]                                  # (B, 29, 3)
    pred_xyz_29 = joints[:, :, 3:6]                               # root-relative
    maxvals = joints[:, :, 6:7]                                   # (B, 29, 1)

    dec_row = slab[:, ROW_DEC, :]
    pred_row = slab[:, ROW_PRED, :]
    sig_row = slab[:, ROW_SIG, :]

    delta_shape = dec_row[:, 0:10]
    pred_shape = pred_row[:, 0:10]
    pred_phi = dec_row[:, 10:56].reshape(B, 23, 2)
    pred_camera = pred_row[:, 56:57]                              # (B, 1)
    sigma = sig_row[:, 57:86].reshape(B, 29, 1)
    camera_root = slab[:, ROW_CROOT, 0:3]                         # (B, 3)
    x0 = slab[:, ROW_FEAT, :]                                     # (B, FEAT_DIM)

    # TODO(synk): SMPL_layer.hybrik (rot_mats / LBS vertices / joints_from_verts),
    # eval-mode update_scale (torch.inverse least-squares) and flip_test branches
    # depend on the external SMPL mesh model and are not reproduced here.
    return dict(
        pred_phi=pred_phi,
        pred_delta_shape=delta_shape,
        pred_shape=pred_shape,
        pred_uvd_jts=pred_uvd.reshape(B, -1),
        pred_xyz_jts_29=pred_xyz_29.reshape(B, -1),
        pred_xyz_jts_24=pred_xyz_29[:, :24, :].reshape(B, 72),
        maxvals=maxvals,
        cam_scale=pred_camera[:, :1],
        cam_root=camera_root,
        pred_camera=pred_camera,
        pred_sigma=sigma,
        scores=1.0 - sigma,
        img_feat=x0,
    )


if __name__ == "__main__":
    key = jax.random.PRNGKey(0)
    kx, kp = jax.random.split(key)
    # synthetic backbone-feature input (stands in for the HRNet trunk output)
    x = jax.random.normal(kx, (2, IN_CH, HEIGHT_DIM, WIDTH_DIM), dtype=jnp.float32)
    params = make_params(kp)

    out = jax.jit(hrnet_smpl_cam_forward)(x, params)
    out = jax.block_until_ready(out)

    B = x.shape[0]
    assert out["pred_uvd_jts"].shape == (B, NUM_JOINTS * 3)
    assert out["pred_xyz_jts_29"].shape == (B, NUM_JOINTS * 3)
    assert out["pred_xyz_jts_24"].shape == (B, 72)
    assert out["pred_phi"].shape == (B, 23, 2)
    assert out["pred_shape"].shape == (B, 10)
    assert out["pred_sigma"].shape == (B, 29, 1)
    assert out["maxvals"].shape == (B, NUM_JOINTS, 1)
    assert out["cam_root"].shape == (B, 3)
    for v in out.values():
        assert bool(jnp.all(jnp.isfinite(v)))
    # softmax maxvals must lie in (0, 1]
    assert bool(jnp.all(out["maxvals"] > 0.0)) and bool(jnp.all(out["maxvals"] <= 1.0))
    # root joint of root-relative xyz must be exactly 0
    assert bool(jnp.all(out["pred_xyz_jts_29"].reshape(B, 29, 3)[:, 0, :] == 0.0))
    print("KERNEL_OK")
</pallas_src>

<mosaic_0001>
module attributes {stable_mosaic.version = 11 : i64} {
  func.func @_fused_kernel(%arg0: i32, %arg1: memref<1x32x256xf32, #tpu.memory_space<vmem>>, %arg2: memref<1x256x32xf32, #tpu.memory_space<vmem>>, %arg3: memref<16x32x32xf32, #tpu.memory_space<vmem>>, %arg4: memref<32x128xf32, #tpu.memory_space<vmem>>, %arg5: memref<1x128xf32, #tpu.memory_space<vmem>>, %arg6: memref<128x128xf32, #tpu.memory_space<vmem>>, %arg7: memref<1x128xf32, #tpu.memory_space<vmem>>, %arg8: memref<1x128xf32, #tpu.memory_space<vmem>>, %arg9: memref<4096x8xf32, #tpu.memory_space<vmem>>, %arg10: memref<1x40x128xf32, #tpu.memory_space<vmem>>, %arg11: memref<32x4096xf32, #tpu.memory_space<vmem>>) attributes {dimension_semantics = [#tpu.dimension_semantics<parallel>], iteration_bounds = array<i64: 2>, scalar_prefetch = 0 : i64, scratch_operands = 1 : i64, tpu.core_type = #tpu.core_type<tc>, window_params = [{transform_indices = @transform_0, window_bounds = array<i64: 1, 32, 256>}, {transform_indices = @transform_1, window_bounds = array<i64: 1, 256, 32>}, {pipeline_mode = #tpu.pipeline_mode<synchronous>, transform_indices = @transform_2, window_bounds = array<i64: 16, 32, 32>}, {pipeline_mode = #tpu.pipeline_mode<synchronous>, transform_indices = @transform_3, window_bounds = array<i64: 32, 128>}, {pipeline_mode = #tpu.pipeline_mode<synchronous>, transform_indices = @transform_4, window_bounds = array<i64: 1, 128>}, {pipeline_mode = #tpu.pipeline_mode<synchronous>, transform_indices = @transform_5, window_bounds = array<i64: 128, 128>}, {pipeline_mode = #tpu.pipeline_mode<synchronous>, transform_indices = @transform_6, window_bounds = array<i64: 1, 128>}, {pipeline_mode = #tpu.pipeline_mode<synchronous>, transform_indices = @transform_7, window_bounds = array<i64: 1, 128>}, {pipeline_mode = #tpu.pipeline_mode<synchronous>, transform_indices = @transform_8, window_bounds = array<i64: 4096, 8>}, {transform_indices = @transform_9, window_bounds = array<i64: 1, 40, 128>}]} {
    %cst = arith.constant 0.000000e+00 : f32
    %0 = vector.broadcast %cst : f32 to vector<1x40x128xf32>
    %c0 = arith.constant 0 : index
    %c0_0 = arith.constant 0 : index
    %c0_1 = arith.constant 0 : index
    %1 = vector.load %arg10[%c0, %c0_0, %c0_1] : memref<1x40x128xf32, #tpu.memory_space<vmem>>, vector<1x40x128xf32>
    tpu.vector_store %arg10[%c0, %c0_0, %c0_1], %0 {strides = array<i32>} : memref<1x40x128xf32, #tpu.memory_space<vmem>>, vector<1x40x128xf32>,
    %c0_2 = arith.constant 0 : index
    %c0_3 = arith.constant 0 : index
    %c0_4 = arith.constant 0 : index
    %2 = vector.load %arg1[%c0_2, %c0_3, %c0_4] : memref<1x32x256xf32, #tpu.memory_space<vmem>>, vector<1x32x256xf32>
    %3 = vector.shape_cast %2 : vector<1x32x256xf32> to vector<32x256xf32>
    %c0_5 = arith.constant 0 : index
    %c0_6 = arith.constant 0 : index
    %c0_7 = arith.constant 0 : index
    %4 = vector.load %arg3[%c0_5, %c0_6, %c0_7] : memref<16x32x32xf32, #tpu.memory_space<vmem>>, vector<1x32x32xf32>
    %5 = vector.shape_cast %4 : vector<1x32x32xf32> to vector<32x32xf32>
    %cst_8 = arith.constant dense<0.000000e+00> : vector<32x256xf32>
    %6 = tpu.matmul %5, %3, %cst_8 {dimension_numbers = #tpu.dot_dimension_numbers<[1], [0], [0], [1], [0, 0, 1, 1], [], []>} : vector<32x32xf32>, vector<32x256xf32>, vector<32x256xf32> -> vector<32x256xf32>
    %c0_9 = arith.constant 0 : index
    %c0_10 = arith.constant 0 : index
    %7 = vector.load %arg11[%c0_9, %c0_10] : memref<32x4096xf32, #tpu.memory_space<vmem>>, vector<32x256xf32>
    tpu.vector_store %arg11[%c0_9, %c0_10], %6 {strides = array<i32>} : memref<32x4096xf32, #tpu.memory_space<vmem>>, vector<32x256xf32>,
    %c1 = arith.constant 1 : index
    %c0_11 = arith.constant 0 : index
    %c0_12 = arith.constant 0 : index
    %8 = vector.load %arg3[%c1, %c0_11, %c0_12] : memref<16x32x32xf32, #tpu.memory_space<vmem>>, vector<1x32x32xf32>
    %9 = vector.shape_cast %8 : vector<1x32x32xf32> to vector<32x32xf32>
    %cst_13 = arith.constant dense<0.000000e+00> : vector<32x256xf32>
    %10 = tpu.matmul %9, %3, %cst_13 {dimension_numbers = #tpu.dot_dimension_numbers<[1], [0], [0], [1], [0, 0, 1, 1], [], []>} : vector<32x32xf32>, vector<32x256xf32>, vector<32x256xf32> -> vector<32x256xf32>
    %c0_14 = arith.constant 0 : index
    %c256 = arith.constant 256 : index
    %11 = vector.load %arg11[%c0_14, %c256] : memref<32x4096xf32, #tpu.memory_space<vmem>>, vector<32x256xf32>
    tpu.vector_store %arg11[%c0_14, %c256], %10 {strides = array<i32>} : memref<32x4096xf32, #tpu.memory_space<vmem>>, vector<32x256xf32>,
    %c2 = arith.constant 2 : index
    %c0_15 = arith.constant 0 : index
    %c0_16 = arith.constant 0 : index
    %12 = vector.load %arg3[%c2, %c0_15, %c0_16] : memref<16x32x32xf32, #tpu.memory_space<vmem>>, vector<1x32x32xf32>
    %13 = vector.shape_cast %12 : vector<1x32x32xf32> to vector<32x32xf32>
    %cst_17 = arith.constant dense<0.000000e+00> : vector<32x256xf32>
    %14 = tpu.matmul %13, %3, %cst_17 {dimension_numbers = #tpu.dot_dimension_numbers<[1], [0], [0], [1], [0, 0, 1, 1], [], []>} : vector<32x32xf32>, vector<32x256xf32>, vector<32x256xf32> -> vector<32x256xf32>
    %c0_18 = arith.constant 0 : index
    %c512 = arith.constant 512 : index
    %15 = vector.load %arg11[%c0_18, %c512] : memref<32x4096xf32, #tpu.memory_space<vmem>>, vector<32x256xf32>
    tpu.vector_store %arg11[%c0_18, %c512], %14 {strides = array<i32>} : memref<32x4096xf32, #tpu.memory_space<vmem>>, vector<32x256xf32>,
    %c3 = arith.constant 3 : index
    %c0_19 = arith.constant 0 : index
    %c0_20 = arith.constant 0 : index
    %16 = vector.load %arg3[%c3, %c0_19, %c0_20] : memref<16x32x32xf32, #tpu.memory_space<vmem>>, vector<1x32x32xf32>
    %17 = vector.shape_cast %16 : vector<1x32x32xf32> to vector<32x32xf32>
    %cst_21 = arith.constant dense<0.000000e+00> : vector<32x256xf32>
    %18 = tpu.matmul %17, %3, %cst_21 {dimension_numbers = #tpu.dot_dimension_numbers<[1], [0], [0], [1], [0, 0, 1, 1], [], []>} : vector<32x32xf32>, vector<32x256xf32>, vector<32x256xf32> -> vector<32x256xf32>
    %c0_22 = arith.constant 0 : index
    %c768 = arith.constant 768 : index
    %19 = vector.load %arg11[%c0_22, %c768] : memref<32x4096xf32, #tpu.memory_space<vmem>>, vector<32x256xf32>
    tpu.vector_store %arg11[%c0_22, %c768], %18 {strides = array<i32>} : memref<32x4096xf32, #tpu.memory_space<vmem>>, vector<32x256xf32>,
    %c4 = arith.constant 4 : index
    %c0_23 = arith.constant 0 : index
    %c0_24 = arith.constant 0 : index
    %20 = vector.load %arg3[%c4, %c0_23, %c0_24] : memref<16x32x32xf32, #tpu.memory_space<vmem>>, vector<1x32x32xf32>
    %21 = vector.shape_cast %20 : vector<1x32x32xf32> to vector<32x32xf32>
    %cst_25 = arith.constant dense<0.000000e+00> : vector<32x256xf32>
    %22 = tpu.matmul %21, %3, %cst_25 {dimension_numbers = #tpu.dot_dimension_numbers<[1], [0], [0], [1], [0, 0, 1, 1], [], []>} : vector<32x32xf32>, vector<32x256xf32>, vector<32x256xf32> -> vector<32x256xf32>
    %c0_26 = arith.constant 0 : index
    %c1024 = arith.constant 1024 : index
    %23 = vector.load %arg11[%c0_26, %c1024] : memref<32x4096xf32, #tpu.memory_space<vmem>>, vector<32x256xf32>
    tpu.vector_store %arg11[%c0_26, %c1024], %22 {strides = array<i32>} : memref<32x4096xf32, #tpu.memory_space<vmem>>, vector<32x256xf32>,
    %c5 = arith.constant 5 : index
    %c0_27 = arith.constant 0 : index
    %c0_28 = arith.constant 0 : index
    %24 = vector.load %arg3[%c5, %c0_27, %c0_28] : memref<16x32x32xf32, #tpu.memory_space<vmem>>, vector<1x32x32xf32>
    %25 = vector.shape_cast %24 : vector<1x32x32xf32> to vector<32x32xf32>
    %cst_29 = arith.constant dense<0.000000e+00> : vector<32x256xf32>
    %26 = tpu.matmul %25, %3, %cst_29 {dimension_numbers = #tpu.dot_dimension_numbers<[1], [0], [0], [1], [0, 0, 1, 1], [], []>} : vector<32x32xf32>, vector<32x256xf32>, vector<32x256xf32> -> vector<32x256xf32>
    %c0_30 = arith.constant 0 : index
    %c1280 = arith.constant 1280 : index
    %27 = vector.load %arg11[%c0_30, %c1280] : memref<32x4096xf32, #tpu.memory_space<vmem>>, vector<32x256xf32>
    tpu.vector_store %arg11[%c0_30, %c1280], %26 {strides = array<i32>} : memref<32x4096xf32, #tpu.memory_space<vmem>>, vector<32x256xf32>,
    %c6 = arith.constant 6 : index
    %c0_31 = arith.constant 0 : index
    %c0_32 = arith.constant 0 : index
    %28 = vector.load %arg3[%c6, %c0_31, %c0_32] : memref<16x32x32xf32, #tpu.memory_space<vmem>>, vector<1x32x32xf32>
    %29 = vector.shape_cast %28 : vector<1x32x32xf32> to vector<32x32xf32>
    %cst_33 = arith.constant dense<0.000000e+00> : vector<32x256xf32>
    %30 = tpu.matmul %29, %3, %cst_33 {dimension_numbers = #tpu.dot_dimension_numbers<[1], [0], [0], [1], [0, 0, 1, 1], [], []>} : vector<32x32xf32>, vector<32x256xf32>, vector<32x256xf32> -> vector<32x256xf32>
    %c0_34 = arith.constant 0 : index
    %c1536 = arith.constant 1536 : index
    %31 = vector.load %arg11[%c0_34, %c1536] : memref<32x4096xf32, #tpu.memory_space<vmem>>, vector<32x256xf32>
    tpu.vector_store %arg11[%c0_34, %c1536], %30 {strides = array<i32>} : memref<32x4096xf32, #tpu.memory_space<vmem>>, vector<32x256xf32>,
    %c7 = arith.constant 7 : index
    %c0_35 = arith.constant 0 : index
    %c0_36 = arith.constant 0 : index
    %32 = vector.load %arg3[%c7, %c0_35, %c0_36] : memref<16x32x32xf32, #tpu.memory_space<vmem>>, vector<1x32x32xf32>
    %33 = vector.shape_cast %32 : vector<1x32x32xf32> to vector<32x32xf32>
    %cst_37 = arith.constant dense<0.000000e+00> : vector<32x256xf32>
    %34 = tpu.matmul %33, %3, %cst_37 {dimension_numbers = #tpu.dot_dimension_numbers<[1], [0], [0], [1], [0, 0, 1, 1], [], []>} : vector<32x32xf32>, vector<32x256xf32>, vector<32x256xf32> -> vector<32x256xf32>
    %c0_38 = arith.constant 0 : index
    %c1792 = arith.constant 1792 : index
    %35 = vector.load %arg11[%c0_38, %c1792] : memref<32x4096xf32, #tpu.memory_space<vmem>>, vector<32x256xf32>
    tpu.vector_store %arg11[%c0_38, %c1792], %34 {strides = array<i32>} : memref<32x4096xf32, #tpu.memory_space<vmem>>, vector<32x256xf32>,
    %c8 = arith.constant 8 : index
    %c0_39 = arith.constant 0 : index
    %c0_40 = arith.constant 0 : index
    %36 = vector.load %arg3[%c8, %c0_39, %c0_40] : memref<16x32x32xf32, #tpu.memory_space<vmem>>, vector<1x32x32xf32>
    %37 = vector.shape_cast %36 : vector<1x32x32xf32> to vector<32x32xf32>
    %cst_41 = arith.constant dense<0.000000e+00> : vector<32x256xf32>
    %38 = tpu.matmul %37, %3, %cst_41 {dimension_numbers = #tpu.dot_dimension_numbers<[1], [0], [0], [1], [0, 0, 1, 1], [], []>} : vector<32x32xf32>, vector<32x256xf32>, vector<32x256xf32> -> vector<32x256xf32>
    %c0_42 = arith.constant 0 : index
    %c2048 = arith.constant 2048 : index
    %39 = vector.load %arg11[%c0_42, %c2048] : memref<32x4096xf32, #tpu.memory_space<vmem>>, vector<32x256xf32>
    tpu.vector_store %arg11[%c0_42, %c2048], %38 {strides = array<i32>} : memref<32x4096xf32, #tpu.memory_space<vmem>>, vector<32x256xf32>,
    %c9 = arith.constant 9 : index
    %c0_43 = arith.constant 0 : index
    %c0_44 = arith.constant 0 : index
    %40 = vector.load %arg3[%c9, %c0_43, %c0_44] : memref<16x32x32xf32, #tpu.memory_space<vmem>>, vector<1x32x32xf32>
    %41 = vector.shape_cast %40 : vector<1x32x32xf32> to vector<32x32xf32>
    %cst_45 = arith.constant dense<0.000000e+00> : vector<32x256xf32>
    %42 = tpu.matmul %41, %3, %cst_45 {dimension_numbers = #tpu.dot_dimension_numbers<[1], [0], [0], [1], [0, 0, 1, 1], [], []>} : vector<32x32xf32>, vector<32x256xf32>, vector<32x256xf32> -> vector<32x256xf32>
    %c0_46 = arith.constant 0 : index
    %c2304 = arith.constant 2304 : index
    %43 = vector.load %arg11[%c0_46, %c2304] : memref<32x4096xf32, #tpu.memory_space<vmem>>, vector<32x256xf32>
    tpu.vector_store %arg11[%c0_46, %c2304], %42 {strides = array<i32>} : memref<32x4096xf32, #tpu.memory_space<vmem>>, vector<32x256xf32>,
    %c10 = arith.constant 10 : index
    %c0_47 = arith.constant 0 : index
    %c0_48 = arith.constant 0 : index
    %44 = vector.load %arg3[%c10, %c0_47, %c0_48] : memref<16x32x32xf32, #tpu.memory_space<vmem>>, vector<1x32x32xf32>
    %45 = vector.shape_cast %44 : vector<1x32x32xf32> to vector<32x32xf32>
    %cst_49 = arith.constant dense<0.000000e+00> : vector<32x256xf32>
    %46 = tpu.matmul %45, %3, %cst_49 {dimension_numbers = #tpu.dot_dimension_numbers<[1], [0], [0], [1], [0, 0, 1, 1], [], []>} : vector<32x32xf32>, vector<32x256xf32>, vector<32x256xf32> -> vector<32x256xf32>
    %c0_50 = arith.constant 0 : index
    %c2560 = arith.constant 2560 : index
    %47 = vector.load %arg11[%c0_50, %c2560] : memref<32x4096xf32, #tpu.memory_space<vmem>>, vector<32x256xf32>
    tpu.vector_store %arg11[%c0_50, %c2560], %46 {strides = array<i32>} : memref<32x4096xf32, #tpu.memory_space<vmem>>, vector<32x256xf32>,
    %c11 = arith.constant 11 : index
    %c0_51 = arith.constant 0 : index
    %c0_52 = arith.constant 0 : index
    %48 = vector.load %arg3[%c11, %c0_51, %c0_52] : memref<16x32x32xf32, #tpu.memory_space<vmem>>, vector<1x32x32xf32>
    %49 = vector.shape_cast %48 : vector<1x32x32xf32> to vector<32x32xf32>
    %cst_53 = arith.constant dense<0.000000e+00> : vector<32x256xf32>
    %50 = tpu.matmul %49, %3, %cst_53 {dimension_numbers = #tpu.dot_dimension_numbers<[1], [0], [0], [1], [0, 0, 1, 1], [], []>} : vector<32x32xf32>, vector<32x256xf32>, vector<32x256xf32> -> vector<32x256xf32>
    %c0_54 = arith.constant 0 : index
    %c2816 = arith.constant 2816 : index
    %51 = vector.load %arg11[%c0_54, %c2816] : memref<32x4096xf32, #tpu.memory_space<vmem>>, vector<32x256xf32>
    tpu.vector_store %arg11[%c0_54, %c2816], %50 {strides = array<i32>} : memref<32x4096xf32, #tpu.memory_space<vmem>>, vector<32x256xf32>,
    %c12 = arith.constant 12 : index
    %c0_55 = arith.constant 0 : index
    %c0_56 = arith.constant 0 : index
    %52 = vector.load %arg3[%c12, %c0_55, %c0_56] : memref<16x32x32xf32, #tpu.memory_space<vmem>>, vector<1x32x32xf32>
    %53 = vector.shape_cast %52 : vector<1x32x32xf32> to vector<32x32xf32>
    %cst_57 = arith.constant dense<0.000000e+00> : vector<32x256xf32>
    %54 = tpu.matmul %53, %3, %cst_57 {dimension_numbers = #tpu.dot_dimension_numbers<[1], [0], [0], [1], [0, 0, 1, 1], [], []>} : vector<32x32xf32>, vector<32x256xf32>, vector<32x256xf32> -> vector<32x256xf32>
    %c0_58 = arith.constant 0 : index
    %c3072 = arith.constant 3072 : index
    %55 = vector.load %arg11[%c0_58, %c3072] : memref<32x4096xf32, #tpu.memory_space<vmem>>, vector<32x256xf32>
    tpu.vector_store %arg11[%c0_58, %c3072], %54 {strides = array<i32>} : memref<32x4096xf32, #tpu.memory_space<vmem>>, vector<32x256xf32>,
    %c13 = arith.constant 13 : index
    %c0_59 = arith.constant 0 : index
    %c0_60 = arith.constant 0 : index
    %56 = vector.load %arg3[%c13, %c0_59, %c0_60] : memref<16x32x32xf32, #tpu.memory_space<vmem>>, vector<1x32x32xf32>
    %57 = vector.shape_cast %56 : vector<1x32x32xf32> to vector<32x32xf32>
    %cst_61 = arith.constant dense<0.000000e+00> : vector<32x256xf32>
    %58 = tpu.matmul %57, %3, %cst_61 {dimension_numbers = #tpu.dot_dimension_numbers<[1], [0], [0], [1], [0, 0, 1, 1], [], []>} : vector<32x32xf32>, vector<32x256xf32>, vector<32x256xf32> -> vector<32x256xf32>
    %c0_62 = arith.constant 0 : index
    %c3328 = arith.constant 3328 : index
    %59 = vector.load %arg11[%c0_62, %c3328] : memref<32x4096xf32, #tpu.memory_space<vmem>>, vector<32x256xf32>
    tpu.vector_store %arg11[%c0_62, %c3328], %58 {strides = array<i32>} : memref<32x4096xf32, #tpu.memory_space<vmem>>, vector<32x256xf32>,
    %c14 = arith.constant 14 : index
    %c0_63 = arith.constant 0 : index
    %c0_64 = arith.constant 0 : index
    %60 = vector.load %arg3[%c14, %c0_63, %c0_64] : memref<16x32x32xf32, #tpu.memory_space<vmem>>, vector<1x32x32xf32>
    %61 = vector.shape_cast %60 : vector<1x32x32xf32> to vector<32x32xf32>
    %cst_65 = arith.constant dense<0.000000e+00> : vector<32x256xf32>
    %62 = tpu.matmul %61, %3, %cst_65 {dimension_numbers = #tpu.dot_dimension_numbers<[1], [0], [0], [1], [0, 0, 1, 1], [], []>} : vector<32x32xf32>, vector<32x256xf32>, vector<32x256xf32> -> vector<32x256xf32>
    %c0_66 = arith.constant 0 : index
    %c3584 = arith.constant 3584 : index
    %63 = vector.load %arg11[%c0_66, %c3584] : memref<32x4096xf32, #tpu.memory_space<vmem>>, vector<32x256xf32>
    tpu.vector_store %arg11[%c0_66, %c3584], %62 {strides = array<i32>} : memref<32x4096xf32, #tpu.memory_space<vmem>>, vector<32x256xf32>,
    %c15 = arith.constant 15 : index
    %c0_67 = arith.constant 0 : index
    %c0_68 = arith.constant 0 : index
    %64 = vector.load %arg3[%c15, %c0_67, %c0_68] : memref<16x32x32xf32, #tpu.memory_space<vmem>>, vector<1x32x32xf32>
    %65 = vector.shape_cast %64 : vector<1x32x32xf32> to vector<32x32xf32>
    %cst_69 = arith.constant dense<0.000000e+00> : vector<32x256xf32>
    %66 = tpu.matmul %65, %3, %cst_69 {dimension_numbers = #tpu.dot_dimension_numbers<[1], [0], [0], [1], [0, 0, 1, 1], [], []>} : vector<32x32xf32>, vector<32x256xf32>, vector<32x256xf32> -> vector<32x256xf32>
    %c0_70 = arith.constant 0 : index
    %c3840 = arith.constant 3840 : index
    %67 = vector.load %arg11[%c0_70, %c3840] : memref<32x4096xf32, #tpu.memory_space<vmem>>, vector<32x256xf32>
    tpu.vector_store %arg11[%c0_70, %c3840], %66 {strides = array<i32>} : memref<32x4096xf32, #tpu.memory_space<vmem>>, vector<32x256xf32>,
    %c0_71 = arith.constant 0 : index
    %c0_72 = arith.constant 0 : index
    %68 = vector.load %arg11[%c0_71, %c0_72] : memref<32x4096xf32, #tpu.memory_space<vmem>>, vector<32x4096xf32>
    %cst_73 = arith.constant dense<0xFF800000> : vector<32xf32>
    %69 = vector.multi_reduction <maximumf>, %68, %cst_73 [1] : vector<32x4096xf32> to vector<32xf32>
    %70 = vector.shape_cast %69 : vector<32xf32> to vector<32x1xf32>
    %71 = vector.broadcast %70 : vector<32x1xf32> to vector<32x4096xf32>
    %72 = arith.subf %68, %71 : vector<32x4096xf32>
    %73 = math.exp %72 : vector<32x4096xf32>
    %cst_74 = arith.constant dense<0.000000e+00> : vector<32xf32>
    %74 = vector.multi_reduction <add>, %73, %cst_74 [1] : vector<32x4096xf32> to vector<32xf32>
    %75 = vector.shape_cast %74 : vector<32xf32> to vector<32x1xf32>
    %76 = tpu.reciprocal %75 : vector<32x1xf32> -> vector<32x1xf32>
    %77 = vector.broadcast %76 : vector<32x1xf32> to vector<32x4096xf32>
    %78 = arith.mulf %73, %77 : vector<32x4096xf32>
    %c0_75 = arith.constant 0 : index
    %c0_76 = arith.constant 0 : index
    %c6_77 = arith.constant 6 : index
    %79 = vector.load %arg10[%c0_75, %c0_76, %c6_77] : memref<1x40x128xf32, #tpu.memory_space<vmem>>, vector<1x32x1xf32>
    %80 = vector.shape_cast %79 : vector<1x32x1xf32> to vector<32x1xf32>
    %81 = vector.shape_cast %76 : vector<32x1xf32> to vector<1x32x1xf32>
    tpu.vector_store %arg10[%c0_75, %c0_76, %c6_77], %81 {strides = array<i32>} : memref<1x40x128xf32, #tpu.memory_space<vmem>>, vector<1x32x1xf32>,
    %c0_78 = arith.constant 0 : index
    %c0_79 = arith.constant 0 : index
    %82 = vector.load %arg9[%c0_78, %c0_79] : memref<4096x8xf32, #tpu.memory_space<vmem>>, vector<4096x8xf32>
    %cst_80 = arith.constant dense<0.000000e+00> : vector<32x8xf32>
    %83 = tpu.matmul %78, %82, %cst_80 {dimension_numbers = #tpu.dot_dimension_numbers<[1], [0], [0], [1], [0, 0, 1, 1], [], []>} : vector<32x4096xf32>, vector<4096x8xf32>, vector<32x8xf32> -> vector<32x8xf32>
    %84 = vector.extract_strided_slice %83 {offsets = [0, 0], sizes = [32, 3], strides = [1, 1]} : vector<32x8xf32> to vector<32x3xf32>
    %cst_81 = arith.constant 5.000000e-01 : f32
    %85 = vector.broadcast %cst_81 : f32 to vector<32x3xf32>
    %86 = arith.subf %84, %85 : vector<32x3xf32>
    %c0_82 = arith.constant 0 : index
    %c0_83 = arith.constant 0 : index
    %c0_84 = arith.constant 0 : index
    %87 = vector.load %arg10[%c0_82, %c0_83, %c0_84] : memref<1x40x128xf32, #tpu.memory_space<vmem>>, vector<1x32x3xf32>
    %88 = vector.shape_cast %87 : vector<1x32x3xf32> to vector<32x3xf32>
    %89 = vector.shape_cast %86 : vector<32x3xf32> to vector<1x32x3xf32>
    tpu.vector_store %arg10[%c0_82, %c0_83, %c0_84], %89 {strides = array<i32>} : memref<1x40x128xf32, #tpu.memory_space<vmem>>, vector<1x32x3xf32>,
    %c0_85 = arith.constant 0 : index
    %c0_86 = arith.constant 0 : index
    %c0_87 = arith.constant 0 : index
    %90 = vector.load %arg2[%c0_85, %c0_86, %c0_87] : memref<1x256x32xf32, #tpu.memory_space<vmem>>, vector<1x256x32xf32>
    %91 = vector.shape_cast %90 : vector<1x256x32xf32> to vector<256x32xf32>
    %cst_88 = arith.constant 3.906250e-03 : f32
    %92 = vector.broadcast %cst_88 : f32 to vector<1x256xf32>
    %cst_89 = arith.constant dense<0.000000e+00> : vector<1x32xf32>
    %93 = tpu.matmul %92, %91, %cst_89 {dimension_numbers = #tpu.dot_dimension_numbers<[1], [0], [0], [1], [0, 0, 1, 1], [], []>} : vector<1x256xf32>, vector<256x32xf32>, vector<1x32xf32> -> vector<1x32xf32>
    %c0_90 = arith.constant 0 : index
    %c0_91 = arith.constant 0 : index
    %94 = vector.load %arg4[%c0_90, %c0_91] : memref<32x128xf32, #tpu.memory_space<vmem>>, vector<32x128xf32>
    %cst_92 = arith.constant dense<0.000000e+00> : vector<1x128xf32>
    %95 = tpu.matmul %93, %94, %cst_92 {dimension_numbers = #tpu.dot_dimension_numbers<[1], [0], [0], [1], [0, 0, 1, 1], [], []>} : vector<1x32xf32>, vector<32x128xf32>, vector<1x128xf32> -> vector<1x128xf32>
    %c0_93 = arith.constant 0 : index
    %c0_94 = arith.constant 0 : index
    %96 = vector.load %arg5[%c0_93, %c0_94] : memref<1x128xf32, #tpu.memory_space<vmem>>, vector<1x128xf32>
    %97 = arith.addf %95, %96 : vector<1x128xf32>
    %c0_95 = arith.constant 0 : index
    %c36 = arith.constant 36 : index
    %c0_96 = arith.constant 0 : index
    %98 = vector.load %arg10[%c0_95, %c36, %c0_96] : memref<1x40x128xf32, #tpu.memory_space<vmem>>, vector<1x1x128xf32>
    %99 = vector.shape_cast %98 : vector<1x1x128xf32> to vector<1x128xf32>
    %100 = vector.shape_cast %97 : vector<1x128xf32> to vector<1x1x128xf32>
    tpu.vector_store %arg10[%c0_95, %c36, %c0_96], %100 {strides = array<i32>} : memref<1x40x128xf32, #tpu.memory_space<vmem>>, vector<1x1x128xf32>,
    %c0_97 = arith.constant 0 : index
    %c0_98 = arith.constant 0 : index
    %101 = vector.load %arg6[%c0_97, %c0_98] : memref<128x128xf32, #tpu.memory_space<vmem>>, vector<128x128xf32>
    %cst_99 = arith.constant dense<0.000000e+00> : vector<1x128xf32>
    %102 = tpu.matmul %97, %101, %cst_99 {dimension_numbers = #tpu.dot_dimension_numbers<[1], [0], [0], [1], [0, 0, 1, 1], [], []>} : vector<1x128xf32>, vector<128x128xf32>, vector<1x128xf32> -> vector<1x128xf32>
    %c0_100 = arith.constant 0 : index
    %c0_101 = arith.constant 0 : index
    %103 = vector.load %arg7[%c0_100, %c0_101] : memref<1x128xf32, #tpu.memory_space<vmem>>, vector<1x128xf32>
    %104 = arith.addf %102, %103 : vector<1x128xf32>
    %c0_102 = arith.constant 0 : index
    %c0_103 = arith.constant 0 : index
    %105 = vector.load %arg8[%c0_102, %c0_103] : memref<1x128xf32, #tpu.memory_space<vmem>>, vector<1x128xf32>
    %106 = arith.addf %104, %105 : vector<1x128xf32>
    %cst_104 = arith.constant 0.000000e+00 : f32
    %107 = vector.broadcast %cst_104 : f32 to vector<1x128xf32>
    %108 = arith.subf %107, %104 : vector<1x128xf32>
    %109 = math.exp %108 : vector<1x128xf32>
    %cst_105 = arith.constant 1.000000e+00 : f32
    %110 = vector.broadcast %cst_105 : f32 to vector<1x128xf32>
    %111 = arith.addf %110, %109 : vector<1x128xf32>
    %cst_106 = arith.constant 1.000000e+00 : f32
    %112 = vector.broadcast %cst_106 : f32 to vector<1x128xf32>
    %113 = arith.divf %112, %111 : vector<1x128xf32>
    %c0_107 = arith.constant 0 : index
    %c32 = arith.constant 32 : index
    %c0_108 = arith.constant 0 : index
    %114 = vector.load %arg10[%c0_107, %c32, %c0_108] : memref<1x40x128xf32, #tpu.memory_space<vmem>>, vector<1x1x128xf32>
    %115 = vector.shape_cast %114 : vector<1x1x128xf32> to vector<1x128xf32>
    %116 = vector.shape_cast %104 : vector<1x128xf32> to vector<1x1x128xf32>
    tpu.vector_store %arg10[%c0_107, %c32, %c0_108], %116 {strides = array<i32>} : memref<1x40x128xf32, #tpu.memory_space<vmem>>, vector<1x1x128xf32>,
    %c0_109 = arith.constant 0 : index
    %c33 = arith.constant 33 : index
    %c0_110 = arith.constant 0 : index
    %117 = vector.load %arg10[%c0_109, %c33, %c0_110] : memref<1x40x128xf32, #tpu.memory_space<vmem>>, vector<1x1x128xf32>
    %118 = vector.shape_cast %117 : vector<1x1x128xf32> to vector<1x128xf32>
    %119 = vector.shape_cast %106 : vector<1x128xf32> to vector<1x1x128xf32>
    tpu.vector_store %arg10[%c0_109, %c33, %c0_110], %119 {strides = array<i32>} : memref<1x40x128xf32, #tpu.memory_space<vmem>>, vector<1x1x128xf32>,
    %c0_111 = arith.constant 0 : index
    %c34 = arith.constant 34 : index
    %c0_112 = arith.constant 0 : index
    %120 = vector.load %arg10[%c0_111, %c34, %c0_112] : memref<1x40x128xf32, #tpu.memory_space<vmem>>, vector<1x1x128xf32>
    %121 = vector.shape_cast %120 : vector<1x1x128xf32> to vector<1x128xf32>
    %122 = vector.shape_cast %113 : vector<1x128xf32> to vector<1x1x128xf32>
    tpu.vector_store %arg10[%c0_111, %c34, %c0_112], %122 {strides = array<i32>} : memref<1x40x128xf32, #tpu.memory_space<vmem>>, vector<1x1x128xf32>,
    %123 = vector.extract_strided_slice %106 {offsets = [0, 56], sizes = [1, 1], strides = [1, 1]} : vector<1x128xf32> to vector<1x1xf32>
    %cst_113 = arith.constant 2.560000e+02 : f32
    %124 = vector.broadcast %cst_113 : f32 to vector<1x1xf32>
    %125 = arith.mulf %124, %123 : vector<1x1xf32>
    %cst_114 = arith.constant 9.99999971E-10 : f32
    %126 = vector.broadcast %cst_114 : f32 to vector<1x1xf32>
    %127 = arith.addf %125, %126 : vector<1x1xf32>
    %cst_115 = arith.constant 1.000000e+03 : f32
    %128 = vector.broadcast %cst_115 : f32 to vector<1x1xf32>
    %129 = arith.divf %128, %127 : vector<1x1xf32>
    %130 = vector.extract_strided_slice %86 {offsets = [0, 2], sizes = [32, 1], strides = [1, 1]} : vector<32x3xf32> to vector<32x1xf32>
    %131 = vector.extract_strided_slice %86 {offsets = [0, 0], sizes = [32, 2], strides = [1, 1]} : vector<32x3xf32> to vector<32x2xf32>
    %cst_116 = arith.constant 2.560000e-01 : f32
    %132 = vector.broadcast %cst_116 : f32 to vector<32x2xf32>
    %133 = arith.mulf %131, %132 : vector<32x2xf32>
    %cst_117 = arith.constant 2.000000e+00 : f32
    %134 = vector.broadcast %cst_117 : f32 to vector<32x1xf32>
    %135 = arith.mulf %130, %134 : vector<32x1xf32>
    %136 = vector.broadcast %129 : vector<1x1xf32> to vector<32x1xf32>
    %137 = arith.addf %135, %136 : vector<32x1xf32>
    %138 = vector.broadcast %137 : vector<32x1xf32> to vector<32x2xf32>
    %139 = arith.mulf %133, %138 : vector<32x2xf32>
    %cst_118 = arith.constant 5.000000e-01 : f32
    %140 = vector.broadcast %cst_118 : f32 to vector<32x2xf32>
    %141 = arith.mulf %139, %140 : vector<32x2xf32>
    %142 = vector.extract_strided_slice %141 {offsets = [0, 0], sizes = [1, 2], strides = [1, 1]} : vector<32x2xf32> to vector<1x2xf32>
    %143 = vector.broadcast %142 : vector<1x2xf32> to vector<32x2xf32>
    %144 = arith.subf %141, %143 : vector<32x2xf32>
    %c0_119 = arith.constant 0 : index
    %c0_120 = arith.constant 0 : index
    %c3_121 = arith.constant 3 : index
    %145 = vector.load %arg10[%c0_119, %c0_120, %c3_121] : memref<1x40x128xf32, #tpu.memory_space<vmem>>, vector<1x32x2xf32>
    %146 = vector.shape_cast %145 : vector<1x32x2xf32> to vector<32x2xf32>
    %147 = vector.shape_cast %144 : vector<32x2xf32> to vector<1x32x2xf32>
    tpu.vector_store %arg10[%c0_119, %c0_120, %c3_121], %147 {strides = array<i32>} : memref<1x40x128xf32, #tpu.memory_space<vmem>>, vector<1x32x2xf32>,
    %148 = vector.extract_strided_slice %130 {offsets = [0, 0], sizes = [1, 1], strides = [1, 1]} : vector<32x1xf32> to vector<1x1xf32>
    %149 = vector.broadcast %148 : vector<1x1xf32> to vector<32x1xf32>
    %150 = arith.subf %130, %149 : vector<32x1xf32>
    %c0_122 = arith.constant 0 : index
    %c0_123 = arith.constant 0 : index
    %c5_124 = arith.constant 5 : index
    %151 = vector.load %arg10[%c0_122, %c0_123, %c5_124] : memref<1x40x128xf32, #tpu.memory_space<vmem>>, vector<1x32x1xf32>
    %152 = vector.shape_cast %151 : vector<1x32x1xf32> to vector<32x1xf32>
    %153 = vector.shape_cast %150 : vector<32x1xf32> to vector<1x32x1xf32>
    tpu.vector_store %arg10[%c0_122, %c0_123, %c5_124], %153 {strides = array<i32>} : memref<1x40x128xf32, #tpu.memory_space<vmem>>, vector<1x32x1xf32>,
    %154 = vector.extract_strided_slice %141 {offsets = [0, 0], sizes = [1, 2], strides = [1, 1]} : vector<32x2xf32> to vector<1x2xf32>
    %cst_125 = arith.constant 2.000000e+00 : f32
    %155 = vector.broadcast %cst_125 : f32 to vector<1x2xf32>
    %156 = arith.mulf %154, %155 : vector<1x2xf32>
    %c0_126 = arith.constant 0 : index
    %c35 = arith.constant 35 : index
    %c0_127 = arith.constant 0 : index
    %157 = vector.load %arg10[%c0_126, %c35, %c0_127] : memref<1x40x128xf32, #tpu.memory_space<vmem>>, vector<1x1x2xf32>
    %158 = vector.shape_cast %157 : vector<1x1x2xf32> to vector<1x2xf32>
    %159 = vector.shape_cast %156 : vector<1x2xf32> to vector<1x1x2xf32>
    tpu.vector_store %arg10[%c0_126, %c35, %c0_127], %159 {strides = array<i32>} : memref<1x40x128xf32, #tpu.memory_space<vmem>>, vector<1x1x2xf32>,
    %160 = vector.extract_strided_slice %130 {offsets = [0, 0], sizes = [1, 1], strides = [1, 1]} : vector<32x1xf32> to vector<1x1xf32>
    %cst_128 = arith.constant 2.000000e+00 : f32
    %161 = vector.broadcast %cst_128 : f32 to vector<1x1xf32>
    %162 = arith.mulf %160, %161 : vector<1x1xf32>
    %163 = arith.addf %162, %129 : vector<1x1xf32>
    %c0_129 = arith.constant 0 : index
    %c35_130 = arith.constant 35 : index
    %c2_131 = arith.constant 2 : index
    %164 = vector.load %arg10[%c0_129, %c35_130, %c2_131] : memref<1x40x128xf32, #tpu.memory_space<vmem>>, vector<1x1x1xf32>
    %165 = vector.shape_cast %164 : vector<1x1x1xf32> to vector<1x1xf32>
    %166 = vector.shape_cast %163 : vector<1x1xf32> to vector<1x1x1xf32>
    tpu.vector_store %arg10[%c0_129, %c35_130, %c2_131], %166 {strides = array<i32>} : memref<1x40x128xf32, #tpu.memory_space<vmem>>, vector<1x1x1xf32>,
    return
  }
  func.func @transform_0(%arg0: i32) -> (i32, i32, i32) {
    %c0_i32 = arith.constant 0 : i32
    %c0_i32_0 = arith.constant 0 : i32
    %c0_i32_1 = arith.constant 0 : i32
    return %arg0, %c0_i32, %c0_i32_0 : i32, i32, i32
  }
  func.func @transform_1(%arg0: i32) -> (i32, i32, i32) {
    %c0_i32 = arith.constant 0 : i32
    %c0_i32_0 = arith.constant 0 : i32
    %c0_i32_1 = arith.constant 0 : i32
    return %arg0, %c0_i32, %c0_i32_0 : i32, i32, i32
  }
  func.func @transform_2(%arg0: i32) -> (i32, i32, i32) {
    %c0_i32 = arith.constant 0 : i32
    %c0_i32_0 = arith.constant 0 : i32
    %c0_i32_1 = arith.constant 0 : i32
    %c0_i32_2 = arith.constant 0 : i32
    return %c0_i32, %c0_i32_0, %c0_i32_1 : i32, i32, i32
  }
  func.func @transform_3(%arg0: i32) -> (i32, i32) {
    %c0_i32 = arith.constant 0 : i32
    %c0_i32_0 = arith.constant 0 : i32
    %c0_i32_1 = arith.constant 0 : i32
    return %c0_i32, %c0_i32_0 : i32, i32
  }
  func.func @transform_4(%arg0: i32) -> (i32, i32) {
    %c0_i32 = arith.constant 0 : i32
    %c0_i32_0 = arith.constant 0 : i32
    %c0_i32_1 = arith.constant 0 : i32
    return %c0_i32, %c0_i32_0 : i32, i32
  }
  func.func @transform_5(%arg0: i32) -> (i32, i32) {
    %c0_i32 = arith.constant 0 : i32
    %c0_i32_0 = arith.constant 0 : i32
    %c0_i32_1 = arith.constant 0 : i32
    return %c0_i32, %c0_i32_0 : i32, i32
  }
  func.func @transform_6(%arg0: i32) -> (i32, i32) {
    %c0_i32 = arith.constant 0 : i32
    %c0_i32_0 = arith.constant 0 : i32
    %c0_i32_1 = arith.constant 0 : i32
    return %c0_i32, %c0_i32_0 : i32, i32
  }
  func.func @transform_7(%arg0: i32) -> (i32, i32) {
    %c0_i32 = arith.constant 0 : i32
    %c0_i32_0 = arith.constant 0 : i32
    %c0_i32_1 = arith.constant 0 : i32
    return %c0_i32, %c0_i32_0 : i32, i32
  }
  func.func @transform_8(%arg0: i32) -> (i32, i32) {
    %c0_i32 = arith.constant 0 : i32
    %c0_i32_0 = arith.constant 0 : i32
    %c0_i32_1 = arith.constant 0 : i32
    return %c0_i32, %c0_i32_0 : i32, i32
  }
  func.func @transform_9(%arg0: i32) -> (i32, i32, i32) {
    %c0_i32 = arith.constant 0 : i32
    %c0_i32_0 = arith.constant 0 : i32
    %c0_i32_1 = arith.constant 0 : i32
    return %arg0, %c0_i32, %c0_i32_0 : i32, i32, i32
  }
}

</mosaic_0001>

<bundles_post_ra>
// kernel: hrnet_smpl_cam_forward.1
= control target key start
LH: loop header
LB: loop body
LE: loop exit
PB: predicated region body
PF: predicated region fallthrough
CT: control target
= control target key end

     0   :  { %s7460_s30 = smov 0   ;;  %s11062_s0 = inlined_call_operand.vmem [shape: f32[2,32,256], index: 0, kind: input, shape index: {}]   ;;  %s11063_s1 = inlined_call_operand.vmem [shape: f32[2,256,32], index: 1, kind: input, shape index: {}]   ;;  %s11064_s2 = inlined_call_operand.vmem [shape: f32[16,32,32], index: 2, kind: input, shape index: {}]   ;;  %s11065_s3 = inlined_call_operand.vmem [shape: f32[32,128], index: 3, kind: input, shape index: {}]   ;;  %s11066_s4 = inlined_call_operand.vmem [shape: f32[1,128], index: 4, kind: input, shape index: {}]   ;;  %s11067_s5 = inlined_call_operand.vmem [shape: f32[128,128], index: 5, kind: input, shape index: {}]   ;;  %s11068_s6 = inlined_call_operand.vmem [shape: f32[1,128], index: 6, kind: input, shape index: {}]   ;;  %s11069_s7 = inlined_call_operand.vmem [shape: f32[1,128], index: 7, kind: input, shape index: {}]   ;;  %s11070_s8 = inlined_call_operand.vmem [shape: f32[4096,8], index: 8, kind: input, shape index: {}]   ;;  %s11071_s9 = inlined_call_operand.vmem [shape: f32[2,40,128], index: 9, kind: output, shape index: {}]  }
   0x1 LB: > { %s5450_s10 = sadd.s32 4294967295, %s7401_s30   ;;  %p5454_p0 = scmp.ge.s32.totalorder %s7401_s30, 1  ;;  %s7401_s30 = sphi %s7460_s30, %s19_s30  }
   0x2   : > { %p297_p1 = scmp.lt.s32.totalorder %s7401_s30, 3 }
   0x4   : > { %p298_p2 = pnand %p5454_p0, %p297_p1 }
   0x6   : > { %301 = sbr.rel (%p298_p2) target bundleno = 2118 (0x846), region = 56 }
   0xd   : > { %p338_p3 = scmp.lt.s32.totalorder %s5450_s10, 1  ;;  %v7403_v0 = vmov 0.0   ;;  %v366_v13 = vld [vmem:[%s11064_s2] sm:$0xff]  ;;  %vm370_vm0 = vcmask 261120   ;;  %v5466_v14 = vld [vmem:[%s11064_s2 + $0x30] sm:$0xff]  ;;  %v367_v15 = vld [vmem:[%s11064_s2 + $0x8] sm:$0xff] }
   0xe   : > { %447 = vmatprep.mubr.f32.mxu0 %v7403_v0  ;;  %573 = vmatprep.mubr.f32.mxu1 %v7403_v0  ;;  %v5467_v16 = vld [vmem:[%s11064_s2 + $0x38] sm:$0xff]  ;;  %v368_v17 = vld [vmem:[%s11064_s2 + $0x10] sm:$0xff]  ;;  %v5480_v18 = vld [vmem:[%s11064_s2 + $0x60] sm:$0xff]  ;;  %vm3098_vm1 = vcmask 56368   ;;  %vm7406_vm2 = vmmov 0   ;;  %vm4979_vm3 = vcmask 23552  }
   0xf   : > { %s11559_s10 = smov (!%p338_p3, %s5450_s10), 1  ;;  %v369_v19 = vld [vmem:[%s11064_s2 + $0x18] sm:$0xff]  ;;  %v5481_v20 = vld [vmem:[%s11064_s2 + $0x68] sm:$0xff]  ;;  %v5464_v21 = vld [vmem:[%s11064_s2 + $0x20] sm:$0xff]  ;;  %s7408_s29 = smov 74   ;;  %vm5374_vm4 = vcmask 8192  }
  0x10   : > { %s5591_s11 = sshll.u32 %s11559_s10, 6  ;;  %s7106_s15 = smul.u32 40, %s11559_s10  ;;  %v5482_v22 = vld [vmem:[%s11064_s2 + $0x70] sm:$0xff]  ;;  %v5465_v23 = vld [vmem:[%s11064_s2 + $0x28] sm:$0xff]  ;;  %v5483_v24 = vld [vmem:[%s11064_s2 + $0x78] sm:$0xff]  ;;  %vm5381_vm5 = vcmask 16400  }
  0x11   : > { %s342_s14 = scalar_lea.vmem %s11062_s0, %s5591_s11  ;;  %v5472_v25 = vld [vmem:[%s11064_s2 + $0x40] sm:$0xff]  ;;  %v5473_v27 = vld [vmem:[%s11064_s2 + $0x48] sm:$0xff]  ;;  %v5474_v29 = vld [vmem:[%s11064_s2 + $0x50] sm:$0xff]  ;;  %s5592_s12 = sshll.u32 %s11559_s10, 8  ;;  %vm5339_vm6 = vcmask 39960   ;;  %vm5368_vm7 = vcmask 48168  }
  0x12   : > { %v359_v1 = vld [vmem:[%s342_s14 + $0x8] sm:$0xff]  ;;  %v361_v2 = vld [vmem:[%s342_s14 + $0x18] sm:$0xff]  ;;  %v358_v3 = vld [vmem:[%s342_s14] sm:$0xff]  ;;  %s7482_s18 = scalar_lea.vmem %s11071_s9, %s7106_s15  ;;  %s10820_s13 = scalar_lea.vmem %s11063_s1, %s5592_s12 }
  0x13   : > { %v7477_v4 = vpack.c.bf16 %v361_v2, %v359_v1  ;;  %v360_v5 = vld [vmem:[%s342_s14 + $0x10] sm:$0xff]  ;;  %v363_v6 = vld [vmem:[%s342_s14 + $0x28] sm:$0xff]  ;;  %v365_v7 = vld [vmem:[%s342_s14 + $0x38] sm:$0xff]  ;;  %353 = vst [vmem:[%s7482_s18] sm:$0xff] %v7403_v0  ;;  %s7409_s11 = smov 3  }
  0x14   : > { %v7484_v8 = vpack.c.bf16 %v360_v5, %v358_v3  ;;  %v7486_v9 = vpack.c.bf16 %v365_v7, %v363_v6  ;;  %v362_v10 = vld [vmem:[%s342_s14 + $0x20] sm:$0xff]  ;;  %v364_v11 = vld [vmem:[%s342_s14 + $0x30] sm:$0xff]  ;;  %354 = vst [vmem:[%s7482_s18 + $0x8] sm:$0xff] %v7403_v0  ;;  %355 = vst [vmem:[%s7482_s18 + $0x10] sm:$0xff] %v7403_v0 }
  0x15   : > { %6401 = vmatprep.subr.bf16.mxu0 %v7477_v4  ;;  %356 = vst [vmem:[%s7482_s18 + $0x18] sm:$0xff] %v7403_v0  ;;  %357 = vst [vmem:[%s7482_s18 + $0x20] sm:$0xff] %v7403_v0  ;;  %7102 = vmatprep.subr.bf16.mxu1 %v7477_v4  ;;  %v7501_v12 = vpack.c.bf16 %v364_v11, %v362_v10  ;;  %v5496_v26 = vld [vmem:[%s11064_s2 + $0xa0] sm:$0xff]  ;;  %v5497_v28 = vld [vmem:[%s11064_s2 + $0xa8] sm:$0xff] }
  0x16   : > { %6403 = vmatpush1.bf16.msra.mxu0 %v7484_v8  ;;  %7104 = vmatpush1.bf16.msra.mxu1 %v7484_v8  ;;  %v5498_v30 = vld [vmem:[%s11064_s2 + $0xb0] sm:$0xff]  ;;  %v5475_v31 = vld [vmem:[%s11064_s2 + $0x58] sm:$0xff]  ;;  %v5488_v33 = vld [vmem:[%s11064_s2 + $0x80] sm:$0xff] }
  0x17   : > { %6405 = vmatprep.subr.bf16.mxu0 %v7486_v9  ;;  %7103 = vmatprep.subr.bf16.mxu1 %v7486_v9  ;;  %v5499_v32 = vld [vmem:[%s11064_s2 + $0xb8] sm:$0xff]  ;;  %v5512_v34 = vld [vmem:[%s11064_s2 + $0xe0] sm:$0xff]  ;;  %v5489_v35 = vld [vmem:[%s11064_s2 + $0x88] sm:$0xff] }
  0x18   : > { %v5513_v36 = vld [vmem:[%s11064_s2 + $0xe8] sm:$0xff]  ;;  %v5490_v37 = vld [vmem:[%s11064_s2 + $0x90] sm:$0xff]  ;;  %v5491_v39 = vld [vmem:[%s11064_s2 + $0x98] sm:$0xff] }
  0x19   : > { %v5514_v38 = vld [vmem:[%s11064_s2 + $0xf0] sm:$0xff]  ;;  %v5515_v40 = vld [vmem:[%s11064_s2 + $0xf8] sm:$0xff]  ;;  %v5504_v41 = vld [vmem:[%s11064_s2 + $0xc0] sm:$0xff] }
  0x1a   : > { %6407 = vmatpush1.bf16.msra.mxu0 %v7501_v12  ;;  %7105 = vmatpush1.bf16.msra.mxu1 %v7501_v12  ;;  %v5528_v42 = vld [vmem:[%s11064_s2 + $0x120] sm:$0xff]  ;;  %v5505_v43 = vld [vmem:[%s11064_s2 + $0xc8] sm:$0xff]  ;;  %v5506_v45 = vld [vmem:[%s11064_s2 + $0xd0] sm:$0xff] }
  0x1b   : > { %6409 = vmatprep.subr.bf16.mxu0 %v7477_v4  ;;  %6425 = vmatprep.subr.bf16.mxu1 %v7477_v4  ;;  %v5529_v44 = vld [vmem:[%s11064_s2 + $0x128] sm:$0xff]  ;;  %v5530_v46 = vld [vmem:[%s11064_s2 + $0x130] sm:$0xff]  ;;  %v5507_v47 = vld [vmem:[%s11064_s2 + $0xd8] sm:$0xff] }
  0x1c   : > { %v5531_v48 = vld [vmem:[%s11064_s2 + $0x138] sm:$0xff]  ;;  %v5520_v49 = vld [vmem:[%s11064_s2 + $0x100] sm:$0xff]  ;;  %v5521_v51 = vld [vmem:[%s11064_s2 + $0x108] sm:$0xff] }
  0x1d   : > { %5460 = vmatmul.mubr.msk.f32.vlgmr.msra.gmra.mrb[0].mxu0 %vm370_vm0, %v366_v13  ;;  %5470 = vmatmul.mubr.msk.f32.vlgmr.msra.gmra.mrb[0].mxu1 %vm370_vm0, %v5466_v14  ;;  %v5544_v50 = vld [vmem:[%s11064_s2 + $0x160] sm:$0xff]  ;;  %v5545_v52 = vld [vmem:[%s11064_s2 + $0x168] sm:$0xff]  ;;  %v5522_v53 = vld [vmem:[%s11064_s2 + $0x110] sm:$0xff] }
  0x1e   : > { %6411 = vmatpush1.bf16.msra.mxu0 %v7484_v8  ;;  %453 = vmatprep.mubr.f32.mxu0 %v7403_v0  ;;  %v5546_v54 = vld [vmem:[%s11064_s2 + $0x170] sm:$0xff]  ;;  %v5523_v55 = vld [vmem:[%s11064_s2 + $0x118] sm:$0xff]  ;;  %v5536_v57 = vld [vmem:[%s11064_s2 + $0x140] sm:$0xff] }
  0x1f   : > { %6413 = vmatprep.subr.bf16.mxu0 %v7486_v9  ;;  %579 = vmatprep.mubr.f32.mxu1 %v7403_v0  ;;  %v5547_v56 = vld [vmem:[%s11064_s2 + $0x178] sm:$0xff]  ;;  %v5560_v58 = vld [vmem:[%s11064_s2 + $0x1a0] sm:$0xff]  ;;  %v5537_v59 = vld [vmem:[%s11064_s2 + $0x148] sm:$0xff] }
  0x20   : > { %6427 = vmatpush1.bf16.msra.mxu1 %v7484_v8  ;;  %v5561_v60 = vld [vmem:[%s11064_s2 + $0x1a8] sm:$0xff]  ;;  %v5538_v61 = vld [vmem:[%s11064_s2 + $0x150] sm:$0xff]  ;;  %v5539_v63 = vld [vmem:[%s11064_s2 + $0x158] sm:$0xff] }
  0x21   : > { %5461 = vmatmul.mubr.msk.f32.gmra.mrb[2].mxu0 %vm370_vm0, %v367_v15  ;;  %5471 = vmatmul.mubr.msk.f32.gmra.mrb[2].mxu1 %vm370_vm0, %v5467_v16  ;;  %v5562_v62 = vld [vmem:[%s11064_s2 + $0x1b0] sm:$0xff]  ;;  %v5563_v1 = vld [vmem:[%s11064_s2 + $0x1b8] sm:$0xff]  ;;  %v5552_v2 = vld [vmem:[%s11064_s2 + $0x180] sm:$0xff] }
  0x22   : > { %459 = vmatprep.mubr.f32.mxu0 %v7403_v0  ;;  %6415 = vmatpush1.bf16.msra.mxu0 %v7501_v12  ;;  %v5576_v3 = vld [vmem:[%s11064_s2 + $0x1e0] sm:$0xff]  ;;  %v5577_v5 = vld [vmem:[%s11064_s2 + $0x1e8] sm:$0xff]  ;;  %v5554_v6 = vld [vmem:[%s11064_s2 + $0x190] sm:$0xff] }
  0x23   : > { %6417 = vmatprep.subr.bf16.mxu0 %v7477_v4  ;;  %6429 = vmatprep.subr.bf16.mxu1 %v7486_v9  ;;  %v5578_v7 = vld [vmem:[%s11064_s2 + $0x1f0] sm:$0xff]  ;;  %v5568_v10 = vld [vmem:[%s11064_s2 + $0x1c0] sm:$0xff]  ;;  %v5569_v11 = vld [vmem:[%s11064_s2 + $0x1c8] sm:$0xff] }
  0x24   : > { %6431 = vmatpush1.bf16.msra.mxu1 %v7501_v12  ;;  %789 = vmatprep.mubr.f32.mxu1 %v7403_v0  ;;  %v5571_v13 = vld [vmem:[%s11064_s2 + $0x1d8] sm:$0xff] }
  0x25   : > { %5462 = vmatmul.mubr.msk.f32.gmra.mrb[4].mxu0 %vm370_vm0, %v368_v17  ;;  %6441 = vmatprep.subr.bf16.mxu1 %v7477_v4 }
  0x26   : > { %465 = vmatprep.mubr.f32.mxu0 %v7403_v0 }
  0x27   : > { %5484 = vmatmul.mubr.msk.f32.vlgmr.msra.gmra.mrb[4].mxu1 %vm370_vm0, %v5480_v18 }
  0x28   : > { %6443 = vmatpush1.bf16.msra.mxu1 %v7484_v8  ;;  %795 = vmatprep.mubr.f32.mxu1 %v7403_v0 }
  0x29   : > { %5463 = vmatmul.mubr.msk.f32.gmra.mrb[6].mxu0 %vm370_vm0, %v369_v19  ;;  %6445 = vmatprep.subr.bf16.mxu1 %v7486_v9 }
  0x2a   : > { %561 = vmatprep.mubr.f32.mxu0 %v7403_v0 }
  0x2b   : > { %5485 = vmatmul.mubr.msk.f32.gmra.mrb[6].mxu1 %vm370_vm0, %v5481_v20 }
  0x2c   : > { %801 = vmatprep.mubr.f32.mxu1 %v7403_v0  ;;  %6447 = vmatpush1.bf16.msra.mxu1 %v7501_v12 }
  0x2d   : > { %5468 = vmatmul.mubr.msk.f32.vlgmr.msra.gmra.mrb[8].mxu0 %vm370_vm0, %v5464_v21  ;;  %6457 = vmatprep.subr.bf16.mxu1 %v7477_v4 }
  0x2e   : > { %6419 = vmatpush1.bf16.msra.mxu0 %v7484_v8  ;;  %567 = vmatprep.mubr.f32.mxu0 %v7403_v0 }
  0x2f   : > { %6421 = vmatprep.subr.bf16.mxu0 %v7486_v9  ;;  %5486 = vmatmul.mubr.msk.f32.gmra.mrb[8].mxu1 %vm370_vm0, %v5482_v22 }
  0x30   : > { %807 = vmatprep.mubr.f32.mxu1 %v7403_v0 }
  0x31   : > { %5469 = vmatmul.mubr.msk.f32.gmra.mrb[10].mxu0 %vm370_vm0, %v5465_v23 }
  0x32   : > { %6423 = vmatpush1.bf16.msra.mxu0 %v7501_v12  ;;  %675 = vmatprep.mubr.f32.mxu0 %v7403_v0 }
  0x33   : > { %6433 = vmatprep.subr.bf16.mxu0 %v7477_v4  ;;  %5487 = vmatmul.mubr.msk.f32.gmra.mrb[10].mxu1 %vm370_vm0, %v5483_v24 }
  0x34   : > { %1017 = vmatprep.mubr.f32.mxu1 %v7403_v0 }
  0x35   : > { %5476 = vmatmul.mubr.msk.f32.vlgmr.msra.gmra.mrb[12].mxu0 %vm370_vm0, %v5472_v25 }
  0x36   : > { %6435 = vmatpush1.bf16.msra.mxu0 %v7484_v8  ;;  %681 = vmatprep.mubr.f32.mxu0 %v7403_v0 }
  0x37   : > { %6437 = vmatprep.subr.bf16.mxu0 %v7486_v9  ;;  %5500 = vmatmul.mubr.msk.f32.vlgmr.msra.gmra.mrb[12].mxu1 %vm370_vm0, %v5496_v26 }
  0x38   : > { %6459 = vmatpush1.bf16.msra.mxu1 %v7484_v8  ;;  %1023 = vmatprep.mubr.f32.mxu1 %v7403_v0 }
  0x39   : > { %5477 = vmatmul.mubr.msk.f32.gmra.mrb[14].mxu0 %vm370_vm0, %v5473_v27  ;;  %6461 = vmatprep.subr.bf16.mxu1 %v7486_v9 }
  0x3a   : > { %687 = vmatprep.mubr.f32.mxu0 %v7403_v0  ;;  %6439 = vmatpush1.bf16.msra.mxu0 %v7501_v12 }
  0x3b   : > { %6449 = vmatprep.subr.bf16.mxu0 %v7477_v4  ;;  %5501 = vmatmul.mubr.msk.f32.gmra.mrb[14].mxu1 %vm370_vm0, %v5497_v28 }
  0x3c   : > { %1029 = vmatprep.mubr.f32.mxu1 %v7403_v0  ;;  %6463 = vmatpush1.bf16.msra.mxu1 %v7501_v12 }
  0x3d   : > { %5478 = vmatmul.mubr.msk.f32.gmra.mrb[16].mxu0 %vm370_vm0, %v5474_v29  ;;  %6473 = vmatprep.subr.bf16.mxu1 %v7477_v4 }
  0x3e   : > { %693 = vmatprep.mubr.f32.mxu0 %v7403_v0 }
  0x3f   : > { %5502 = vmatmul.mubr.msk.f32.gmra.mrb[16].mxu1 %vm370_vm0, %v5498_v30 }
  0x40   : > { %1035 = vmatprep.mubr.f32.mxu1 %v7403_v0 }
  0x41   : > { %5479 = vmatmul.mubr.msk.f32.gmra.mrb[18].mxu0 %vm370_vm0, %v5475_v31 }
  0x42   : > { %903 = vmatprep.mubr.f32.mxu0 %v7403_v0 }
  0x43   : > { %5503 = vmatmul.mubr.msk.f32.gmra.mrb[18].mxu1 %vm370_vm0, %v5499_v32 }
  0x44   : > { %1245 = vmatprep.mubr.f32.mxu1 %v7403_v0 }
  0x45   : > { %5492 = vmatmul.mubr.msk.f32.vlgmr.msra.gmra.mrb[20].mxu0 %vm370_vm0, %v5488_v33 }
  0x46   : > { %6451 = vmatpush1.bf16.msra.mxu0 %v7484_v8  ;;  %909 = vmatprep.mubr.f32.mxu0 %v7403_v0 }
  0x47   : > { %6453 = vmatprep.subr.bf16.mxu0 %v7486_v9  ;;  %5516 = vmatmul.mubr.msk.f32.vlgmr.msra.gmra.mrb[20].mxu1 %vm370_vm0, %v5512_v34 }
  0x48   : > { %6475 = vmatpush1.bf16.msra.mxu1 %v7484_v8  ;;  %1251 = vmatprep.mubr.f32.mxu1 %v7403_v0 }
  0x49   : > { %5493 = vmatmul.mubr.msk.f32.gmra.mrb[22].mxu0 %vm370_vm0, %v5489_v35  ;;  %6477 = vmatprep.subr.bf16.mxu1 %v7486_v9 }
  0x4a   : > { %915 = vmatprep.mubr.f32.mxu0 %v7403_v0  ;;  %6455 = vmatpush1.bf16.msra.mxu0 %v7501_v12 }
  0x4b   : > { %6465 = vmatprep.subr.bf16.mxu0 %v7477_v4  ;;  %5517 = vmatmul.mubr.msk.f32.gmra.mrb[22].mxu1 %vm370_vm0, %v5513_v36 }
  0x4c   : > { %1257 = vmatprep.mubr.f32.mxu1 %v7403_v0  ;;  %6479 = vmatpush1.bf16.msra.mxu1 %v7501_v12 }
  0x4d   : > { %5494 = vmatmul.mubr.msk.f32.gmra.mrb[24].mxu0 %vm370_vm0, %v5490_v37  ;;  %6489 = vmatprep.subr.bf16.mxu1 %v7477_v4 }
  0x4e   : > { %921 = vmatprep.mubr.f32.mxu0 %v7403_v0 }
  0x4f   : > { %5518 = vmatmul.mubr.msk.f32.gmra.mrb[24].mxu1 %vm370_vm0, %v5514_v38 }
  0x50   : > { %1263 = vmatprep.mubr.f32.mxu1 %v7403_v0 }
  0x51   : > { %5495 = vmatmul.mubr.msk.f32.gmra.mrb[26].mxu0 %vm370_vm0, %v5491_v39 }
  0x52   : > { %1131 = vmatprep.mubr.f32.mxu0 %v7403_v0 }
  0x53   : > { %5519 = vmatmul.mubr.msk.f32.gmra.mrb[26].mxu1 %vm370_vm0, %v5515_v40 }
  0x54   : > { %1473 = vmatprep.mubr.f32.mxu1 %v7403_v0 }
  0x55   : > { %5508 = vmatmul.mubr.msk.f32.vlgmr.msra.gmra.mrb[28].mxu0 %vm370_vm0, %v5504_v41 }
  0x56   : > { %6467 = vmatpush1.bf16.msra.mxu0 %v7484_v8  ;;  %1137 = vmatprep.mubr.f32.mxu0 %v7403_v0 }
  0x57   : > { %6469 = vmatprep.subr.bf16.mxu0 %v7486_v9  ;;  %5532 = vmatmul.mubr.msk.f32.vlgmr.msra.gmra.mrb[28].mxu1 %vm370_vm0, %v5528_v42 }
  0x58   : > { %6491 = vmatpush1.bf16.msra.mxu1 %v7484_v8  ;;  %1479 = vmatprep.mubr.f32.mxu1 %v7403_v0 }
  0x59   : > { %5509 = vmatmul.mubr.msk.f32.gmra.mrb[30].mxu0 %vm370_vm0, %v5505_v43  ;;  %6493 = vmatprep.subr.bf16.mxu1 %v7486_v9 }
  0x5a   : > { %1143 = vmatprep.mubr.f32.mxu0 %v7403_v0  ;;  %6471 = vmatpush1.bf16.msra.mxu0 %v7501_v12 }
  0x5b   : > { %6481 = vmatprep.subr.bf16.mxu0 %v7477_v4  ;;  %5533 = vmatmul.mubr.msk.f32.gmra.mrb[30].mxu1 %vm370_vm0, %v5529_v44 }
  0x5c   : > { %1485 = vmatprep.mubr.f32.mxu1 %v7403_v0  ;;  %6495 = vmatpush1.bf16.msra.mxu1 %v7501_v12 }
  0x5d   : > { %5510 = vmatmul.mubr.msk.f32.gmra.mrb[32].mxu0 %vm370_vm0, %v5506_v45  ;;  %6505 = vmatprep.subr.bf16.mxu1 %v7477_v4 }
  0x5e   : > { %1149 = vmatprep.mubr.f32.mxu0 %v7403_v0 }
  0x5f   : > { %5534 = vmatmul.mubr.msk.f32.gmra.mrb[32].mxu1 %vm370_vm0, %v5530_v46 }
  0x60   : > { %1491 = vmatprep.mubr.f32.mxu1 %v7403_v0 }
  0x61   : > { %5511 = vmatmul.mubr.msk.f32.gmra.mrb[34].mxu0 %vm370_vm0, %v5507_v47 }
  0x62   : > { %1359 = vmatprep.mubr.f32.mxu0 %v7403_v0 }
  0x63   : > { %5535 = vmatmul.mubr.msk.f32.gmra.mrb[34].mxu1 %vm370_vm0, %v5531_v48 }
  0x64   : > { %1701 = vmatprep.mubr.f32.mxu1 %v7403_v0 }
  0x65   : > { %5524 = vmatmul.mubr.msk.f32.vlgmr.msra.gmra.mrb[36].mxu0 %vm370_vm0, %v5520_v49 }
  0x66   : > { %6483 = vmatpush1.bf16.msra.mxu0 %v7484_v8  ;;  %1365 = vmatprep.mubr.f32.mxu0 %v7403_v0 }
  0x67   : > { %6485 = vmatprep.subr.bf16.mxu0 %v7486_v9  ;;  %5548 = vmatmul.mubr.msk.f32.vlgmr.msra.gmra.mrb[36].mxu1 %vm370_vm0, %v5544_v50 }
  0x68   : > { %6507 = vmatpush1.bf16.msra.mxu1 %v7484_v8  ;;  %1707 = vmatprep.mubr.f32.mxu1 %v7403_v0 }
  0x69   : > { %5525 = vmatmul.mubr.msk.f32.gmra.mrb[38].mxu0 %vm370_vm0, %v5521_v51  ;;  %6509 = vmatprep.subr.bf16.mxu1 %v7486_v9 }
  0x6a   : > { %1371 = vmatprep.mubr.f32.mxu0 %v7403_v0  ;;  %6487 = vmatpush1.bf16.msra.mxu0 %v7501_v12 }
  0x6b   : > { %6497 = vmatprep.subr.bf16.mxu0 %v7477_v4  ;;  %5549 = vmatmul.mubr.msk.f32.gmra.mrb[38].mxu1 %vm370_vm0, %v5545_v52 }
  0x6c   : > { %1713 = vmatprep.mubr.f32.mxu1 %v7403_v0  ;;  %6511 = vmatpush1.bf16.msra.mxu1 %v7501_v12 }
  0x6d   : > { %5526 = vmatmul.mubr.msk.f32.gmra.mrb[40].mxu0 %vm370_vm0, %v5522_v53  ;;  %6521 = vmatprep.subr.bf16.mxu1 %v7477_v4 }
  0x6e   : > { %1377 = vmatprep.mubr.f32.mxu0 %v7403_v0 }
  0x6f   : > { %5550 = vmatmul.mubr.msk.f32.gmra.mrb[40].mxu1 %vm370_vm0, %v5546_v54 }
  0x70   : > { %1719 = vmatprep.mubr.f32.mxu1 %v7403_v0 }
  0x71   : > { %5527 = vmatmul.mubr.msk.f32.gmra.mrb[42].mxu0 %vm370_vm0, %v5523_v55 }
  0x72   : > { %1587 = vmatprep.mubr.f32.mxu0 %v7403_v0 }
  0x73   : > { %5551 = vmatmul.mubr.msk.f32.gmra.mrb[42].mxu1 %vm370_vm0, %v5547_v56 }
  0x74   : > { %1929 = vmatprep.mubr.f32.mxu1 %v7403_v0 }
  0x75   : > { %5540 = vmatmul.mubr.msk.f32.vlgmr.msra.gmra.mrb[44].mxu0 %vm370_vm0, %v5536_v57 }
  0x76   : > { %6499 = vmatpush1.bf16.msra.mxu0 %v7484_v8  ;;  %1593 = vmatprep.mubr.f32.mxu0 %v7403_v0 }
  0x77   : > { %6501 = vmatprep.subr.bf16.mxu0 %v7486_v9  ;;  %5564 = vmatmul.mubr.msk.f32.vlgmr.msra.gmra.mrb[44].mxu1 %vm370_vm0, %v5560_v58 }
  0x78   : > { %6523 = vmatpush1.bf16.msra.mxu1 %v7484_v8  ;;  %1935 = vmatprep.mubr.f32.mxu1 %v7403_v0 }
  0x79   : > { %5541 = vmatmul.mubr.msk.f32.gmra.mrb[46].mxu0 %vm370_vm0, %v5537_v59  ;;  %6525 = vmatprep.subr.bf16.mxu1 %v7486_v9 }
  0x7a   : > { %1599 = vmatprep.mubr.f32.mxu0 %v7403_v0  ;;  %6503 = vmatpush1.bf16.msra.mxu0 %v7501_v12 }
  0x7b   : > { %6513 = vmatprep.subr.bf16.mxu0 %v7477_v4  ;;  %5565 = vmatmul.mubr.msk.f32.gmra.mrb[46].mxu1 %vm370_vm0, %v5561_v60  ;;  %v5553_v4 = vld [vmem:[%s11064_s2 + $0x188] sm:$0xff] }
  0x7c   : > { %1941 = vmatprep.mubr.f32.mxu1 %v7403_v0  ;;  %6527 = vmatpush1.bf16.msra.mxu1 %v7501_v12 }
  0x7d   : > { %5542 = vmatmul.mubr.msk.f32.gmra.mrb[48].mxu0 %vm370_vm0, %v5538_v61 }
  0x7e   : > { %1605 = vmatprep.mubr.f32.mxu0 %v7403_v0 }
  0x7f   : > { %5566 = vmatmul.mubr.msk.f32.gmra.mrb[48].mxu1 %vm370_vm0, %v5562_v62 }
  0x80   : > { %1947 = vmatprep.mubr.f32.mxu1 %v7403_v0 }
  0x81   : > { %5543 = vmatmul.mubr.msk.f32.gmra.mrb[50].mxu0 %vm370_vm0, %v5539_v63 }
  0x82   : > { %1815 = vmatprep.mubr.f32.mxu0 %v7403_v0 }
  0x83   : > { %5567 = vmatmul.mubr.msk.f32.gmra.mrb[50].mxu1 %vm370_vm0, %v5563_v1 }
  0x84   : > { %2157 = vmatprep.mubr.f32.mxu1 %v7403_v0 }
  0x85   : > { %5556 = vmatmul.mubr.msk.f32.vlgmr.msra.gmra.mrb[52].mxu0 %vm370_vm0, %v5552_v2 }
  0x86   : > { %6515 = vmatpush1.bf16.msra.mxu0 %v7484_v8  ;;  %1821 = vmatprep.mubr.f32.mxu0 %v7403_v0  ;;  %v5555_v8 = vld [vmem:[%s11064_s2 + $0x198] sm:$0xff] }
  0x87   : > { %6517 = vmatprep.subr.bf16.mxu0 %v7486_v9  ;;  %5580 = vmatmul.mubr.msk.f32.vlgmr.msra.gmra.mrb[52].mxu1 %vm370_vm0, %v5576_v3  ;;  %v5579_v9 = vld [vmem:[%s11064_s2 + $0x1f8] sm:$0xff] }
  0x88   : > { %2163 = vmatprep.mubr.f32.mxu1 %v7403_v0 }
  0x89   : > { %5557 = vmatmul.mubr.msk.f32.gmra.mrb[54].mxu0 %vm370_vm0, %v5553_v4 }
  0x8a   : > { %1827 = vmatprep.mubr.f32.mxu0 %v7403_v0  ;;  %6519 = vmatpush1.bf16.msra.mxu0 %v7501_v12  ;;  %v5570_v12 = vld [vmem:[%s11064_s2 + $0x1d0] sm:$0xff] }
  0x8b   : > { %5581 = vmatmul.mubr.msk.f32.gmra.mrb[54].mxu1 %vm370_vm0, %v5577_v5 }
  0x8c   : > { %2169 = vmatprep.mubr.f32.mxu1 %v7403_v0 }
  0x8d   : > { %5558 = vmatmul.mubr.msk.f32.gmra.mrb[56].mxu0 %vm370_vm0, %v5554_v6 }
  0x8e   : > { %1833 = vmatprep.mubr.f32.mxu0 %v7403_v0 }
  0x8f   : > { %5582 = vmatmul.mubr.msk.f32.gmra.mrb[56].mxu1 %vm370_vm0, %v5578_v7 }
  0x90   : > { %2175 = vmatprep.mubr.f32.mxu1 %v7403_v0 }
  0x91   : > { %5559 = vmatmul.mubr.msk.f32.gmra.mrb[58].mxu0 %vm370_vm0, %v5555_v8 }
  0x92   : > { %2043 = vmatprep.mubr.f32.mxu0 %v7403_v0 }
  0x93   : > { %5583 = vmatmul.mubr.msk.f32.gmra.mrb[58].mxu1 %vm370_vm0, %v5579_v9 }
  0x95   : > { %5572 = vmatmul.mubr.msk.f32.vlgmr.msra.gmra.mrb[60].mxu0 %vm370_vm0, %v5568_v10 }
  0x96   : > { %2049 = vmatprep.mubr.f32.mxu0 %v7403_v0 }
  0x99   : > { %5573 = vmatmul.mubr.msk.f32.gmra.mrb[62].mxu0 %vm370_vm0, %v5569_v11 }
  0x9a   : > { %2055 = vmatprep.mubr.f32.mxu0 %v7403_v0 }
  0x9d   : > { %5574 = vmatmul.mubr.msk.f32.gmra.mrb[64].mxu0 %vm370_vm0, %v5570_v12 }
  0x9e   : > { %2061 = vmatprep.mubr.f32.mxu0 %v7403_v0 }
  0xa1   : > { %5575 = vmatmul.mubr.msk.f32.gmra.mrb[66].mxu0 %vm370_vm0, %v5571_v13 }
  0xf0   : > { %v7886_v14 = vpop.f32.mrb[0].mxu0  ;;  %v7888_v15 = vpop.f32.mrb[0].mxu1 }
  0xf1   : > { %11234 = vst [vmem:[#allocation3_spill] sm:$0xff] %v7888_v15  ;;  %v7890_v16 = vpop.f32.mrb[1].mxu0  ;;  %v7892_v17 = vpop.f32.mrb[1].mxu1 }
  0xf2   : > { %11235 = vst [vmem:[#allocation4_spill] sm:$0xff] %v7892_v17  ;;  %v2318_v18 = vmax.f32 %v7886_v14, %v7890_v16 }
  0xf4   : > { %v7896_v19 = vpop.f32.mrb[2].mxu0  ;;  %v7898_v0 = vpop.f32.mrb[2].mxu1 }
  0xf5   : > { %11236 = vst [vmem:[#allocation5_spill] sm:$0xff] %v7898_v0  ;;  %v7900_v20 = vpop.f32.mrb[3].mxu0  ;;  %v7902_v21 = vpop.f32.mrb[3].mxu1 }
  0xf6   : > { %11237 = vst [vmem:[#allocation6_spill] sm:$0xff] %v7902_v21  ;;  %v2351_v22 = vmax.f32 %v7896_v19, %v7900_v20 }
  0xf8   : > { %v7906_v23 = vpop.f32.mrb[4].mxu0 }
  0xf9   : > { %11238 = vst [vmem:[#allocation7_spill] sm:$0xff] %v7906_v23  ;;  %v7908_v24 = vpop.f32.mrb[5].mxu0 }
  0xfa   : > { %11239 = vst [vmem:[#allocation8_spill] sm:$0xff] %v7908_v24  ;;  %v2384_v25 = vmax.f32 %v7906_v23, %v7908_v24  ;;  %v7912_v26 = vpop.f32.mrb[4].mxu1 }
  0xfb   : > { %v7914_v27 = vpop.f32.mrb[5].mxu1 }
  0xfc   : > { %v2385_v28 = vmax.f32 %v2384_v25, %v7888_v15  ;;  %v7917_v29 = vpop.f32.mrb[6].mxu0 }
  0xfd   : > { %11240 = vst [vmem:[#allocation9_spill] sm:$0xff] %v7917_v29  ;;  %v7919_v30 = vpop.f32.mrb[7].mxu0 }
  0xfe   : > { %11241 = vst [vmem:[#allocation10_spill] sm:$0xff] %v7919_v30  ;;  %v2417_v31 = vmax.f32 %v7917_v29, %v7919_v30  ;;  %v2386_v32 = vmax.f32 %v2385_v28, %v7892_v17  ;;  %v7924_v33 = vpop.f32.mrb[6].mxu1 }
  0xff   : > { %v7926_v34 = vpop.f32.mrb[7].mxu1 }
 0x100   : > { %v2418_v35 = vmax.f32 %v2417_v31, %v7898_v0  ;;  %v7929_v36 = vpop.f32.mrb[8].mxu0 }
 0x101   : > { %v2319_v37 = vmax.f32 %v2318_v18, %v7929_v36  ;;  %v7932_v38 = vpop.f32.mrb[9].mxu0 }
 0x102   : > { %v2419_v39 = vmax.f32 %v2418_v35, %v7902_v21  ;;  %v7935_v40 = vpop.f32.mrb[8].mxu1 }
 0x103   : > { %11242 = vst [vmem:[#allocation11_spill] sm:$0xff] %v7935_v40  ;;  %v2320_v41 = vmax.f32 %v2319_v37, %v7932_v38  ;;  %v7938_v42 = vpop.f32.mrb[9].mxu1 }
 0x104   : > { %11243 = vst [vmem:[#allocation12_spill] sm:$0xff] %v7938_v42  ;;  %v7940_v43 = vpop.f32.mrb[10].mxu0 }
 0x105   : > { %v2352_v44 = vmax.f32 %v2351_v22, %v7940_v43  ;;  %v7943_v45 = vpop.f32.mrb[11].mxu0 }
 0x106   : > { %v7945_v46 = vpop.f32.mrb[10].mxu1 }
 0x107   : > { %11244 = vst [vmem:[#allocation13_spill] sm:$0xff] %v7945_v46  ;;  %v2353_v47 = vmax.f32 %v2352_v44, %v7943_v45  ;;  %v7948_v48 = vpop.f32.mrb[11].mxu1 }
 0x108   : > { %11245 = vst [vmem:[#allocation14_spill] sm:$0xff] %v7948_v48  ;;  %v7950_v49 = vpop.f32.mrb[12].mxu0 }
 0x109   : > { %v2321_v50 = vmax.f32 %v2320_v41, %v7950_v49  ;;  %v7953_v51 = vpop.f32.mrb[13].mxu0 }
 0x10a   : > { %v7955_v52 = vpop.f32.mrb[12].mxu1 }
 0x10b   : > { %v2322_v53 = vmax.f32 %v2321_v50, %v7953_v51  ;;  %v7958_v54 = vpop.f32.mrb[13].mxu1 }
 0x10c   : > { %v7960_v55 = vpop.f32.mrb[14].mxu0 }
 0x10d   : > { %v2354_v56 = vmax.f32 %v2353_v47, %v7960_v55  ;;  %v2323_v57 = vmax.f32 %v2322_v53, %v7912_v26  ;;  %v7964_v58 = vpop.f32.mrb[15].mxu0 }
 0x10e   : > { %v7966_v59 = vpop.f32.mrb[14].mxu1 }
 0x10f   : > { %11246 = vst [vmem:[#allocation15_spill] sm:$0xff] %v7966_v59  ;;  %v2355_v60 = vmax.f32 %v2354_v56, %v7964_v58  ;;  %v2324_v61 = vmax.f32 %v2323_v57, %v7914_v27  ;;  %v7970_v62 = vpop.f32.mrb[15].mxu1 }
 0x110   : > { %11247 = vst [vmem:[#allocation16_spill] sm:$0xff] %v7970_v62  ;;  %v7972_v63 = vpop.f32.mrb[16].mxu0 }
 0x111   : > { %11248 = vst [vmem:[#allocation17_spill] sm:$0xff] %v7972_v63  ;;  %v2387_v1 = vmax.f32 %v2386_v32, %v7972_v63  ;;  %v2356_v2 = vmax.f32 %v2355_v60, %v7924_v33  ;;  %v7976_v3 = vpop.f32.mrb[17].mxu0 }
 0x112   : > { %11249 = vst [vmem:[#allocation18_spill] sm:$0xff] %v7976_v3  ;;  %v7978_v4 = vpop.f32.mrb[16].mxu1 }
 0x113   : > { %11250 = vst [vmem:[#allocation19_spill] sm:$0xff] %v7978_v4  ;;  %v2388_v5 = vmax.f32 %v2387_v1, %v7976_v3  ;;  %v2357_v6 = vmax.f32 %v2356_v2, %v7926_v34  ;;  %v7982_v7 = vpop.f32.mrb[17].mxu1 }
 0x114   : > { %11251 = vst [vmem:[#allocation20_spill] sm:$0xff] %v7982_v7  ;;  %v7984_v8 = vpop.f32.mrb[18].mxu0 }
 0x115   : > { %11252 = vst [vmem:[#allocation21_spill] sm:$0xff] %v7984_v8  ;;  %v2420_v9 = vmax.f32 %v2419_v39, %v7984_v8  ;;  %v2389_v10 = vmax.f32 %v2388_v5, %v7935_v40  ;;  %v7988_v11 = vpop.f32.mrb[19].mxu0 }
 0x116   : > { %11253 = vst [vmem:[#allocation22_spill] sm:$0xff] %v7988_v11  ;;  %v7990_v12 = vpop.f32.mrb[18].mxu1 }
 0x117   : > { %11254 = vst [vmem:[#allocation23_spill] sm:$0xff] %v7990_v12  ;;  %v2421_v13 = vmax.f32 %v2420_v9, %v7988_v11  ;;  %v2390_v18 = vmax.f32 %v2389_v10, %v7938_v42  ;;  %v7994_v22 = vpop.f32.mrb[19].mxu1 }
 0x118   : > { %11255 = vst [vmem:[#allocation24_spill] sm:$0xff] %v7994_v22  ;;  %v7996_v25 = vpop.f32.mrb[20].mxu0 }
 0x119   : > { %v2422_v28 = vmax.f32 %v2421_v13, %v7945_v46  ;;  %v2325_v31 = vmax.f32 %v2324_v61, %v7996_v25  ;;  %v8000_v32 = vpop.f32.mrb[21].mxu0 }
 0x11a   : > { %v8002_v35 = vpop.f32.mrb[20].mxu1 }
 0x11b   : > { %v2423_v37 = vmax.f32 %v2422_v28, %v7948_v48  ;;  %v2326_v39 = vmax.f32 %v2325_v31, %v8000_v32  ;;  %v8006_v41 = vpop.f32.mrb[21].mxu1 }
 0x11c   : > { %v8008_v44 = vpop.f32.mrb[22].mxu0 }
 0x11d   : > { %v2358_v47 = vmax.f32 %v2357_v6, %v8008_v44  ;;  %v2327_v50 = vmax.f32 %v2326_v39, %v7955_v52  ;;  %v8012_v53 = vpop.f32.mrb[23].mxu0 }
 0x11e   : > { %v8014_v56 = vpop.f32.mrb[22].mxu1 }
 0x11f   : > { %11256 = vst [vmem:[#allocation25_spill] sm:$0xff] %v8014_v56  ;;  %v2359_v57 = vmax.f32 %v2358_v47, %v8012_v53  ;;  %v2328_v60 = vmax.f32 %v2327_v50, %v7958_v54  ;;  %v8018_v61 = vpop.f32.mrb[23].mxu1 }
 0x120   : > { %11257 = vst [vmem:[#allocation26_spill] sm:$0xff] %v8018_v61  ;;  %v8020_v1 = vpop.f32.mrb[24].mxu0 }
 0x121   : > { %11258 = vst [vmem:[#allocation27_spill] sm:$0xff] %v8020_v1  ;;  %v2391_v2 = vmax.f32 %v2390_v18, %v8020_v1  ;;  %v2360_v5 = vmax.f32 %v2359_v57, %v7966_v59  ;;  %v8024_v9 = vpop.f32.mrb[25].mxu0 }
 0x122   : > { %11259 = vst [vmem:[#allocation28_spill] sm:$0xff] %v8024_v9  ;;  %v8026_v6 = vpop.f32.mrb[24].mxu1 }
 0x123   : > { %11260 = vst [vmem:[#allocation29_spill] sm:$0xff] %v8026_v6  ;;  %v2392_v10 = vmax.f32 %v2391_v2, %v8024_v9  ;;  %v2361_v13 = vmax.f32 %v2360_v5, %v7970_v62  ;;  %v8030_v28 = vpop.f32.mrb[25].mxu1 }
 0x124   : > { %11261 = vst [vmem:[#allocation30_spill] sm:$0xff] %v8030_v28  ;;  %v8032_v31 = vpop.f32.mrb[26].mxu0 }
 0x125   : > { %11262 = vst [vmem:[#allocation31_spill] sm:$0xff] %v8032_v31  ;;  %v2424_v39 = vmax.f32 %v2423_v37, %v8032_v31  ;;  %v2393_v47 = vmax.f32 %v2392_v10, %v7978_v4  ;;  %v8036_v50 = vpop.f32.mrb[27].mxu0 }
 0x126   : > { %11263 = vst [vmem:[#allocation32_spill] sm:$0xff] %v8036_v50  ;;  %v8038_v18 = vpop.f32.mrb[26].mxu1 }
 0x127   : > { %11264 = vst [vmem:[#allocation33_spill] sm:$0xff] %v8038_v18  ;;  %v2425_v57 = vmax.f32 %v2424_v39, %v8036_v50  ;;  %v2394_v48 = vmax.f32 %v2393_v47, %v7982_v7  ;;  %v8042_v46 = vpop.f32.mrb[27].mxu1 }
 0x128   : > { %11265 = vst [vmem:[#allocation34_spill] sm:$0xff] %v8042_v46  ;;  %v8044_v2 = vpop.f32.mrb[28].mxu0 }
 0x129   : > { %v2426_v5 = vmax.f32 %v2425_v57, %v7990_v12  ;;  %v2329_v11 = vmax.f32 %v2328_v60, %v8044_v2  ;;  %v8048_v8 = vpop.f32.mrb[29].mxu0 }
 0x12a   : > { %v8050_v37 = vpop.f32.mrb[28].mxu1 }
 0x12b   : > { %v2427_v10 = vmax.f32 %v2426_v5, %v7994_v22  ;;  %v2330_v31 = vmax.f32 %v2329_v11, %v8048_v8  ;;  %v8054_v21 = vpop.f32.mrb[29].mxu1 }
 0x12c   : > { %v8056_v39 = vpop.f32.mrb[30].mxu0 }
 0x12d   : > { %11266 = vst [vmem:[#allocation35_spill] sm:$0xff] %v8056_v39  ;;  %v2362_v47 = vmax.f32 %v2361_v13, %v8056_v39  ;;  %v2331_v50 = vmax.f32 %v2330_v31, %v8002_v35  ;;  %v8060_v0 = vpop.f32.mrb[31].mxu0 }
 0x12e   : > { %11267 = vst [vmem:[#allocation36_spill] sm:$0xff] %v8060_v0  ;;  %v8062_v57 = vpop.f32.mrb[30].mxu1 }
 0x12f   : > { %11268 = vst [vmem:[#allocation37_spill] sm:$0xff] %v8062_v57  ;;  %v2363_v60 = vmax.f32 %v2362_v47, %v8060_v0  ;;  %v2332_v12 = vmax.f32 %v2331_v50, %v8006_v41  ;;  %v8066_v30 = vpop.f32.mrb[31].mxu1 }
 0x130   : > { %11269 = vst [vmem:[#allocation38_spill] sm:$0xff] %v8066_v30  ;;  %v8068_v5 = vpop.f32.mrb[32].mxu0 }
 0x131   : > { %11270 = vst [vmem:[#allocation39_spill] sm:$0xff] %v8068_v5  ;;  %v2395_v11 = vmax.f32 %v2394_v48, %v8068_v5  ;;  %v2364_v22 = vmax.f32 %v2363_v60, %v8014_v56  ;;  %v8072_v29 = vpop.f32.mrb[33].mxu0 }
 0x132   : > { %11271 = vst [vmem:[#allocation40_spill] sm:$0xff] %v8072_v29  ;;  %v8074_v13 = vpop.f32.mrb[32].mxu1 }
 0x133   : > { %11272 = vst [vmem:[#allocation41_spill] sm:$0xff] %v8074_v13  ;;  %v2396_v31 = vmax.f32 %v2395_v11, %v8072_v29  ;;  %v2365_v7 = vmax.f32 %v2364_v22, %v8018_v61  ;;  %v8078_v4 = vpop.f32.mrb[33].mxu1 }
 0x134   : > { %11273 = vst [vmem:[#allocation42_spill] sm:$0xff] %v8078_v4  ;;  %v8080_v47 = vpop.f32.mrb[34].mxu0 }
 0x135   : > { %11274 = vst [vmem:[#allocation43_spill] sm:$0xff] %v8080_v47  ;;  %v2428_v50 = vmax.f32 %v2427_v10, %v8080_v47  ;;  %v2397_v9 = vmax.f32 %v2396_v31, %v8026_v6  ;;  %v8084_v1 = vpop.f32.mrb[35].mxu0 }
 0x136   : > { %11275 = vst [vmem:[#allocation44_spill] sm:$0xff] %v8084_v1  ;;  %v8086_v48 = vpop.f32.mrb[34].mxu1 }
 0x137   : > { %11276 = vst [vmem:[#allocation45_spill] sm:$0xff] %v8086_v48  ;;  %v2429_v60 = vmax.f32 %v2428_v50, %v8084_v1  ;;  %v2398_v5 = vmax.f32 %v2397_v9, %v8030_v28  ;;  %v8090_v42 = vpop.f32.mrb[35].mxu1 }
 0x138   : > { %11277 = vst [vmem:[#allocation46_spill] sm:$0xff] %v8090_v42  ;;  %v8092_v11 = vpop.f32.mrb[36].mxu0 }
 0x139   : > { %v2430_v22 = vmax.f32 %v2429_v60, %v8038_v18  ;;  %v2333_v29 = vmax.f32 %v2332_v12, %v8092_v11  ;;  %v8096_v40 = vpop.f32.mrb[37].mxu0 }
 0x13a   : > { %v8098_v10 = vpop.f32.mrb[36].mxu1 }
 0x13b   : > { %v2431_v31 = vmax.f32 %v2430_v22, %v8042_v46  ;;  %v2334_v47 = vmax.f32 %v2333_v29, %v8096_v40  ;;  %v8102_v6 = vpop.f32.mrb[37].mxu1 }
 0x13c   : > { %v8104_v50 = vpop.f32.mrb[38].mxu0 }
 0x13d   : > { %11278 = vst [vmem:[#allocation47_spill] sm:$0xff] %v8104_v50  ;;  %v2366_v9 = vmax.f32 %v2365_v7, %v8104_v50  ;;  %v2335_v1 = vmax.f32 %v2334_v47, %v8050_v37  ;;  %v8108_v28 = vpop.f32.mrb[39].mxu0 }
 0x13e   : > { %11279 = vst [vmem:[#allocation48_spill] sm:$0xff] %v8108_v28  ;;  %v8110_v60 = vpop.f32.mrb[38].mxu1 }
 0x13f   : > { %11280 = vst [vmem:[#allocation49_spill] sm:$0xff] %v8110_v60  ;;  %v2367_v12 = vmax.f32 %v2366_v9, %v8108_v28  ;;  %v2336_v18 = vmax.f32 %v2335_v1, %v8054_v21  ;;  %v8114_v3 = vpop.f32.mrb[39].mxu1 }
 0x140   : > { %11281 = vst [vmem:[#allocation50_spill] sm:$0xff] %v8114_v3  ;;  %v8116_v22 = vpop.f32.mrb[40].mxu0 }
 0x141   : > { %11282 = vst [vmem:[#allocation51_spill] sm:$0xff] %v8116_v22  ;;  %v2399_v29 = vmax.f32 %v2398_v5, %v8116_v22  ;;  %v2368_v46 = vmax.f32 %v2367_v12, %v8062_v57  ;;  %v8120_v63 = vpop.f32.mrb[41].mxu0 }
 0x142   : > { %11283 = vst [vmem:[#allocation52_spill] sm:$0xff] %v8120_v63  ;;  %v8122_v7 = vpop.f32.mrb[40].mxu1 }
 0x143   : > { %11284 = vst [vmem:[#allocation53_spill] sm:$0xff] %v8122_v7  ;;  %v2400_v47 = vmax.f32 %v2399_v29, %v8120_v63  ;;  %v2369_v17 = vmax.f32 %v2368_v46, %v8066_v30  ;;  %v8126_v15 = vpop.f32.mrb[41].mxu1 }
 0x144   : > { %11285 = vst [vmem:[#allocation54_spill] sm:$0xff] %v8126_v15  ;;  %v8128_v9 = vpop.f32.mrb[42].mxu0 }
 0x145   : > { %11286 = vst [vmem:[#allocation55_spill] sm:$0xff] %v8128_v9  ;;  %v2432_v1 = vmax.f32 %v2431_v31, %v8128_v9  ;;  %v2401_v24 = vmax.f32 %v2400_v47, %v8074_v13  ;;  %v8132_v23 = vpop.f32.mrb[43].mxu0 }
 0x146   : > { %11287 = vst [vmem:[#allocation56_spill] sm:$0xff] %v8132_v23  ;;  %v8134_v5 = vpop.f32.mrb[42].mxu1 }
 0x147   : > { %11288 = vst [vmem:[#allocation57_spill] sm:$0xff] %v8134_v5  ;;  %v2433_v12 = vmax.f32 %v2432_v1, %v8132_v23  ;;  %v2402_v22 = vmax.f32 %v2401_v24, %v8078_v4  ;;  %v8138_v57 = vpop.f32.mrb[43].mxu1 }
 0x148   : > { %11289 = vst [vmem:[#allocation58_spill] sm:$0xff] %v8138_v57  ;;  %v8140_v29 = vpop.f32.mrb[44].mxu0 }
 0x149   : > { %v2434_v46 = vmax.f32 %v2433_v12, %v8086_v48  ;;  %v2337_v63 = vmax.f32 %v2336_v18, %v8140_v29  ;;  %v8144_v30 = vpop.f32.mrb[45].mxu0 }
 0x14a   : > { %v8146_v31 = vpop.f32.mrb[44].mxu1 }
 0x14b   : > { %v2435_v47 = vmax.f32 %v2434_v46, %v8090_v42  ;;  %v2338_v9 = vmax.f32 %v2337_v63, %v8144_v30  ;;  %v8150_v13 = vpop.f32.mrb[45].mxu1 }
 0x14c   : > { %v8152_v1 = vpop.f32.mrb[46].mxu0 }
 0x14d   : > { %11290 = vst [vmem:[#allocation59_spill] sm:$0xff] %v8152_v1  ;;  %v2370_v24 = vmax.f32 %v2369_v17, %v8152_v1  ;;  %v2339_v23 = vmax.f32 %v2338_v9, %v8098_v10  ;;  %v8156_v4 = vpop.f32.mrb[47].mxu0 }
 0x14e   : > { %11291 = vst [vmem:[#allocation60_spill] sm:$0xff] %v8156_v4  ;;  %v8158_v12 = vpop.f32.mrb[46].mxu1 }
 0x14f   : > { %11292 = vst [vmem:[#allocation61_spill] sm:$0xff] %v8158_v12  ;;  %v2371_v18 = vmax.f32 %v2370_v24, %v8156_v4  ;;  %v2340_v48 = vmax.f32 %v2339_v23, %v8102_v6  ;;  %v8162_v28 = vpop.f32.mrb[47].mxu1 }
 0x150   : > { %11293 = vst [vmem:[#allocation62_spill] sm:$0xff] %v8162_v28  ;;  %v8164_v46 = vpop.f32.mrb[48].mxu0 }
 0x151   : > { %11294 = vst [vmem:[#allocation63_spill] sm:$0xff] %v8164_v46  ;;  %v2403_v63 = vmax.f32 %v2402_v22, %v8164_v46  ;;  %v2372_v42 = vmax.f32 %v2371_v18, %v8110_v60  ;;  %v8168_v50 = vpop.f32.mrb[49].mxu0 }
 0x152   : > { %11295 = vst [vmem:[#allocation64_spill] sm:$0xff] %v8168_v50  ;;  %v8170_v17 = vpop.f32.mrb[48].mxu1 }
 0x153   : > { %11296 = vst [vmem:[#allocation65_spill] sm:$0xff] %v8170_v17  ;;  %v2404_v9 = vmax.f32 %v2403_v63, %v8168_v50  ;;  %v2373_v1 = vmax.f32 %v2372_v42, %v8114_v3  ;;  %v8174_v61 = vpop.f32.mrb[49].mxu1 }
 0x154   : > { %11297 = vst [vmem:[#allocation66_spill] sm:$0xff] %v8174_v61  ;;  %v8176_v24 = vpop.f32.mrb[50].mxu0 }
 0x155   : > { %11298 = vst [vmem:[#allocation67_spill] sm:$0xff] %v8176_v24  ;;  %v2436_v23 = vmax.f32 %v2435_v47, %v8176_v24  ;;  %v2405_v4 = vmax.f32 %v2404_v9, %v8122_v7  ;;  %v8180_v56 = vpop.f32.mrb[51].mxu0 }
 0x156   : > { %11299 = vst [vmem:[#allocation68_spill] sm:$0xff] %v8180_v56  ;;  %v8182_v22 = vpop.f32.mrb[50].mxu1 }
 0x157   : > { %11300 = vst [vmem:[#allocation69_spill] sm:$0xff] %v8182_v22  ;;  %v2437_v18 = vmax.f32 %v2436_v23, %v8180_v56  ;;  %v2406_v46 = vmax.f32 %v2405_v4, %v8126_v15  ;;  %v8186_v60 = vpop.f32.mrb[51].mxu1 }
 0x158   : > { %11301 = vst [vmem:[#allocation70_spill] sm:$0xff] %v8186_v60  ;;  %v8188_v63 = vpop.f32.mrb[52].mxu0 }
 0x159   : > { %v2438_v42 = vmax.f32 %v2437_v18, %v8134_v5  ;;  %v2341_v50 = vmax.f32 %v2340_v48, %v8188_v63  ;;  %v8192_v3 = vpop.f32.mrb[53].mxu0 }
 0x15a   : > { %v8194_v47 = vpop.f32.mrb[52].mxu1 }
 0x15b   : > { %v2439_v9 = vmax.f32 %v2438_v42, %v8138_v57  ;;  %v2342_v24 = vmax.f32 %v2341_v50, %v8192_v3  ;;  %v8198_v7 = vpop.f32.mrb[53].mxu1 }
 0x15c   : > { %v8200_v23 = vpop.f32.mrb[54].mxu0 }
 0x15d   : > { %11302 = vst [vmem:[#allocation71_spill] sm:$0xff] %v8200_v23  ;;  %v2374_v4 = vmax.f32 %v2373_v1, %v8200_v23  ;;  %v2343_v56 = vmax.f32 %v2342_v24, %v8146_v31  ;;  %v8204_v15 = vpop.f32.mrb[55].mxu0 }
 0x15e   : > { %11303 = vst [vmem:[#allocation72_spill] sm:$0xff] %v8204_v15  ;;  %v8206_v18 = vpop.f32.mrb[54].mxu1 }
 0x15f   : > { %v2375_v48 = vmax.f32 %v2374_v4, %v8204_v15  ;;  %v2344_v5 = vmax.f32 %v2343_v56, %v8150_v13  ;;  %v8210_v0 = vpop.f32.mrb[55].mxu1 }
 0x160   : > { %v8212_v42 = vpop.f32.mrb[56].mxu0 }
 0x161   : > { %11304 = vst [vmem:[#allocation73_spill] sm:$0xff] %v8212_v42  ;;  %v2407_v50 = vmax.f32 %v2406_v46, %v8212_v42  ;;  %v2376_v57 = vmax.f32 %v2375_v48, %v8158_v12  ;;  %v8216_v39 = vpop.f32.mrb[57].mxu0 }
 0x162   : > { %11305 = vst [vmem:[#allocation74_spill] sm:$0xff] %v8216_v39  ;;  %v8218_v1 = vpop.f32.mrb[56].mxu1 }
 0x163   : > { %v2408_v24 = vmax.f32 %v2407_v50, %v8216_v39  ;;  %v2377_v23 = vmax.f32 %v2376_v57, %v8162_v28  ;;  %v8222_v62 = vpop.f32.mrb[57].mxu1 }
 0x164   : > { %v8224_v4 = vpop.f32.mrb[58].mxu0 }
 0x165   : > { %11306 = vst [vmem:[#allocation75_spill] sm:$0xff] %v8224_v4  ;;  %v2440_v56 = vmax.f32 %v2439_v9, %v8224_v4  ;;  %v2409_v15 = vmax.f32 %v2408_v24, %v8170_v17  ;;  %v8228_v59 = vpop.f32.mrb[59].mxu0 }
 0x166   : > { %11307 = vst [vmem:[#allocation76_spill] sm:$0xff] %v8228_v59  ;;  %v8230_v46 = vpop.f32.mrb[58].mxu1 }
 0x167   : > { %v2441_v48 = vmax.f32 %v2440_v56, %v8228_v59  ;;  %v2410_v42 = vmax.f32 %v2409_v15, %v8174_v61  ;;  %v8234_v12 = vpop.f32.mrb[59].mxu1 }
 0x168   : > { %v8236_v50 = vpop.f32.mrb[60].mxu0 }
 0x169   : > { %v2442_v57 = vmax.f32 %v2441_v48, %v8182_v22  ;;  %v2345_v39 = vmax.f32 %v2344_v5, %v8236_v50  ;;  %v8240_v28 = vpop.f32.mrb[61].mxu0 }
 0x16b   : > { %v2443_v9 = vmax.f32 %v2442_v57, %v8186_v60  ;;  %v2346_v24 = vmax.f32 %v2345_v39, %v8240_v28 }
 0x16c   : > { %v8244_v4 = vpop.f32.mrb[62].mxu0 }
 0x16d   : > { %v2378_v56 = vmax.f32 %v2377_v23, %v8244_v4  ;;  %v2347_v15 = vmax.f32 %v2346_v24, %v8194_v47  ;;  %v8248_v59 = vpop.f32.mrb[63].mxu0 }
 0x16f   : > { %v2379_v61 = vmax.f32 %v2378_v56, %v8248_v59  ;;  %v2348_v48 = vmax.f32 %v2347_v15, %v8198_v7 }
 0x170   : > { %v8252_v22 = vpop.f32.mrb[64].mxu0 }
 0x171   : > { %v2411_v5 = vmax.f32 %v2410_v42, %v8252_v22  ;;  %v2380_v57 = vmax.f32 %v2379_v61, %v8206_v18  ;;  %2349 = vmax.xlane.f32.xlu0 %v2348_v48  ;;  %v8256_v39 = vpop.f32.mrb[65].mxu0 }
 0x173   : > { %v2412_v60 = vmax.f32 %v2411_v5, %v8256_v39  ;;  %v2381_v23 = vmax.f32 %v2380_v57, %v8210_v0 }
 0x174   : > { %v8260_v24 = vpop.f32.mrb[66].mxu0 }
 0x175   : > { %v2444_v17 = vmax.f32 %v2443_v9, %v8260_v24  ;;  %v2413_v56 = vmax.f32 %v2412_v60, %v8218_v1  ;;  %2382 = vmax.xlane.f32.xlu0 %v2381_v23  ;;  %v8264_v15 = vpop.f32.mrb[67].mxu0 }
 0x177   : > { %v2445_v42 = vmax.f32 %v2444_v17, %v8264_v15  ;;  %v2414_v61 = vmax.f32 %v2413_v56, %v8222_v62 }
 0x179   : > { %v2446_v48 = vmax.f32 %v2445_v42, %v8230_v46  ;;  %2415 = vmax.xlane.f32.xlu1 %v2414_v61 }
 0x17b   : > { %v2447_v5 = vmax.f32 %v2446_v48, %v8234_v12 }
 0x17d   : > { %2448 = vmax.xlane.f32.xlu1 %v2447_v5 }
 0x1fe   : > { %v8270_v57 = vpop.xlane.xlu0 %2349 }
 0x1ff   : > { %v2450_v9 = vsub.f32 %v7886_v14, %v8270_v57  ;;  %v2451_v60 = vsub.f32 %v7890_v16, %v8270_v57  ;;  %v2452_v23 = vsub.f32 %v7929_v36, %v8270_v57  ;;  %v2453_v17 = vsub.f32 %v7932_v38, %v8270_v57 }
 0x200   : > { %v2454_v61 = vsub.f32 %v7950_v49, %v8270_v57  ;;  %v2455_v5 = vsub.f32 %v7953_v51, %v8270_v57  ;;  %v2456_v16 = vsub.f32 %v7912_v26, %v8270_v57  ;;  %v2457_v38 = vsub.f32 %v7914_v27, %v8270_v57 }
 0x201   : > { %v2578_v56 = vmul.f32 1.442695, %v2450_v9  ;;  %v2580_v42 = vmul.f32 1.442695, %v2451_v60  ;;  %v2582_v48 = vmul.f32 1.442695, %v2452_v23  ;;  %v2458_v49 = vsub.f32 %v7996_v25, %v8270_v57 }
 0x202   : > { %v2584_v14 = vmul.f32 1.442695, %v2453_v17  ;;  %v2586_v36 = vmul.f32 1.442695, %v2454_v61  ;;  %v2588_v9 = vmul.f32 1.442695, %v2455_v5  ;;  %v2459_v51 = vsub.f32 %v8000_v32, %v8270_v57 }
 0x203   : > { %7124 = vpow2.f32 %v2578_v56  ;;  %v2590_v60 = vmul.f32 1.442695, %v2456_v16  ;;  %v2592_v23 = vmul.f32 1.442695, %v2457_v38  ;;  %v2460_v56 = vsub.f32 %v7955_v52, %v8270_v57 }
 0x204   : > { %7126 = vpow2.f32 %v2580_v42  ;;  %v2594_v27 = vmul.f32 1.442695, %v2458_v49  ;;  %v2461_v61 = vsub.f32 %v7958_v54, %v8270_v57  ;;  %v2596_v32 = vmul.f32 1.442695, %v2459_v51 }
 0x205   : > { %7128 = vpow2.f32 %v2582_v48  ;;  %v2598_v52 = vmul.f32 1.442695, %v2460_v56  ;;  %v2463_v38 = vsub.f32 %v8048_v8, %v8270_v57  ;;  %v2466_v51 = vsub.f32 %v8092_v11, %v8270_v57 }
 0x206   : > { %7130 = vpow2.f32 %v2584_v14  ;;  %v2462_v14 = vsub.f32 %v8044_v2, %v8270_v57  ;;  %v2600_v54 = vmul.f32 1.442695, %v2461_v61  ;;  %v2465_v2 = vsub.f32 %v8006_v41, %v8270_v57  ;;  %v8332_v61 = vpop.xlane.xlu0 %2382 }
 0x207   : > { %7132 = vpow2.f32 %v2586_v36  ;;  %v2467_v8 = vsub.f32 %v8096_v40, %v8270_v57  ;;  %v2468_v56 = vsub.f32 %v8050_v37, %v8270_v57  ;;  %v2470_v41 = vsub.f32 %v8140_v29, %v8270_v57 }
 0x208   : > { %7134 = vpow2.f32 %v2588_v9  ;;  %v2464_v9 = vsub.f32 %v8002_v35, %v8270_v57  ;;  %v2469_v35 = vsub.f32 %v8054_v21, %v8270_v57  ;;  %v2471_v11 = vsub.f32 %v8144_v30, %v8270_v57 }
 0x209   : > { %7136 = vpow2.f32 %v2590_v60  ;;  %v2604_v40 = vmul.f32 1.442695, %v2463_v38  ;;  %v2472_v37 = vsub.f32 %v8098_v10, %v8270_v57  ;;  %v2473_v21 = vsub.f32 %v8102_v6, %v8270_v57 }
 0x20a   : > { %7138 = vpow2.f32 %v2592_v23  ;;  %v2602_v23 = vmul.f32 1.442695, %v2462_v14  ;;  %v2475_v29 = vsub.f32 %v8192_v3, %v8270_v57  ;;  %v2608_v30 = vmul.f32 1.442695, %v2465_v2 }
 0x20b   : > { %7140 = vpow2.f32 %v2594_v27  ;;  %v2610_v10 = vmul.f32 1.442695, %v2466_v51  ;;  %v2482_v6 = vsub.f32 %v7896_v19, %v8332_v61  ;;  %v2483_v3 = vsub.f32 %v7900_v20, %v8332_v61 }
 0x20c   : > { %7142 = vpow2.f32 %v2596_v32  ;;  %v2606_v32 = vmul.f32 1.442695, %v2464_v9  ;;  %v2477_v9 = vsub.f32 %v8150_v13, %v8270_v57  ;;  %v2479_v19 = vsub.f32 %v8240_v28, %v8270_v57 }
 0x20d   : > { %v8292_v17 = vpop.eup %7124  ;;  %7144 = vpow2.f32 %v2598_v52  ;;  %v2474_v52 = vsub.f32 %v8188_v63, %v8270_v57  ;;  %v2612_v63 = vmul.f32 1.442695, %v2467_v8  ;;  %v2484_v13 = vsub.f32 %v7940_v43, %v8332_v61 }
 0x20e   : > { %v8294_v26 = vpop.eup %7126  ;;  %7146 = vpow2.f32 %v2600_v54  ;;  %v2480_v20 = vsub.f32 %v8194_v47, %v8270_v57  ;;  %v2642_v8 = vmul.f32 1.442695, %v2482_v6  ;;  %v2485_v28 = vsub.f32 %v7943_v45, %v8332_v61 }
 0x20f   : > { %v2834_v42 = vadd.f32 %v8294_v26, %v8292_v17  ;;  %v8300_v25 = vpop.eup %7128  ;;  %7148 = vpow2.f32 %v2602_v23  ;;  %v2616_v23 = vmul.f32 1.442695, %v2469_v35  ;;  %v2644_v35 = vmul.f32 1.442695, %v2483_v3 }
 0x210   : > { %v8305_v5 = vpop.eup %7130  ;;  %7150 = vpow2.f32 %v2604_v40  ;;  %v2618_v40 = vmul.f32 1.442695, %v2470_v41  ;;  %v2620_v43 = vmul.f32 1.442695, %v2471_v11  ;;  %v2628_v6 = vmul.f32 1.442695, %v2475_v29 }
 0x211   : > { %v2835_v48 = vadd.f32 %v8300_v25, %v2834_v42  ;;  %v8310_v36 = vpop.eup %7132  ;;  %7152 = vpow2.f32 %v2606_v32  ;;  %v2487_v41 = vsub.f32 %v7964_v58, %v8332_v61  ;;  %v2648_v11 = vmul.f32 1.442695, %v2485_v28 }
 0x212   : > { %11308 = vst [vmem:[#allocation77_spill] sm:$0xff] %v8310_v36  ;;  %v8317_v60 = vpop.eup %7134  ;;  %7154 = vpow2.f32 %v2608_v30  ;;  %v2486_v30 = vsub.f32 %v7960_v55, %v8332_v61  ;;  %v8399_v58 = vmul.f32 1.442695, %v2479_v19  ;;  %v2490_v19 = vsub.f32 %v8008_v44, %v8332_v61  ;;  %v11325_v44 = vld [vmem:[#allocation35_spill] sm:$0xff] }
 0x213   : > { %v2836_v16 = vadd.f32 %v8305_v5, %v2835_v48  ;;  %11309 = vst [vmem:[#allocation78_spill] sm:$0xff] %v8317_v60  ;;  %v8330_v42 = vpop.eup %7136  ;;  %7156 = vpow2.f32 %v2610_v10  ;;  %v2646_v10 = vmul.f32 1.442695, %v2484_v13 }
 0x214   : > { %11310 = vst [vmem:[#allocation79_spill] sm:$0xff] %v8330_v42  ;;  %v8343_v14 = vpop.eup %7138  ;;  %7158 = vpow2.f32 %v2612_v63  ;;  %v2650_v29 = vmul.f32 1.442695, %v2486_v30 }
 0x215   : > { %v2837_v49 = vadd.f32 %v8310_v36, %v2836_v16  ;;  %11311 = vst [vmem:[#allocation80_spill] sm:$0xff] %v8343_v14  ;;  %v2476_v16 = vsub.f32 %v8146_v31, %v8270_v57  ;;  %v8354_v54 = vpop.eup %7140  ;;  %v2614_v31 = vmul.f32 1.442695, %v2468_v56  ;;  %v3122_v36 = vld [vmem:[%s11070_s8 + $0x98] sm:$0xff] }
 0x216   : > { %11312 = vst [vmem:[#allocation81_spill] sm:$0xff] %v8354_v54  ;;  %v8363_v51 = vpop.eup %7142 }
 0x217   : > { %v2838_v27 = vadd.f32 %v8317_v60, %v2837_v49  ;;  %v2478_v49 = vsub.f32 %v8236_v50, %v8270_v57  ;;  %11313 = vst [vmem:[#allocation82_spill] sm:$0xff] %v8363_v51  ;;  %v8372_v56 = vpop.eup %7144  ;;  %7160 = vpow2.f32 %v2614_v31  ;;  %v2630_v63 = vmul.f32 1.442695, %v2476_v16  ;;  %v3154_v60 = vld [vmem:[%s11070_s8 + $0x198] sm:$0xff] }
 0x218   : > { %11314 = vst [vmem:[#allocation83_spill] sm:$0xff] %v8372_v56  ;;  %v8379_v47 = vpop.eup %7146  ;;  %7162 = vpow2.f32 %v2616_v23 }
 0x219   : > { %v2839_v48 = vadd.f32 %v8330_v42, %v2838_v27  ;;  %v2481_v27 = vsub.f32 %v8198_v7, %v8270_v57  ;;  %11315 = vst [vmem:[#allocation84_spill] sm:$0xff] %v8379_v47  ;;  %v2626_v7 = vmul.f32 1.442695, %v2474_v52  ;;  %7164 = vpow2.f32 %v2642_v8  ;;  %v8384_v45 = vpop.eup %7148  ;;  %v3121_v42 = vld [vmem:[%s11070_s8 + $0x90] sm:$0xff] }
 0x21a   : > { %11316 = vst [vmem:[#allocation85_spill] sm:$0xff] %v8384_v45  ;;  %7166 = vpow2.f32 %v2644_v35  ;;  %v8391_v3 = vpop.eup %7150  ;;  %v2488_v52 = vsub.f32 %v7924_v33, %v8332_v61  ;;  %v2652_v33 = vmul.f32 1.442695, %v2487_v41 }
 0x21b   : > { %v2840_v38 = vadd.f32 %v8343_v14, %v2839_v48  ;;  %v2622_v48 = vmul.f32 1.442695, %v2472_v37  ;;  %7168 = vpow2.f32 %v2618_v40  ;;  %v8388_v37 = vmul.f32 1.442695, %v2477_v9  ;;  %11317 = vst [vmem:[#allocation86_spill] sm:$0xff] %v8391_v3  ;;  %v8397_v31 = vpop.eup %7152 }
 0x21c   : > { %7170 = vpow2.f32 %v2646_v10  ;;  %11318 = vst [vmem:[#allocation87_spill] sm:$0xff] %v8397_v31  ;;  %v8404_v9 = vpop.eup %7154  ;;  %v8406_v23 = vmul.f32 1.442695, %v2481_v27  ;;  %v11322_v27 = vld [vmem:[#allocation15_spill] sm:$0xff]  ;;  %v2654_v40 = vmul.f32 1.442695, %v2488_v52 }
 0x21d   : > { %v2841_v2 = vadd.f32 %v8354_v54, %v2840_v38  ;;  %v2624_v38 = vmul.f32 1.442695, %v2473_v21  ;;  %v8393_v21 = vmul.f32 1.442695, %v2478_v49  ;;  %7172 = vpow2.f32 %v2620_v43  ;;  %11319 = vst [vmem:[#allocation88_spill] sm:$0xff] %v8404_v9  ;;  %v8410_v13 = vpop.eup %7156  ;;  %v11342_v54 = vld [vmem:[#allocation72_spill] sm:$0xff] }
 0x21e   : > { %v2489_v49 = vsub.f32 %v7926_v34, %v8332_v61  ;;  %7174 = vpow2.f32 %v2648_v11  ;;  %11320 = vst [vmem:[#allocation89_spill] sm:$0xff] %v8410_v13  ;;  %v8417_v8 = vpop.eup %7158  ;;  %v2492_v28 = vsub.f32 %v11322_v27, %v8332_v61  ;;  %v11323_v34 = vld [vmem:[#allocation16_spill] sm:$0xff]  ;;  %v11329_v11 = vld [vmem:[#allocation26_spill] sm:$0xff] }
 0x21f   : > { %v2842_v50 = vadd.f32 %v8363_v51, %v2841_v2  ;;  %v8401_v2 = vmul.f32 1.442695, %v2480_v20  ;;  %7176 = vpow2.f32 %v2622_v48  ;;  %v2491_v20 = vsub.f32 %v8012_v53, %v8332_v61  ;;  %11321 = vst [vmem:[#allocation90_spill] sm:$0xff] %v8417_v8  ;;  %v11326_v53 = vld [vmem:[#allocation36_spill] sm:$0xff] }
 0x220   : > { %v2493_v35 = vsub.f32 %v11323_v34, %v8332_v61  ;;  %7178 = vpow2.f32 %v2650_v29  ;;  %v2494_v48 = vsub.f32 %v11325_v44, %v8332_v61  ;;  %v2495_v30 = vsub.f32 %v11326_v53, %v8332_v61  ;;  %v11331_v27 = vld [vmem:[#allocation48_spill] sm:$0xff]  ;;  %v11332_v53 = vld [vmem:[#allocation37_spill] sm:$0xff] }
 0x221   : > { %v2843_v32 = vadd.f32 %v8372_v56, %v2842_v50  ;;  %v8423_v43 = vpop.eup %7160  ;;  %7180 = vpow2.f32 %v2624_v38  ;;  %v2656_v52 = vmul.f32 1.442695, %v2489_v49  ;;  %v2499_v34 = vsub.f32 %v11331_v27, %v8332_v61  ;;  %v11341_v56 = vld [vmem:[#allocation71_spill] sm:$0xff] }
 0x222   : > { %11324 = vst [vmem:[#allocation15_spill] sm:$0xff] %v8423_v43  ;;  %v8430_v10 = vpop.eup %7162  ;;  %7182 = vpow2.f32 %v2652_v33  ;;  %v2658_v49 = vmul.f32 1.442695, %v2490_v19  ;;  %v2660_v19 = vmul.f32 1.442695, %v2491_v20 }
 0x223   : > { %v2844_v57 = vadd.f32 %v8379_v47, %v2843_v32  ;;  %11327 = vst [vmem:[#allocation16_spill] sm:$0xff] %v8430_v10  ;;  %v8436_v29 = vpop.eup %7164  ;;  %7184 = vpow2.f32 %v2626_v7  ;;  %v2662_v20 = vmul.f32 1.442695, %v2492_v28  ;;  %v2664_v28 = vmul.f32 1.442695, %v2493_v35 }
 0x224   : > { %v8443_v44 = vpop.eup %7166  ;;  %7186 = vpow2.f32 %v2654_v40  ;;  %v2666_v35 = vmul.f32 1.442695, %v2494_v48 }
 0x225   : > { %v2845_v55 = vadd.f32 %v8384_v45, %v2844_v57  ;;  %v11328_v57 = vld [vmem:[#allocation25_spill] sm:$0xff]  ;;  %7188 = vpow2.f32 %v2628_v6  ;;  %v2867_v27 = vadd.f32 %v8443_v44, %v8436_v29 }
 0x226   : > { %v2496_v41 = vsub.f32 %v11328_v57, %v8332_v61  ;;  %v2500_v57 = vsub.f32 %v11332_v53, %v8332_v61  ;;  %v11337_v53 = vld [vmem:[#allocation60_spill] sm:$0xff]  ;;  %7190 = vpow2.f32 %v2656_v52 }
 0x227   : > { %v2846_v16 = vadd.f32 %v8391_v3, %v2845_v55  ;;  %v2497_v55 = vsub.f32 %v11329_v11, %v8332_v61  ;;  %v11333_v11 = vld [vmem:[#allocation38_spill] sm:$0xff]  ;;  %v2503_v45 = vsub.f32 %v11337_v53, %v8332_v61  ;;  %7192 = vpow2.f32 %v2630_v63 }
 0x228   : > { %v2501_v33 = vsub.f32 %v11333_v11, %v8332_v61  ;;  %v11338_v11 = vld [vmem:[#allocation49_spill] sm:$0xff]  ;;  %v2506_v53 = vsub.f32 %v11341_v56, %v8332_v61  ;;  %7194 = vpow2.f32 %v2658_v49  ;;  %v11346_v56 = vld [vmem:[#allocation62_spill] sm:$0xff]  ;;  %v2670_v47 = vmul.f32 1.442695, %v2496_v41 }
 0x229   : > { %v2847_v50 = vadd.f32 %v8397_v31, %v2846_v16  ;;  %v11330_v16 = vld [vmem:[#allocation47_spill] sm:$0xff]  ;;  %v8449_v31 = vpop.eup %7168  ;;  %v2504_v40 = vsub.f32 %v11338_v11, %v8332_v61  ;;  %v2507_v11 = vsub.f32 %v11342_v54, %v8332_v61  ;;  %7196 = vpow2.f32 %v8388_v37 }
 0x22a   : > { %11334 = vst [vmem:[#allocation35_spill] sm:$0xff] %v8449_v31  ;;  %7198 = vpow2.f32 %v2660_v19 }
 0x22b   : > { %v2848_v32 = vadd.f32 %v8404_v9, %v2847_v50  ;;  %v2498_v50 = vsub.f32 %v11330_v16, %v8332_v61  ;;  %7200 = vpow2.f32 %v8393_v21 }
 0x22d   : > { %v2849_v38 = vadd.f32 %v8410_v13, %v2848_v32  ;;  %v11335_v32 = vld [vmem:[#allocation59_spill] sm:$0xff]  ;;  %v8456_v13 = vpop.eup %7170  ;;  %7202 = vpow2.f32 %v2662_v20  ;;  %v2674_v51 = vmul.f32 1.442695, %v2498_v50 }
 0x22e   : > { %v2502_v16 = vsub.f32 %v11335_v32, %v8332_v61  ;;  %11336 = vst [vmem:[#allocation36_spill] sm:$0xff] %v8456_v13  ;;  %v8462_v9 = vpop.eup %7172  ;;  %7204 = vpow2.f32 %v8399_v58  ;;  %v2676_v58 = vmul.f32 1.442695, %v2499_v34 }
 0x22f   : > { %v2850_v7 = vadd.f32 %v8417_v8, %v2849_v38  ;;  %11339 = vst [vmem:[#allocation25_spill] sm:$0xff] %v8462_v9  ;;  %v11340_v38 = vld [vmem:[#allocation50_spill] sm:$0xff]  ;;  %v2868_v8 = vadd.f32 %v8456_v13, %v2867_v27  ;;  %v8468_v3 = vpop.eup %7174  ;;  %7206 = vpow2.f32 %v2664_v28  ;;  %v2684_v28 = vmul.f32 1.442695, %v2503_v45 }
 0x230   : > { %v2505_v32 = vsub.f32 %v11340_v38, %v8332_v61  ;;  %v8474_v52 = vpop.eup %7176  ;;  %7208 = vpow2.f32 %v8401_v2  ;;  %v11354_v2 = vld [vmem:[#allocation7_spill] sm:$0xff]  ;;  %v8539_v45 = vmul.f32 1.442695, %v2507_v11  ;;  %v11363_v11 = vld [vmem:[#allocation4_spill] sm:$0xff] }
 0x231   : > { %v2851_v6 = vadd.f32 %v8423_v43, %v2850_v7  ;;  %11343 = vst [vmem:[#allocation26_spill] sm:$0xff] %v8474_v52  ;;  %v11344_v7 = vld [vmem:[#allocation61_spill] sm:$0xff]  ;;  %v2869_v27 = vadd.f32 %v8468_v3, %v2868_v8  ;;  %v8481_v43 = vpop.eup %7178  ;;  %7210 = vpow2.f32 %v2666_v35 }
 0x232   : > { %11345 = vst [vmem:[#allocation47_spill] sm:$0xff] %v8481_v43  ;;  %v8487_v49 = vpop.eup %7180  ;;  %7212 = vpow2.f32 %v8406_v23  ;;  %v8532_v35 = vmul.f32 1.442695, %v2505_v32 }
 0x233   : > { %v2852_v63 = vadd.f32 %v8430_v10, %v2851_v6  ;;  %11347 = vst [vmem:[#allocation48_spill] sm:$0xff] %v8487_v49  ;;  %v2870_v8 = vadd.f32 %v8481_v43, %v2869_v27  ;;  %v8494_v38 = vpop.eup %7182  ;;  %v2672_v10 = vmul.f32 1.442695, %v2497_v55 }
 0x234   : > { %11348 = vst [vmem:[#allocation37_spill] sm:$0xff] %v8494_v38  ;;  %v8500_v54 = vpop.eup %7184 }
 0x235   : > { %v2853_v37 = vadd.f32 %v8449_v31, %v2852_v63  ;;  %11349 = vst [vmem:[#allocation38_spill] sm:$0xff] %v8500_v54  ;;  %v2668_v63 = vmul.f32 1.442695, %v2495_v30  ;;  %v2871_v6 = vadd.f32 %v8494_v38, %v2870_v8  ;;  %v8505_v27 = vpop.eup %7186  ;;  %v8507_v31 = vpop.xlane.xlu1 %2415  ;;  %v2680_v8 = vmul.f32 1.442695, %v2501_v33 }
 0x236   : > { %11350 = vst [vmem:[#allocation59_spill] sm:$0xff] %v8505_v27  ;;  %v8509_v19 = vpop.eup %7188  ;;  %v2514_v50 = vsub.f32 %v11354_v2, %v8507_v31 }
 0x237   : > { %v2854_v21 = vadd.f32 %v8462_v9, %v2853_v37  ;;  %11351 = vst [vmem:[#allocation60_spill] sm:$0xff] %v8509_v19  ;;  %v2872_v20 = vadd.f32 %v8505_v27, %v2871_v6  ;;  %v8514_v30 = vpop.eup %7190  ;;  %v2678_v37 = vmul.f32 1.442695, %v2500_v57  ;;  %v2682_v9 = vmul.f32 1.442695, %v2502_v16  ;;  %v11356_v57 = vld [vmem:[#allocation8_spill] sm:$0xff] }
 0x238   : > { %11352 = vst [vmem:[#allocation49_spill] sm:$0xff] %v8514_v30  ;;  %v8516_v43 = vpop.eup %7192  ;;  %7214 = vpow2.f32 %v2668_v63  ;;  %v8525_v6 = vmul.f32 1.442695, %v2504_v40  ;;  %v2515_v33 = vsub.f32 %v11356_v57, %v8507_v31  ;;  %v11359_v40 = vld [vmem:[#allocation3_spill] sm:$0xff]  ;;  %v2706_v32 = vmul.f32 1.442695, %v2514_v50 }
 0x239   : > { %v2855_v48 = vadd.f32 %v8474_v52, %v2854_v21  ;;  %11353 = vst [vmem:[#allocation50_spill] sm:$0xff] %v8516_v43  ;;  %v2873_v55 = vadd.f32 %v8514_v30, %v2872_v20  ;;  %v8523_v34 = vpop.eup %7194  ;;  %7216 = vpow2.f32 %v2670_v47  ;;  %v8537_v20 = vmul.f32 1.442695, %v2506_v53 }
 0x23a   : > { %11355 = vst [vmem:[#allocation71_spill] sm:$0xff] %v8523_v34  ;;  %v8529_v16 = vpop.eup %7196  ;;  %7218 = vpow2.f32 %v2672_v10  ;;  %v2516_v63 = vsub.f32 %v11359_v40, %v8507_v31  ;;  %v11362_v10 = vsub.f32 %v11344_v7, %v8332_v61  ;;  %v2708_v40 = vmul.f32 1.442695, %v2515_v33  ;;  %v11368_v33 = vld [vmem:[#allocation17_spill] sm:$0xff] }
 0x23b   : > { %v2856_v41 = vadd.f32 %v8487_v49, %v2855_v48  ;;  %11357 = vst [vmem:[#allocation72_spill] sm:$0xff] %v8529_v16  ;;  %v2874_v21 = vadd.f32 %v8523_v34, %v2873_v55  ;;  %v8535_v48 = vpop.eup %7198  ;;  %7220 = vpow2.f32 %v2674_v51  ;;  %v2517_v55 = vsub.f32 %v11363_v11, %v8507_v31 }
 0x23c   : > { %11358 = vst [vmem:[#allocation61_spill] sm:$0xff] %v8535_v48  ;;  %v8543_v2 = vpop.eup %7200  ;;  %7222 = vpow2.f32 %v2676_v58  ;;  %v8552_v53 = vmul.f32 1.442695, %v11362_v10  ;;  %v11365_v51 = vsub.f32 %v11346_v56, %v8332_v61  ;;  %v11367_v7 = vsub.f32 %v8244_v4, %v8332_v61 }
 0x23d   : > { %v2857_v23 = vadd.f32 %v8500_v54, %v2856_v41  ;;  %11360 = vst [vmem:[#allocation62_spill] sm:$0xff] %v8543_v2  ;;  %v2875_v47 = vadd.f32 %v8535_v48, %v2874_v21  ;;  %v8547_v41 = vpop.eup %7202  ;;  %7224 = vpow2.f32 %v2678_v37  ;;  %v2518_v11 = vsub.f32 %v11368_v33, %v8507_v31 }
 0x23e   : > { %11361 = vst [vmem:[#allocation7_spill] sm:$0xff] %v8547_v41  ;;  %v8556_v54 = vpop.eup %7204  ;;  %v8562_v50 = vmul.f32 1.442695, %v11365_v51  ;;  %7226 = vpow2.f32 %v2680_v8  ;;  %v8570_v10 = vmul.f32 1.442695, %v11367_v7  ;;  %v11370_v51 = vsub.f32 %v8248_v59, %v8332_v61 }
 0x23f   : > { %v2858_v57 = vadd.f32 %v8509_v19, %v2857_v23  ;;  %11364 = vst [vmem:[#allocation8_spill] sm:$0xff] %v8556_v54  ;;  %v2876_v58 = vadd.f32 %v8547_v41, %v2875_v47  ;;  %v8565_v21 = vpop.eup %7206  ;;  %7228 = vpow2.f32 %v2706_v32  ;;  %v11372_v4 = vsub.f32 %v8206_v18, %v8332_v61 }
 0x240   : > { %11366 = vst [vmem:[#allocation3_spill] sm:$0xff] %v8565_v21  ;;  %v8574_v37 = vpop.eup %7208  ;;  %v8580_v47 = vmul.f32 1.442695, %v11370_v51  ;;  %7230 = vpow2.f32 %v2708_v40  ;;  %v11375_v32 = vsub.f32 %v8210_v0, %v8332_v61  ;;  %v11378_v40 = vld [vmem:[#allocation12_spill] sm:$0xff]  ;;  %v11380_v61 = vld [vmem:[#allocation27_spill] sm:$0xff] }
 0x241   : > { %v2859_v23 = vadd.f32 %v8516_v43, %v2858_v57  ;;  %v2710_v57 = vmul.f32 1.442695, %v2516_v63  ;;  %11369 = vst [vmem:[#allocation4_spill] sm:$0xff] %v8574_v37  ;;  %v2877_v8 = vadd.f32 %v8565_v21, %v2876_v58  ;;  %v8583_v43 = vpop.eup %7210  ;;  %v8588_v7 = vmul.f32 1.442695, %v11372_v4  ;;  %v11373_v63 = vld [vmem:[#allocation18_spill] sm:$0xff] }
 0x242   : > { %11371 = vst [vmem:[#allocation17_spill] sm:$0xff] %v8583_v43  ;;  %v2519_v33 = vsub.f32 %v11373_v63, %v8507_v31  ;;  %7232 = vpow2.f32 %v2682_v9  ;;  %v8598_v58 = vmul.f32 1.442695, %v11375_v32  ;;  %v11377_v4 = vld [vmem:[#allocation11_spill] sm:$0xff]  ;;  %v2714_v63 = vmul.f32 1.442695, %v2518_v11 }
 0x243   : > { %v2860_v56 = vadd.f32 %v8529_v16, %v2859_v23  ;;  %v2712_v23 = vmul.f32 1.442695, %v2517_v55  ;;  %v8592_v16 = vpop.eup %7212  ;;  %v2878_v51 = vadd.f32 %v8583_v43, %v2877_v8  ;;  %v2520_v19 = vsub.f32 %v11377_v4, %v8507_v31  ;;  %v11382_v32 = vld [vmem:[#allocation28_spill] sm:$0xff] }
 0x244   : > { %11374 = vst [vmem:[#allocation18_spill] sm:$0xff] %v8592_v16  ;;  %v8601_v18 = vpop.eup %7214  ;;  %v2521_v55 = vsub.f32 %v11378_v40, %v8507_v31  ;;  %7234 = vpow2.f32 %v2710_v57  ;;  %v2523_v4 = vsub.f32 %v11382_v32, %v8507_v31  ;;  %v2716_v11 = vmul.f32 1.442695, %v2519_v33  ;;  %v11387_v32 = vld [vmem:[#allocation39_spill] sm:$0xff] }
 0x245   : > { %v2861_v59 = vadd.f32 %v8543_v2, %v2860_v56  ;;  %11376 = vst [vmem:[#allocation91_spill] sm:$0xff] %v8601_v18  ;;  %v8607_v52 = vpop.eup %7216  ;;  %7236 = vpow2.f32 %v2684_v28  ;;  %v2879_v0 = vadd.f32 %v8601_v18, %v2878_v51  ;;  %v2522_v56 = vsub.f32 %v11380_v61, %v8507_v31  ;;  %v11383_v2 = vld [vmem:[#allocation19_spill] sm:$0xff]  ;;  %v11385_v51 = vld [vmem:[#allocation20_spill] sm:$0xff] }
 0x246   : > { %11379 = vst [vmem:[#allocation11_spill] sm:$0xff] %v8607_v52  ;;  %v8613_v8 = vpop.eup %7218  ;;  %v2524_v40 = vsub.f32 %v11383_v2, %v8507_v31  ;;  %7238 = vpow2.f32 %v2712_v23  ;;  %v2525_v61 = vsub.f32 %v11385_v51, %v8507_v31  ;;  %v2526_v49 = vsub.f32 %v11387_v32, %v8507_v31  ;;  %v11388_v2 = vld [vmem:[#allocation40_spill] sm:$0xff]  ;;  %v11392_v32 = vld [vmem:[#allocation30_spill] sm:$0xff] }
 0x247   : > { %v2862_v9 = vadd.f32 %v8556_v54, %v2861_v59  ;;  %11381 = vst [vmem:[#allocation12_spill] sm:$0xff] %v8613_v8  ;;  %v8619_v57 = vpop.eup %7220  ;;  %7240 = vpow2.f32 %v8525_v6  ;;  %v2880_v28 = vadd.f32 %v8607_v52, %v2879_v0  ;;  %v2527_v23 = vsub.f32 %v11388_v2, %v8507_v31  ;;  %v11390_v0 = vld [vmem:[#allocation29_spill] sm:$0xff]  ;;  %v11393_v2 = vld [vmem:[#allocation51_spill] sm:$0xff] }
 0x248   : > { %11384 = vst [vmem:[#allocation27_spill] sm:$0xff] %v8619_v57  ;;  %v8626_v54 = vpop.eup %7222  ;;  %7242 = vpow2.f32 %v2714_v63  ;;  %v2718_v33 = vmul.f32 1.442695, %v2520_v19  ;;  %v2528_v51 = vsub.f32 %v11390_v0, %v8507_v31  ;;  %v2529_v52 = vsub.f32 %v11392_v32, %v8507_v31  ;;  %v11396_v0 = vld [vmem:[#allocation41_spill] sm:$0xff]  ;;  %v11398_v32 = vld [vmem:[#allocation42_spill] sm:$0xff] }
 0x249   : > { %v2863_v59 = vadd.f32 %v8574_v37, %v2862_v9  ;;  %11386 = vst [vmem:[#allocation28_spill] sm:$0xff] %v8626_v54  ;;  %v8632_v43 = vpop.eup %7224  ;;  %7244 = vpow2.f32 %v8532_v35  ;;  %v2881_v6 = vadd.f32 %v8613_v8, %v2880_v28  ;;  %v2530_v63 = vsub.f32 %v11393_v2, %v8507_v31 }
 0x24a   : > { %11389 = vst [vmem:[#allocation19_spill] sm:$0xff] %v8632_v43  ;;  %v8639_v37 = vpop.eup %7226  ;;  %7246 = vpow2.f32 %v2716_v11  ;;  %v2720_v19 = vmul.f32 1.442695, %v2521_v55  ;;  %v2533_v2 = vsub.f32 %v11398_v32, %v8507_v31  ;;  %v11399_v55 = vld [vmem:[#allocation63_spill] sm:$0xff]  ;;  %v11403_v32 = vld [vmem:[#allocation53_spill] sm:$0xff] }
 0x24b   : > { %v2864_v9 = vadd.f32 %v8592_v16, %v2863_v59  ;;  %11391 = vst [vmem:[#allocation20_spill] sm:$0xff] %v8639_v37  ;;  %v8645_v18 = vpop.eup %7228  ;;  %7248 = vpow2.f32 %v8537_v20  ;;  %v2882_v35 = vadd.f32 %v8619_v57, %v2881_v6  ;;  %v11395_v59 = vld [vmem:[#allocation52_spill] sm:$0xff]  ;;  %v2532_v16 = vsub.f32 %v11396_v0, %v8507_v31 }
 0x24c   : > { %11394 = vst [vmem:[#allocation39_spill] sm:$0xff] %v8645_v18  ;;  %v2531_v28 = vsub.f32 %v11395_v59, %v8507_v31  ;;  %v8653_v8 = vpop.eup %7230  ;;  %v2534_v11 = vsub.f32 %v11399_v55, %v8507_v31  ;;  %7250 = vpow2.f32 %v2718_v33  ;;  %v11401_v6 = vld [vmem:[#allocation64_spill] sm:$0xff]  ;;  %v2536_v34 = vsub.f32 %v11403_v32, %v8507_v31  ;;  %v11404_v33 = vld [vmem:[#allocation54_spill] sm:$0xff] }
 0x24d   : > { %2865 = vadd.xlane.f32.xlu0 %v2864_v9  ;;  %11397 = vst [vmem:[#allocation40_spill] sm:$0xff] %v8653_v8  ;;  %v2722_v9 = vmul.f32 1.442695, %v2522_v56  ;;  %v8659_v41 = vpop.eup %7232  ;;  %7252 = vpow2.f32 %v8539_v45  ;;  %v2883_v20 = vadd.f32 %v8626_v54, %v2882_v35  ;;  %v2535_v59 = vsub.f32 %v11401_v6, %v8507_v31  ;;  %v11406_v35 = vld [vmem:[#allocation73_spill] sm:$0xff]  ;;  %v11408_v32 = vld [vmem:[#allocation74_spill] sm:$0xff] }
 0x24e   : > { %11400 = vst [vmem:[#allocation29_spill] sm:$0xff] %v8659_v41  ;;  %v2900_v0 = vadd.f32 %v8653_v8, %v8645_v18  ;;  %v8667_v57 = vpop.eup %7234  ;;  %v2537_v56 = vsub.f32 %v11404_v33, %v8507_v31  ;;  %7254 = vpow2.f32 %v2720_v19  ;;  %v2724_v55 = vmul.f32 1.442695, %v2523_v4  ;;  %v11409_v33 = vld [vmem:[#allocation65_spill] sm:$0xff] }
 0x24f   : > { %11402 = vst [vmem:[#allocation30_spill] sm:$0xff] %v8667_v57  ;;  %v8673_v21 = vpop.eup %7236  ;;  %7256 = vpow2.f32 %v8552_v53  ;;  %v2884_v45 = vadd.f32 %v8632_v43, %v2883_v20  ;;  %v2726_v4 = vmul.f32 1.442695, %v2524_v40  ;;  %v11411_v20 = vld [vmem:[#allocation66_spill] sm:$0xff]  ;;  %v2728_v40 = vmul.f32 1.442695, %v2525_v61 }
 0x250   : > { %11405 = vst [vmem:[#allocation51_spill] sm:$0xff] %v8673_v21  ;;  %v2901_v54 = vadd.f32 %v8667_v57, %v2900_v0  ;;  %v8680_v48 = vpop.eup %7238  ;;  %7258 = vpow2.f32 %v2722_v9  ;;  %v2730_v27 = vmul.f32 1.442695, %v2526_v49  ;;  %v2734_v38 = vmul.f32 1.442695, %v2528_v51  ;;  %v8816_v57 = vld [vmem:[%s11070_s8 + $0x10] sm:$0xff] }
 0x251   : > { %11407 = vst [vmem:[#allocation52_spill] sm:$0xff] %v8680_v48  ;;  %v8686_v30 = vpop.eup %7240  ;;  %7260 = vpow2.f32 %v8562_v50  ;;  %v2885_v53 = vadd.f32 %v8639_v37, %v2884_v45  ;;  %v2732_v37 = vmul.f32 1.442695, %v2527_v23  ;;  %v8715_v45 = vpop.xlane.xlu1 %2448  ;;  %v8719_v49 = vmul.f32 1.442695, %v2532_v16 }
 0x252   : > { %11410 = vst [vmem:[#allocation41_spill] sm:$0xff] %v8686_v30  ;;  %v2902_v0 = vadd.f32 %v8680_v48, %v2901_v54  ;;  %v8693_v43 = vpop.eup %7242  ;;  %7262 = vpow2.f32 %v2724_v55  ;;  %v8725_v51 = vmul.f32 1.442695, %v2533_v2  ;;  %v11420_v2 = vld [vmem:[#allocation9_spill] sm:$0xff] }
 0x253   : > { %11412 = vst [vmem:[#allocation42_spill] sm:$0xff] %v8693_v43  ;;  %v8699_v19 = vpop.eup %7244  ;;  %7264 = vpow2.f32 %v8570_v10  ;;  %v2886_v50 = vadd.f32 %v8659_v41, %v2885_v53  ;;  %v2736_v10 = vmul.f32 1.442695, %v2529_v52  ;;  %v8717_v41 = vmul.f32 1.442695, %v2531_v28 }
 0x254   : > { %11413 = vst [vmem:[#allocation63_spill] sm:$0xff] %v8699_v19  ;;  %v2903_v54 = vadd.f32 %v8693_v43, %v2902_v0  ;;  %v8706_v6 = vpop.eup %7246  ;;  %7266 = vpow2.f32 %v2726_v4  ;;  %v2738_v0 = vmul.f32 1.442695, %v2530_v63  ;;  %v8732_v63 = vmul.f32 1.442695, %v2535_v59  ;;  %v11423_v59 = vld [vmem:[#allocation5_spill] sm:$0xff] }
 0x255   : > { %11414 = vst [vmem:[#allocation64_spill] sm:$0xff] %v8706_v6  ;;  %v8708_v9 = vpop.eup %7248  ;;  %7268 = vpow2.f32 %v8580_v47  ;;  %v2887_v61 = vadd.f32 %v8673_v21, %v2886_v50  ;;  %v8730_v50 = vmul.f32 1.442695, %v2534_v11  ;;  %v8734_v28 = vmul.f32 1.442695, %v2536_v34  ;;  %v3104_v43 = vld [vmem:[%s11070_s8 + $0x8] sm:$0xff] }
 0x256   : > { %11415 = vst [vmem:[#allocation53_spill] sm:$0xff] %v8708_v9  ;;  %v2904_v55 = vadd.f32 %v8706_v6, %v2903_v54  ;;  %v8713_v53 = vpop.eup %7250  ;;  %7270 = vpow2.f32 %v2728_v40  ;;  %v2546_v54 = vsub.f32 %v11420_v2, %v8715_v45  ;;  %v8749_v34 = vmul.f32 1.442695, %v2537_v56  ;;  %v3120_v2 = vld [vmem:[%s11070_s8 + $0x88] sm:$0xff] }
 0x257   : > { %11416 = vst [vmem:[#allocation54_spill] sm:$0xff] %v8713_v53  ;;  %v8721_v23 = vpop.eup %7252  ;;  %7272 = vpow2.f32 %v8588_v7  ;;  %v2888_v47 = vadd.f32 %v8686_v30, %v2887_v61  ;;  %v11421_v61 = vld [vmem:[#allocation10_spill] sm:$0xff] }
 0x258   : > { %11417 = vst [vmem:[#allocation73_spill] sm:$0xff] %v8721_v23  ;;  %v2905_v52 = vadd.f32 %v8713_v53, %v2904_v55  ;;  %v8728_v4 = vpop.eup %7254  ;;  %7274 = vpow2.f32 %v2730_v27  ;;  %v2547_v55 = vsub.f32 %v11421_v61, %v8715_v45  ;;  %v3119_v27 = vld [vmem:[%s11070_s8 + $0x80] sm:$0xff]  ;;  %v2770_v14 = vmul.f32 1.442695, %v2546_v54  ;;  %v3137_v54 = vld [vmem:[%s11070_s8 + $0x110] sm:$0xff] }
 0x259   : > { %11418 = vst [vmem:[#allocation74_spill] sm:$0xff] %v8728_v4  ;;  %v8736_v16 = vpop.eup %7256  ;;  %v2889_v40 = vadd.f32 %v8699_v19, %v2888_v47  ;;  %7276 = vpow2.f32 %v2732_v37  ;;  %v2548_v47 = vsub.f32 %v11423_v59, %v8715_v45  ;;  %v3151_v61 = vld [vmem:[%s11070_s8 + $0x180] sm:$0xff]  ;;  %v3152_v37 = vld [vmem:[%s11070_s8 + $0x188] sm:$0xff]  ;;  %v6528_v13 = vpack.c.bf16 %v3120_v2, %v3119_v27 }
 0x25a   : > { %11419 = vst [vmem:[#allocation65_spill] sm:$0xff] %v8736_v16  ;;  %v2906_v7 = vadd.f32 %v8728_v4, %v2905_v52  ;;  %v8747_v11 = vpop.eup %7258  ;;  %v11424_v52 = vld [vmem:[#allocation6_spill] sm:$0xff]  ;;  %7278 = vpow2.f32 %v8598_v58  ;;  %v3103_v53 = vld [vmem:[%s11070_s8] sm:$0xff]  ;;  %v2772_v6 = vmul.f32 1.442695, %v2547_v55  ;;  %v3124_v27 = vld [vmem:[%s11070_s8 + $0xa8] sm:$0xff] }
 0x25b   : > { %11422 = vst [vmem:[#allocation66_spill] sm:$0xff] %v8747_v11  ;;  %v2549_v30 = vsub.f32 %v11424_v52, %v8715_v45  ;;  %v8764_v56 = vpop.eup %7260  ;;  %v2890_v59 = vadd.f32 %v8708_v9, %v2889_v40  ;;  %v11425_v52 = vsub.f32 %v11406_v35, %v8507_v31  ;;  %v3135_v58 = vld [vmem:[%s11070_s8 + $0x100] sm:$0xff]  ;;  %v3136_v35 = vld [vmem:[%s11070_s8 + $0x108] sm:$0xff]  ;;  %7280 = vpow2.f32 %v2734_v38  ;;  %v11428_v9 = vld [vmem:[#allocation21_spill] sm:$0xff]  ;;  %6529 = vmatprep.subr.bf16.mxu0 %v6528_v13 }
 0x25c   : > { %v2907_v21 = vadd.f32 %v8747_v11, %v2906_v7  ;;  %v8786_v40 = vpop.eup %7262  ;;  %v11427_v7 = vsub.f32 %v11408_v32, %v8507_v31  ;;  %v2550_v11 = vsub.f32 %v11428_v9, %v8715_v45  ;;  %v11429_v4 = vld [vmem:[#allocation22_spill] sm:$0xff]  ;;  %v3153_v38 = vld [vmem:[%s11070_s8 + $0x190] sm:$0xff]  ;;  %7282 = vpow2.f32 %v2736_v10  ;;  %v3123_v10 = vld [vmem:[%s11070_s8 + $0xa0] sm:$0xff] }
 0x25d   : > { %v8771_v19 = vmul.f32 1.442695, %v11425_v52  ;;  %11426 = vst [vmem:[#allocation9_spill] sm:$0xff] %v8786_v40  ;;  %v8806_v32 = vpop.eup %7264  ;;  %v2774_v48 = vmul.f32 1.442695, %v2548_v47  ;;  %7284 = vpow2.f32 %v2738_v0  ;;  %v6530_v0 = vpack.c.bf16 %v3104_v43, %v3103_v53  ;;  %v3107_v53 = vld [vmem:[%s11070_s8 + $0x20] sm:$0xff] }
 0x25e   : > { %v8791_v52 = vmul.f32 1.442695, %v11427_v7  ;;  %11430 = vst [vmem:[#allocation10_spill] sm:$0xff] %v8806_v32  ;;  %v2891_v7 = vadd.f32 %v8721_v23, %v2890_v59  ;;  %v2908_v9 = vadd.f32 %v8786_v40, %v2907_v21  ;;  %v8818_v18 = vpop.eup %7266  ;;  %v2776_v8 = vmul.f32 1.442695, %v2549_v30  ;;  %v3106_v21 = vld [vmem:[%s11070_s8 + $0x18] sm:$0xff] }
 0x25f   : > { %11431 = vst [vmem:[#allocation5_spill] sm:$0xff] %v8818_v18  ;;  %v8826_v55 = vpop.eup %7268  ;;  %v6560_v40 = vpack.c.bf16 %v3152_v37, %v3151_v61  ;;  %v3138_v30 = vld [vmem:[%s11070_s8 + $0x118] sm:$0xff]  ;;  %7286 = vpow2.f32 %v8717_v41  ;;  %v6562_v2 = vpack.c.bf16 %v3136_v35, %v3135_v58  ;;  %v6532_v61 = vpack.c.bf16 %v3122_v36, %v3121_v42  ;;  %v3155_v37 = vld [vmem:[%s11070_s8 + $0x1a0] sm:$0xff]  ;;  %6531 = vmatpush3.bf16.msra.mxu0 %v6530_v0  ;;  %v11435_v35 = vld [vmem:[#allocation13_spill] sm:$0xff] }
 0x260   : > { %11432 = vst [vmem:[#allocation6_spill] sm:$0xff] %v8826_v55  ;;  %v2892_v59 = vadd.f32 %v8736_v16, %v2891_v7  ;;  %v2909_v23 = vadd.f32 %v8818_v18, %v2908_v9  ;;  %v8839_v47 = vpop.eup %7270  ;;  %v3156_v7 = vld [vmem:[%s11070_s8 + $0x1a8] sm:$0xff]  ;;  %7288 = vpow2.f32 %v2770_v14  ;;  %v6564_v13 = vpack.c.bf16 %v3154_v60, %v3153_v38 }
 0x261   : > { %v8848_v9 = vpop.eup %7272  ;;  %6561 = vmatprep.subr.bf16.mxu1 %v6560_v40  ;;  %7290 = vpow2.f32 %v2772_v6  ;;  %v6534_v36 = vpack.c.bf16 %v3106_v21, %v8816_v57  ;;  %v6566_v42 = vpack.c.bf16 %v3138_v30, %v3137_v54  ;;  %v6536_v41 = vpack.c.bf16 %v3124_v27, %v3123_v10  ;;  %6533 = vmatprep.subr.bf16.mxu0 %v6532_v61  ;;  %v3108_v6 = vld [vmem:[%s11070_s8 + $0x28] sm:$0xff]  ;;  %v3139_v57 = vld [vmem:[%s11070_s8 + $0x120] sm:$0xff]  ;;  %v3125_v21 = vld [vmem:[%s11070_s8 + $0xb0] sm:$0xff] }
 0x262   : > { %11433 = vst [vmem:[#allocation21_spill] sm:$0xff] %v8848_v9  ;;  %v2893_v16 = vadd.f32 %v8764_v56, %v2892_v59  ;;  %v2910_v18 = vadd.f32 %v8839_v47, %v2909_v23  ;;  %v8852_v43 = vpop.eup %7274  ;;  %6563 = vmatpush3.bf16.msra.mxu1 %v6562_v2  ;;  %7292 = vpow2.f32 %v8719_v49  ;;  %v6568_v60 = vpack.c.bf16 %v3156_v7, %v3155_v37  ;;  %v3140_v23 = vld [vmem:[%s11070_s8 + $0x128] sm:$0xff]  ;;  %v3126_v54 = vld [vmem:[%s11070_s8 + $0xb8] sm:$0xff]  ;;  %v3109_v7 = vld [vmem:[%s11070_s8 + $0x30] sm:$0xff] }
 0x263   : > { %6565 = vmatprep.subr.bf16.mxu1 %v6564_v13  ;;  %v2552_v40 = vsub.f32 %v11435_v35, %v8715_v45  ;;  %7294 = vpow2.f32 %v2774_v48  ;;  %v2778_v38 = vmul.f32 1.442695, %v2550_v11  ;;  %v11437_v10 = vld [vmem:[#allocation14_spill] sm:$0xff]  ;;  %v3157_v11 = vld [vmem:[%s11070_s8 + $0x1b0] sm:$0xff]  ;;  %v11438_v2 = vsub.f32 %v11429_v4, %v8715_v45  ;;  %6535 = vmatpush3.bf16.msra.mxu0 %v6534_v36 }
 0x264   : > { %v2894_v58 = vadd.f32 %v8806_v32, %v2893_v16  ;;  %v2911_v14 = vadd.f32 %v8852_v43, %v2910_v18  ;;  %v8870_v16 = vpop.eup %7276  ;;  %v11434_v18 = vsub.f32 %v11409_v33, %v8507_v31  ;;  %7296 = vpow2.f32 %v8725_v51  ;;  %v3158_v27 = vld [vmem:[%s11070_s8 + $0x1b8] sm:$0xff]  ;;  %6537 = vmatprep.subr.bf16.mxu0 %v6536_v41  ;;  %v3141_v36 = vld [vmem:[%s11070_s8 + $0x130] sm:$0xff] }
 0x265   : > { %v8885_v59 = vpop.eup %7278  ;;  %v2553_v48 = vsub.f32 %v11437_v10, %v8715_v45  ;;  %7298 = vpow2.f32 %v2776_v8  ;;  %v2780_v51 = vmul.f32 1.442695, %v11438_v2  ;;  %v6538_v61 = vpack.c.bf16 %v3108_v6, %v3107_v53  ;;  %v3110_v13 = vld [vmem:[%s11070_s8 + $0x38] sm:$0xff]  ;;  %v3127_v53 = vld [vmem:[%s11070_s8 + $0xc0] sm:$0xff] }
 0x266   : > { %v8875_v49 = vmul.f32 1.442695, %v11434_v18  ;;  %11436 = vst [vmem:[#allocation22_spill] sm:$0xff] %v8885_v59  ;;  %v2895_v30 = vadd.f32 %v8826_v55, %v2894_v58  ;;  %v2912_v33 = vadd.f32 %v8870_v16, %v2911_v14  ;;  %v8898_v0 = vpop.eup %7280  ;;  %6567 = vmatpush3.bf16.msra.mxu1 %v6566_v42  ;;  %v6570_v37 = vpack.c.bf16 %v3140_v23, %v3139_v57  ;;  %v3142_v42 = vld [vmem:[%s11070_s8 + $0x138] sm:$0xff]  ;;  %v3128_v57 = vld [vmem:[%s11070_s8 + $0xc8] sm:$0xff]  ;;  %v3159_v23 = vld [vmem:[%s11070_s8 + $0x1c0] sm:$0xff] }
 0x267   : > { %7300 = vpow2.f32 %v8730_v50  ;;  %6569 = vmatprep.subr.bf16.mxu1 %v6568_v60  ;;  %v6540_v4 = vpack.c.bf16 %v3126_v54, %v3125_v21  ;;  %v8921_v14 = vpop.eup %7282  ;;  %v11439_v50 = vld [vmem:[#allocation31_spill] sm:$0xff]  ;;  %v2782_v41 = vmul.f32 1.442695, %v2552_v40  ;;  %v6572_v60 = vpack.c.bf16 %v3158_v27, %v3157_v11  ;;  %v3160_v18 = vld [vmem:[%s11070_s8 + $0x1c8] sm:$0xff]  ;;  %6539 = vmatpush3.bf16.msra.mxu0 %v6538_v61 }
 0x268   : > { %v2896_v58 = vadd.f32 %v8848_v9, %v2895_v30  ;;  %v2913_v8 = vadd.f32 %v8898_v0, %v2912_v33  ;;  %v2554_v6 = vsub.f32 %v11439_v50, %v8715_v45  ;;  %7302 = vpow2.f32 %v2778_v38  ;;  %v8934_v35 = vpop.eup %7284  ;;  %v11440_v38 = vld [vmem:[#allocation32_spill] sm:$0xff]  ;;  %v3111_v27 = vld [vmem:[%s11070_s8 + $0x40] sm:$0xff]  ;;  %v3161_v50 = vld [vmem:[%s11070_s8 + $0x1d0] sm:$0xff] }
 0x269   : > { %7304 = vpow2.f32 %v8732_v63  ;;  %v2555_v54 = vsub.f32 %v11440_v38, %v8715_v45  ;;  %v8941_v30 = vpop.eup %7286  ;;  %v2784_v33 = vmul.f32 1.442695, %v2553_v48  ;;  %v6542_v10 = vpack.c.bf16 %v3110_v13, %v3109_v7  ;;  %v3112_v63 = vld [vmem:[%s11070_s8 + $0x48] sm:$0xff]  ;;  %v3143_v2 = vld [vmem:[%s11070_s8 + $0x140] sm:$0xff]  ;;  %6541 = vmatprep.subr.bf16.mxu0 %v6540_v4  ;;  %v3129_v7 = vld [vmem:[%s11070_s8 + $0xd0] sm:$0xff] }
 0x26a   : > { %v2897_v21 = vadd.f32 %v8885_v59, %v2896_v58  ;;  %v2914_v40 = vadd.f32 %v8921_v14, %v2913_v8  ;;  %7306 = vpow2.f32 %v2780_v51  ;;  %6571 = vmatpush3.bf16.msra.mxu1 %v6570_v37  ;;  %v6574_v11 = vpack.c.bf16 %v3142_v42, %v3141_v36  ;;  %v8952_v58 = vpop.eup %7288  ;;  %v3144_v37 = vld [vmem:[%s11070_s8 + $0x148] sm:$0xff]  ;;  %v3130_v13 = vld [vmem:[%s11070_s8 + $0xd8] sm:$0xff] }
 0x26b   : > { %7308 = vpow2.f32 %v8734_v28  ;;  %v6544_v51 = vpack.c.bf16 %v3128_v57, %v3127_v53  ;;  %v6576_v61 = vpack.c.bf16 %v3160_v18, %v3159_v23  ;;  %v8965_v8 = vpop.eup %7290  ;;  %v11441_v28 = vld [vmem:[#allocation23_spill] sm:$0xff]  ;;  %v11442_v4 = vld [vmem:[#allocation24_spill] sm:$0xff]  ;;  %v2786_v53 = vmul.f32 1.442695, %v2554_v6  ;;  %6573 = vmatprep.subr.bf16.mxu1 %v6572_v60  ;;  %v3162_v57 = vld [vmem:[%s11070_s8 + $0x1d8] sm:$0xff]  ;;  %6543 = vmatpush3.bf16.msra.mxu0 %v6542_v10 }
 0x26c   : > { %2898 = vadd.xlane.f32.xlu1 %v2897_v21  ;;  %v2915_v48 = vadd.f32 %v8934_v35, %v2914_v40  ;;  %v2556_v36 = vsub.f32 %v11441_v28, %v8715_v45  ;;  %v2557_v42 = vsub.f32 %v11442_v4, %v8715_v45  ;;  %7310 = vpow2.f32 %v2782_v41  ;;  %v8977_v23 = vpop.eup %7292  ;;  %v3113_v28 = vld [vmem:[%s11070_s8 + $0x50] sm:$0xff]  ;;  %v3114_v10 = vld [vmem:[%s11070_s8 + $0x58] sm:$0xff] }
 0x26d   : > { %7312 = vpow2.f32 %v8749_v34  ;;  %v2788_v21 = vmul.f32 1.442695, %v2555_v54  ;;  %v2933_v41 = vadd.f32 %v8965_v8, %v8952_v58  ;;  %v8983_v6 = vpop.eup %7294  ;;  %v6546_v60 = vpack.c.bf16 %v3112_v63, %v3111_v27  ;;  %6545 = vmatprep.subr.bf16.mxu0 %v6544_v51  ;;  %v3146_v27 = vld [vmem:[%s11070_s8 + $0x158] sm:$0xff] }
 0x26e   : > { %v2916_v18 = vadd.f32 %v8941_v30, %v2915_v48  ;;  %7314 = vpow2.f32 %v2784_v33  ;;  %6575 = vmatpush3.bf16.msra.mxu1 %v6574_v11  ;;  %v6578_v40 = vpack.c.bf16 %v3144_v37, %v3143_v2  ;;  %v6548_v38 = vpack.c.bf16 %v3130_v13, %v3129_v7  ;;  %v8988_v4 = vpop.eup %7296  ;;  %v3145_v11 = vld [vmem:[%s11070_s8 + $0x150] sm:$0xff]  ;;  %v11444_v48 = vld [vmem:[#allocation43_spill] sm:$0xff]  ;;  %v11445_v13 = vld [vmem:[#allocation44_spill] sm:$0xff] }
 0x26f   : > { %7316 = vpow2.f32 %v8771_v19  ;;  %v2934_v54 = vadd.f32 %v8983_v6, %v2933_v41  ;;  %6577 = vmatprep.subr.bf16.mxu1 %v6576_v61  ;;  %v6580_v33 = vpack.c.bf16 %v3162_v57, %v3161_v50  ;;  %v9002_v19 = vpop.eup %7298  ;;  %v11443_v63 = vsub.f32 %v11411_v20, %v8507_v31  ;;  %6547 = vmatpush3.bf16.msra.mxu0 %v6546_v60  ;;  %v11447_v60 = vld [vmem:[#allocation33_spill] sm:$0xff] }
 0x270   : > { %v2917_v34 = vadd.f32 %v8977_v23, %v2916_v18  ;;  %v2558_v51 = vsub.f32 %v11444_v48, %v8715_v45  ;;  %7318 = vpow2.f32 %v2786_v53  ;;  %v2790_v61 = vmul.f32 1.442695, %v2556_v36  ;;  %6549 = vmatprep.subr.bf16.mxu0 %v6548_v38 }
 0x271   : > { %v2760_v2 = vmul.f32 1.442695, %v11443_v63  ;;  %v9009_v37 = vpop.eup %7300  ;;  %7320 = vpow2.f32 %v8791_v52  ;;  %v2559_v50 = vsub.f32 %v11445_v13, %v8715_v45  ;;  %v2935_v57 = vadd.f32 %v9002_v19, %v2934_v54 }
 0x272   : > { %v2918_v7 = vadd.f32 %v8988_v4, %v2917_v34  ;;  %v9016_v18 = vpop.eup %7302  ;;  %7322 = vpow2.f32 %v2788_v21  ;;  %v2792_v20 = vmul.f32 1.442695, %v2557_v42  ;;  %6579 = vmatpush3.bf16.msra.mxu1 %v6578_v40  ;;  %v6550_v41 = vpack.c.bf16 %v3114_v10, %v3113_v28 }
 0x273   : > { %v6582_v53 = vpack.c.bf16 %v3146_v27, %v3145_v11  ;;  %v9018_v36 = vpop.eup %7304  ;;  %7324 = vpow2.f32 %v8875_v49  ;;  %v11446_v52 = vsub.f32 %v8252_v22, %v8507_v31  ;;  %v2936_v54 = vadd.f32 %v9016_v18, %v2935_v57  ;;  %6581 = vmatprep.subr.bf16.mxu1 %v6580_v33 }
 0x274   : > { %v2919_v63 = vadd.f32 %v9009_v37, %v2918_v7  ;;  %v9026_v21 = vpop.eup %7306  ;;  %v2545_v42 = vsub.f32 %v8222_v62, %v8507_v31  ;;  %v2560_v40 = vsub.f32 %v11447_v60, %v8715_v45  ;;  %7326 = vpow2.f32 %v2790_v61  ;;  %v11449_v62 = vld [vmem:[#allocation34_spill] sm:$0xff]  ;;  %6551 = vmatpush3.bf16.msra.mxu0 %v6550_v41 }
 0x275   : > { %v2762_v34 = vmul.f32 1.442695, %v11446_v52  ;;  %v2794_v49 = vmul.f32 1.442695, %v2558_v51  ;;  %v9032_v28 = vpop.eup %7308  ;;  %7328 = vpow2.f32 %v2760_v2  ;;  %v11448_v22 = vsub.f32 %v8256_v39, %v8507_v31  ;;  %v11451_v52 = vld [vmem:[#allocation55_spill] sm:$0xff] }
 0x276   : > { %v2920_v38 = vadd.f32 %v9018_v36, %v2919_v63  ;;  %v2937_v33 = vadd.f32 %v9026_v21, %v2936_v54  ;;  %v9039_v11 = vpop.eup %7310  ;;  %v2561_v27 = vsub.f32 %v11449_v62, %v8715_v45  ;;  %7330 = vpow2.f32 %v2792_v20  ;;  %6583 = vmatpush3.bf16.msra.mxu1 %v6582_v53  ;;  %v3131_v63 = vld [vmem:[%s11070_s8 + $0xe0] sm:$0xff]  ;;  %v3132_v54 = vld [vmem:[%s11070_s8 + $0xe8] sm:$0xff] }
 0x277   : > { %v2764_v10 = vmul.f32 1.442695, %v11448_v22  ;;  %v2796_v48 = vmul.f32 1.442695, %v2559_v50  ;;  %v9043_v51 = vpop.eup %7312  ;;  %7332 = vpow2.f32 %v2762_v34  ;;  %v11450_v39 = vsub.f32 %v8218_v1, %v8507_v31  ;;  %v11453_v1 = vld [vmem:[#allocation56_spill] sm:$0xff] }
 0x278   : > { %v2921_v61 = vadd.f32 %v9032_v28, %v2920_v38  ;;  %v2938_v7 = vadd.f32 %v9039_v11, %v2937_v33  ;;  %v9050_v13 = vpop.eup %7314  ;;  %v2768_v57 = vmul.f32 1.442695, %v2545_v42  ;;  %v2562_v20 = vsub.f32 %v11451_v52, %v8715_v45  ;;  %v3163_v42 = vld [vmem:[%s11070_s8 + $0x1e0] sm:$0xff]  ;;  %v3164_v38 = vld [vmem:[%s11070_s8 + $0x1e8] sm:$0xff] }
 0x279   : > { %v2766_v2 = vmul.f32 1.442695, %v11450_v39  ;;  %7334 = vpow2.f32 %v2794_v49  ;;  %v2798_v50 = vmul.f32 1.442695, %v2560_v40  ;;  %v9054_v41 = vpop.eup %7316  ;;  %v2563_v31 = vsub.f32 %v11453_v1, %v8715_v45  ;;  %v11454_v40 = vld [vmem:[#allocation45_spill] sm:$0xff]  ;;  %v3115_v33 = vld [vmem:[%s11070_s8 + $0x60] sm:$0xff] }
 0x27a   : > { %11452 = vst [vmem:[#allocation13_spill] sm:$0xff] %v9054_v41  ;;  %7336 = vpow2.f32 %v2764_v10  ;;  %v2922_v53 = vadd.f32 %v9043_v51, %v2921_v61  ;;  %v2939_v34 = vadd.f32 %v9050_v13, %v2938_v7  ;;  %v9069_v60 = vpop.eup %7318  ;;  %v2564_v49 = vsub.f32 %v11454_v40, %v8715_v45  ;;  %v3116_v62 = vld [vmem:[%s11070_s8 + $0x68] sm:$0xff]  ;;  %v3147_v7 = vld [vmem:[%s11070_s8 + $0x160] sm:$0xff] }
 0x27b   : > { %7338 = vpow2.f32 %v2796_v48  ;;  %v2800_v22 = vmul.f32 1.442695, %v2561_v27  ;;  %v6552_v10 = vpack.c.bf16 %v3132_v54, %v3131_v63  ;;  %v9082_v39 = vpop.eup %7320  ;;  %v6584_v48 = vpack.c.bf16 %v3164_v38, %v3163_v42  ;;  %v3148_v52 = vld [vmem:[%s11070_s8 + $0x168] sm:$0xff]  ;;  %v11456_v38 = vld [vmem:[#allocation46_spill] sm:$0xff] }
 0x27c   : > { %7340 = vpow2.f32 %v2766_v2  ;;  %v2923_v61 = vadd.f32 %v9054_v41, %v2922_v53  ;;  %v2940_v27 = vadd.f32 %v9069_v60, %v2939_v34  ;;  %v9092_v1 = vpop.eup %7322  ;;  %v2802_v63 = vmul.f32 1.442695, %v2562_v20 }
 0x27d   : > { %7342 = vpow2.f32 %v2798_v50  ;;  %6553 = vmatprep.subr.bf16.mxu0 %v6552_v10  ;;  %v6554_v54 = vpack.c.bf16 %v3116_v62, %v3115_v33  ;;  %v6586_v2 = vpack.c.bf16 %v3148_v52, %v3147_v7  ;;  %v9094_v40 = vpop.eup %7324  ;;  %6585 = vmatprep.subr.bf16.mxu1 %v6584_v48  ;;  %v2565_v9 = vsub.f32 %v11456_v38, %v8715_v45  ;;  %v11457_v33 = vld [vmem:[#allocation67_spill] sm:$0xff]  ;;  %v11459_v7 = vld [vmem:[#allocation68_spill] sm:$0xff] }
 0x27e   : > { %11455 = vst [vmem:[#allocation14_spill] sm:$0xff] %v9094_v40  ;;  %7344 = vpow2.f32 %v2768_v57  ;;  %v2924_v53 = vadd.f32 %v9082_v39, %v2923_v61  ;;  %v2941_v34 = vadd.f32 %v9092_v1, %v2940_v27  ;;  %v9098_v42 = vpop.eup %7326  ;;  %v2804_v32 = vmul.f32 1.442695, %v2563_v31 }
 0x27f   : > { %7346 = vpow2.f32 %v2800_v22  ;;  %6555 = vmatpush3.bf16.msra.mxu0 %v6554_v54  ;;  %6587 = vmatpush3.bf16.msra.mxu1 %v6586_v2  ;;  %v9102_v20 = vpop.eup %7328  ;;  %v2566_v62 = vsub.f32 %v11457_v33, %v8715_v45  ;;  %v2806_v61 = vmul.f32 1.442695, %v2564_v49  ;;  %v2567_v52 = vsub.f32 %v11459_v7, %v8715_v45  ;;  %v11463_v7 = vld [vmem:[#allocation58_spill] sm:$0xff] }
 0x280   : > { %v2925_v50 = vadd.f32 %v9094_v40, %v2924_v53  ;;  %v2942_v57 = vadd.f32 %v9098_v42, %v2941_v34  ;;  %v9106_v10 = vpop.eup %7330  ;;  %7348 = vpow2.f32 %v2802_v63  ;;  %v2808_v54 = vmul.f32 1.442695, %v2565_v9  ;;  %v11461_v34 = vld [vmem:[#allocation57_spill] sm:$0xff] }
 0x281   : > { %v9110_v27 = vpop.eup %7332  ;;  %7350 = vpow2.f32 %v2804_v32  ;;  %v2568_v38 = vsub.f32 %v11461_v34, %v8715_v45  ;;  %v11465_v34 = vld [vmem:[#allocation75_spill] sm:$0xff] }
 0x282   : > { %11458 = vst [vmem:[#allocation31_spill] sm:$0xff] %v9110_v27  ;;  %v2926_v22 = vadd.f32 %v9102_v20, %v2925_v50  ;;  %v2943_v31 = vadd.f32 %v9106_v10, %v2942_v57  ;;  %7352 = vpow2.f32 %v2806_v61  ;;  %v2810_v50 = vmul.f32 1.442695, %v2566_v62 }
 0x283   : > { %v9114_v48 = vpop.eup %7334  ;;  %7354 = vpow2.f32 %v2808_v54 }
 0x284   : > { %v9118_v2 = vpop.eup %7336  ;;  %v2927_v53 = vadd.f32 %v9110_v27, %v2926_v22  ;;  %v2944_v63 = vadd.f32 %v9114_v48, %v2943_v31  ;;  %v2569_v22 = vsub.f32 %v11463_v7, %v8715_v45  ;;  %v2812_v31 = vmul.f32 1.442695, %v2567_v52  ;;  %v11466_v52 = vld [vmem:[#allocation76_spill] sm:$0xff] }
 0x285   : > { %11460 = vst [vmem:[#allocation32_spill] sm:$0xff] %v9118_v2  ;;  %v9122_v49 = vpop.eup %7338  ;;  %7356 = vpow2.f32 %v2810_v50  ;;  %v2571_v54 = vsub.f32 %v11466_v52, %v8715_v45 }
 0x286   : > { %v9126_v57 = vpop.eup %7340  ;;  %v2928_v33 = vadd.f32 %v9118_v2, %v2927_v53  ;;  %v2945_v32 = vadd.f32 %v9122_v49, %v2944_v63  ;;  %v2570_v53 = vsub.f32 %v11465_v34, %v8715_v45  ;;  %v2814_v63 = vmul.f32 1.442695, %v2568_v38  ;;  %v11467_v34 = vld [vmem:[#allocation69_spill] sm:$0xff] }
 0x287   : > { %11462 = vst [vmem:[#allocation23_spill] sm:$0xff] %v9126_v57  ;;  %v9130_v9 = vpop.eup %7342  ;;  %7358 = vpow2.f32 %v2812_v31  ;;  %v2572_v50 = vsub.f32 %v11467_v34, %v8715_v45  ;;  %v2820_v31 = vmul.f32 1.442695, %v2571_v54  ;;  %v2576_v34 = vsub.f32 %v8230_v46, %v8715_v45  ;;  %v3133_v46 = vld [vmem:[%s11070_s8 + $0xf0] sm:$0xff] }
 0x288   : > { %v9134_v27 = vpop.eup %7344  ;;  %v2929_v59 = vadd.f32 %v9126_v57, %v2928_v33  ;;  %v2946_v61 = vadd.f32 %v9130_v9, %v2945_v32  ;;  %v2816_v33 = vmul.f32 1.442695, %v2569_v22  ;;  %7360 = vpow2.f32 %v2814_v63 }
 0x289   : > { %11464 = vst [vmem:[#allocation24_spill] sm:$0xff] %v9134_v27  ;;  %v9138_v62 = vpop.eup %7346  ;;  %v2818_v38 = vmul.f32 1.442695, %v2570_v53  ;;  %v2822_v52 = vmul.f32 1.442695, %v2572_v50 }
 0x28a   : > { %v2930_v2 = vadd.f32 %v9134_v27, %v2929_v59  ;;  %v2947_v55 = vadd.f32 %v9138_v62, %v2946_v61  ;;  %v9144_v7 = vpop.eup %7348  ;;  %v11468_v27 = vld [vmem:[#allocation70_spill] sm:$0xff]  ;;  %7362 = vpow2.f32 %v2816_v33 }
 0x28b   : > { %v9149_v57 = vpop.eup %7350  ;;  %v2573_v40 = vsub.f32 %v11468_v27, %v8715_v45  ;;  %7364 = vpow2.f32 %v2818_v38 }
 0x28c   : > { %2931 = vadd.xlane.f32.xlu0 %v2930_v2  ;;  %v2948_v32 = vadd.f32 %v9144_v7, %v2947_v55  ;;  %v9154_v61 = vpop.eup %7352  ;;  %v2574_v55 = vsub.f32 %v8260_v24, %v8715_v45  ;;  %7366 = vpow2.f32 %v2820_v31 }
 0x28d   : > { %v9159_v22 = vpop.eup %7354  ;;  %v2824_v27 = vmul.f32 1.442695, %v2573_v40  ;;  %7368 = vpow2.f32 %v2822_v52 }
 0x28e   : > { %v2949_v59 = vadd.f32 %v9149_v57, %v2948_v32  ;;  %v2575_v32 = vsub.f32 %v8264_v15, %v8715_v45  ;;  %v2826_v24 = vmul.f32 1.442695, %v2574_v55  ;;  %v3134_v55 = vld [vmem:[%s11070_s8 + $0xf8] sm:$0xff] }
 0x28f   : > { %v9164_v63 = vpop.eup %7356  ;;  %7370 = vpow2.f32 %v2824_v27  ;;  %v3166_v27 = vld [vmem:[%s11070_s8 + $0x1f8] sm:$0xff] }
 0x290   : > { %v2950_v2 = vadd.f32 %v9154_v61, %v2949_v59  ;;  %v2577_v59 = vsub.f32 %v8234_v12, %v8715_v45  ;;  %v2828_v15 = vmul.f32 1.442695, %v2575_v32  ;;  %7372 = vpow2.f32 %v2826_v24  ;;  %v3165_v12 = vld [vmem:[%s11070_s8 + $0x1f0] sm:$0xff] }
 0x291   : > { %v9169_v33 = vpop.eup %7358  ;;  %v6556_v32 = vpack.c.bf16 %v3134_v55, %v3133_v46 }
 0x292   : > { %v2951_v53 = vadd.f32 %v9159_v22, %v2950_v2  ;;  %v9174_v38 = vpop.eup %7360  ;;  %v2830_v2 = vmul.f32 1.442695, %v2576_v34  ;;  %7374 = vpow2.f32 %v2828_v15  ;;  %v2832_v52 = vmul.f32 1.442695, %v2577_v59  ;;  %v3118_v34 = vld [vmem:[%s11070_s8 + $0x78] sm:$0xff]  ;;  %v3149_v59 = vld [vmem:[%s11070_s8 + $0x170] sm:$0xff] }
 0x293   : > { %v3150_v15 = vld [vmem:[%s11070_s8 + $0x178] sm:$0xff]  ;;  %6557 = vmatprep.subr.bf16.mxu0 %v6556_v32 }
 0x294   : > { %v2952_v54 = vadd.f32 %v9164_v63, %v2951_v53  ;;  %v9179_v31 = vpop.eup %7362  ;;  %7376 = vpow2.f32 %v2830_v2  ;;  %v6590_v55 = vpack.c.bf16 %v3150_v15, %v3149_v59  ;;  %v3183_v59 = vld [vmem:[%s11070_s8 + $0x280] sm:$0xff]  ;;  %v3184_v15 = vld [vmem:[%s11070_s8 + $0x288] sm:$0xff] }
 0x295   : > { %v9191_v45 = vpop.eup %7364  ;;  %7378 = vpow2.f32 %v2832_v52 }
 0x296   : > { %v2953_v50 = vadd.f32 %v9169_v33, %v2952_v54  ;;  %11469 = vst [vmem:[#allocation43_spill] sm:$0xff] %v9191_v45  ;;  %v3117_v54 = vld [vmem:[%s11070_s8 + $0x70] sm:$0xff]  ;;  %v9209_v46 = vpop.eup %7366 }
 0x297   : > { %11470 = vst [vmem:[#allocation44_spill] sm:$0xff] %v9209_v46 }
 0x298   : > { %v2954_v40 = vadd.f32 %v9174_v38, %v2953_v50  ;;  %v6588_v50 = vpack.c.bf16 %v3166_v27, %v3165_v12 }
 0x29a   : > { %v2955_v53 = vadd.f32 %v9179_v31, %v2954_v40  ;;  %v6558_v40 = vpack.c.bf16 %v3118_v34, %v3117_v54  ;;  %6589 = vmatprep.subr.bf16.mxu1 %v6588_v50 }
 0x29b   : > { %6591 = vmatpush3.bf16.msra.mxu1 %v6590_v55  ;;  %v3215_v55 = vld [vmem:[%s11070_s8 + $0x380] sm:$0xff] }
 0x29c   : > { %v2956_v24 = vadd.f32 %v9191_v45, %v2955_v53  ;;  %6559 = vmatpush3.bf16.msra.mxu0 %v6558_v40  ;;  %v9212_v53 = vpop.eup %7368 }
 0x29d   : > { %11471 = vst [vmem:[#allocation33_spill] sm:$0xff] %v9212_v53  ;;  %v9215_v27 = vpop.eup %7370 }
 0x29e   : > { %v2957_v41 = vadd.f32 %v9209_v46, %v2956_v24  ;;  %11472 = vst [vmem:[#allocation34_spill] sm:$0xff] %v9215_v27  ;;  %v9218_v34 = vpop.eup %7372 }
 0x29f   : > { %11473 = vst [vmem:[#allocation55_spill] sm:$0xff] %v9218_v34  ;;  %v9221_v32 = vpop.eup %7374 }
 0x2a0   : > { %v2958_v12 = vadd.f32 %v9212_v53, %v2957_v41  ;;  %11474 = vst [vmem:[#allocation56_spill] sm:$0xff] %v9221_v32  ;;  %v9224_v50 = vpop.eup %7376 }
 0x2a1   : > { %11475 = vst [vmem:[#allocation45_spill] sm:$0xff] %v9224_v50  ;;  %v9227_v52 = vpop.eup %7378 }
 0x2a2   : > { %v2959_v54 = vadd.f32 %v9215_v27, %v2958_v12  ;;  %11476 = vst [vmem:[#allocation46_spill] sm:$0xff] %v9227_v52  ;;  %v6592_v12 = vpack.c.bf16 %v3184_v15, %v3183_v59  ;;  %v3199_v59 = vld [vmem:[%s11070_s8 + $0x300] sm:$0xff]  ;;  %v3200_v15 = vld [vmem:[%s11070_s8 + $0x308] sm:$0xff]  ;;  %v3169_v27 = vld [vmem:[%s11070_s8 + $0x210] sm:$0xff] }
 0x2a4   : > { %v2960_v2 = vadd.f32 %v9218_v34, %v2959_v54  ;;  %v3216_v54 = vld [vmem:[%s11070_s8 + $0x388] sm:$0xff]  ;;  %6593 = vmatprep.subr.bf16.mxu0 %v6592_v12  ;;  %v3186_v12 = vld [vmem:[%s11070_s8 + $0x298] sm:$0xff]  ;;  %v6626_v34 = vpack.c.bf16 %v3200_v15, %v3199_v59  ;;  %v3219_v15 = vld [vmem:[%s11070_s8 + $0x3a0] sm:$0xff] }
 0x2a5   : > { %v3188_v59 = vld [vmem:[%s11070_s8 + $0x2a8] sm:$0xff] }
 0x2a6   : > { %v2961_v24 = vadd.f32 %v9221_v32, %v2960_v2  ;;  %v6624_v2 = vpack.c.bf16 %v3216_v54, %v3215_v55  ;;  %v3185_v55 = vld [vmem:[%s11070_s8 + $0x290] sm:$0xff] }
 0x2a7   : > { %v3217_v54 = vld [vmem:[%s11070_s8 + $0x390] sm:$0xff] }
 0x2a8   : > { %v2962_v40 = vadd.f32 %v9224_v50, %v2961_v24  ;;  %6625 = vmatprep.subr.bf16.mxu1 %v6624_v2  ;;  %v3218_v2 = vld [vmem:[%s11070_s8 + $0x398] sm:$0xff] }
 0x2aa   : > { %v2963_v41 = vadd.f32 %v9227_v52, %v2962_v40  ;;  %v3167_v40 = vld [vmem:[%s11070_s8 + $0x200] sm:$0xff] }
 0x2ac   : > { %2964 = vadd.xlane.f32.xlu1 %v2963_v41  ;;  %v3168_v41 = vld [vmem:[%s11070_s8 + $0x208] sm:$0xff] }
 0x2ad   : > { %v6594_v50 = vpack.c.bf16 %v3168_v41, %v3167_v40  ;;  %v3170_v40 = vld [vmem:[%s11070_s8 + $0x218] sm:$0xff]  ;;  %v6628_v41 = vpack.c.bf16 %v3218_v2, %v3217_v54 }
 0x2da   : > { %v2866_v24 = vpop.xlane.xlu0 %2865 }
 0x2db   : > { %7380 = vrcp.f32 %v2866_v24 }
 0x2e5   : > { %v9266_v24 = vpop.eup %7380 }
 0x2e6   : > { %v2971_v52 = vmul.f32 %v9266_v24, %v8294_v26  ;;  %v2973_v32 = vmul.f32 %v9266_v24, %v8305_v5  ;;  %v2970_v53 = vmul.f32 %v9266_v24, %v8292_v17  ;;  %v2972_v45 = vmul.f32 %v9266_v24, %v8300_v25  ;;  %3099 = vst.msk [vmem:[%s7482_s18] sm:$0xff] %vm3098_vm1, %v9266_v24  ;;  %v3201_v17 = vld [vmem:[%s11070_s8 + $0x310] sm:$0xff]  ;;  %v3202_v25 = vld [vmem:[%s11070_s8 + $0x318] sm:$0xff]  ;;  %v3187_v5 = vld [vmem:[%s11070_s8 + $0x2a0] sm:$0xff] }
 0x2e7   : > { %v6596_v26 = vpack.c.bf16 %v3186_v12, %v3185_v55  ;;  %v3220_v55 = vld [vmem:[%s11070_s8 + $0x3a8] sm:$0xff]  ;;  %v6598_v12 = vpack.c.bf16 %v3170_v40, %v3169_v27  ;;  %v6630_v54 = vpack.c.bf16 %v3202_v25, %v3201_v17  ;;  %v6600_v2 = vpack.c.bf16 %v3188_v59, %v3187_v5  ;;  %v3189_v27 = vld [vmem:[%s11070_s8 + $0x2b0] sm:$0xff]  ;;  %v3222_v40 = vld [vmem:[%s11070_s8 + $0x3b8] sm:$0xff] }
 0x2e8   : > { %3679 = vmatprep.mubr.f32.mxu0 %v2971_v52  ;;  %3764 = vmatprep.mubr.f32.mxu1 %v2973_v32  ;;  %v3171_v32 = vld [vmem:[%s11070_s8 + $0x220] sm:$0xff]  ;;  %v3172_v52 = vld [vmem:[%s11070_s8 + $0x228] sm:$0xff]  ;;  %v6632_v46 = vpack.c.bf16 %v3220_v55, %v3219_v15  ;;  %v3173_v17 = vld [vmem:[%s11070_s8 + $0x230] sm:$0xff] }
 0x2e9   : > { %3680 = vmatmul.mubr.f32.vlgmr.msra.gmra.mrb[68].mxu0 %v2970_v53  ;;  %3765 = vmatmul.mubr.f32.vlgmr.msra.gmra.mrb[60].mxu1 %v2972_v45  ;;  %v3203_v45 = vld [vmem:[%s11070_s8 + $0x320] sm:$0xff]  ;;  %v3204_v53 = vld [vmem:[%s11070_s8 + $0x328] sm:$0xff]  ;;  %v3174_v25 = vld [vmem:[%s11070_s8 + $0x238] sm:$0xff] }
 0x2ea   : > { %6595 = vmatpush3.bf16.msra.mxu0 %v6594_v50  ;;  %6627 = vmatpush3.bf16.msra.mxu1 %v6626_v34  ;;  %v3190_v34 = vld [vmem:[%s11070_s8 + $0x2b8] sm:$0xff]  ;;  %v3221_v50 = vld [vmem:[%s11070_s8 + $0x3b0] sm:$0xff] }
 0x2eb   : > { %6597 = vmatprep.subr.bf16.mxu0 %v6596_v26  ;;  %6629 = vmatprep.subr.bf16.mxu1 %v6628_v41  ;;  %v6602_v26 = vpack.c.bf16 %v3172_v52, %v3171_v32  ;;  %v6634_v41 = vpack.c.bf16 %v3204_v53, %v3203_v45  ;;  %v6604_v5 = vpack.c.bf16 %v3190_v34, %v3189_v27  ;;  %v3205_v15 = vld [vmem:[%s11070_s8 + $0x330] sm:$0xff]  ;;  %v3206_v55 = vld [vmem:[%s11070_s8 + $0x338] sm:$0xff]  ;;  %v3224_v32 = vld [vmem:[%s11070_s8 + $0x3c8] sm:$0xff] }
 0x2ec   : > { %v6636_v59 = vpack.c.bf16 %v3222_v40, %v3221_v50  ;;  %v6606_v52 = vpack.c.bf16 %v3174_v25, %v3173_v17  ;;  %v3175_v45 = vld [vmem:[%s11070_s8 + $0x240] sm:$0xff]  ;;  %v3176_v53 = vld [vmem:[%s11070_s8 + $0x248] sm:$0xff]  ;;  %v3225_v17 = vld [vmem:[%s11070_s8 + $0x3d0] sm:$0xff] }
 0x2ed   : > { %v3207_v50 = vld [vmem:[%s11070_s8 + $0x340] sm:$0xff]  ;;  %v3208_v40 = vld [vmem:[%s11070_s8 + $0x348] sm:$0xff]  ;;  %v3226_v25 = vld [vmem:[%s11070_s8 + $0x3d8] sm:$0xff] }
 0x2ee   : > { %6599 = vmatpush3.bf16.msra.mxu0 %v6598_v12  ;;  %6631 = vmatpush3.bf16.msra.mxu1 %v6630_v54  ;;  %v3191_v12 = vld [vmem:[%s11070_s8 + $0x2c0] sm:$0xff]  ;;  %v3192_v54 = vld [vmem:[%s11070_s8 + $0x2c8] sm:$0xff] }
 0x2ef   : > { %6601 = vmatprep.subr.bf16.mxu0 %v6600_v2  ;;  %6633 = vmatprep.subr.bf16.mxu1 %v6632_v46  ;;  %v3223_v46 = vld [vmem:[%s11070_s8 + $0x3c0] sm:$0xff]  ;;  %v6638_v2 = vpack.c.bf16 %v3206_v55, %v3205_v15  ;;  %v6608_v27 = vpack.c.bf16 %v3192_v54, %v3191_v12  ;;  %v3177_v15 = vld [vmem:[%s11070_s8 + $0x250] sm:$0xff]  ;;  %v3178_v55 = vld [vmem:[%s11070_s8 + $0x258] sm:$0xff]  ;;  %v6644_v54 = vpack.c.bf16 %v3226_v25, %v3225_v17 }
 0x2f0   : > { %v6640_v34 = vpack.c.bf16 %v3224_v32, %v3223_v46  ;;  %v3209_v46 = vld [vmem:[%s11070_s8 + $0x350] sm:$0xff]  ;;  %v3210_v32 = vld [vmem:[%s11070_s8 + $0x358] sm:$0xff]  ;;  %v3211_v25 = vld [vmem:[%s11070_s8 + $0x360] sm:$0xff] }
 0x2f2   : > { %6603 = vmatpush3.bf16.msra.mxu0 %v6602_v26  ;;  %6635 = vmatpush3.bf16.msra.mxu1 %v6634_v41  ;;  %v3193_v26 = vld [vmem:[%s11070_s8 + $0x2d0] sm:$0xff]  ;;  %v3194_v41 = vld [vmem:[%s11070_s8 + $0x2d8] sm:$0xff] }
 0x2f3   : > { %6605 = vmatprep.subr.bf16.mxu0 %v6604_v5  ;;  %6637 = vmatprep.subr.bf16.mxu1 %v6636_v59  ;;  %v6610_v5 = vpack.c.bf16 %v3176_v53, %v3175_v45  ;;  %v6642_v59 = vpack.c.bf16 %v3208_v40, %v3207_v50  ;;  %v6612_v12 = vpack.c.bf16 %v3194_v41, %v3193_v26  ;;  %v3227_v45 = vld [vmem:[%s11070_s8 + $0x3e0] sm:$0xff]  ;;  %v3228_v53 = vld [vmem:[%s11070_s8 + $0x3e8] sm:$0xff] }
 0x2f4   : > { %v6646_v50 = vpack.c.bf16 %v3210_v32, %v3209_v46  ;;  %v3179_v40 = vld [vmem:[%s11070_s8 + $0x260] sm:$0xff]  ;;  %v3180_v26 = vld [vmem:[%s11070_s8 + $0x268] sm:$0xff]  ;;  %v6648_v17 = vpack.c.bf16 %v3228_v53, %v3227_v45  ;;  %v3182_v45 = vld [vmem:[%s11070_s8 + $0x278] sm:$0xff] }
 0x2f5   : > { %v3213_v53 = vld [vmem:[%s11070_s8 + $0x370] sm:$0xff] }
 0x2f6   : > { %6607 = vmatpush3.bf16.msra.mxu0 %v6606_v52  ;;  %6639 = vmatpush3.bf16.msra.mxu1 %v6638_v2  ;;  %v3195_v52 = vld [vmem:[%s11070_s8 + $0x2e0] sm:$0xff]  ;;  %v3196_v2 = vld [vmem:[%s11070_s8 + $0x2e8] sm:$0xff] }
 0x2f7   : > { %6609 = vmatprep.subr.bf16.mxu0 %v6608_v27  ;;  %6641 = vmatprep.subr.bf16.mxu1 %v6640_v34  ;;  %v6614_v34 = vpack.c.bf16 %v3178_v55, %v3177_v15  ;;  %v6616_v41 = vpack.c.bf16 %v3196_v2, %v3195_v52  ;;  %v3198_v15 = vld [vmem:[%s11070_s8 + $0x2f8] sm:$0xff]  ;;  %v3229_v55 = vld [vmem:[%s11070_s8 + $0x3f0] sm:$0xff] }
 0x2f8   : > { %v3181_v2 = vld [vmem:[%s11070_s8 + $0x270] sm:$0xff] }
 0x2f9   : > { %v2899_v27 = vpop.xlane.xlu1 %2898 }
 0x2fa   : > { %6611 = vmatpush3.bf16.msra.mxu0 %v6610_v5  ;;  %6643 = vmatpush3.bf16.msra.mxu1 %v6642_v59  ;;  %7382 = vrcp.f32 %v2899_v27  ;;  %v3212_v5 = vld [vmem:[%s11070_s8 + $0x368] sm:$0xff]  ;;  %v3197_v59 = vld [vmem:[%s11070_s8 + $0x2f0] sm:$0xff]  ;;  %v3214_v27 = vld [vmem:[%s11070_s8 + $0x378] sm:$0xff] }
 0x2fb   : > { %6613 = vmatprep.subr.bf16.mxu0 %v6612_v12  ;;  %6645 = vmatprep.subr.bf16.mxu1 %v6644_v54  ;;  %v3230_v12 = vld [vmem:[%s11070_s8 + $0x3f8] sm:$0xff]  ;;  %v6618_v54 = vpack.c.bf16 %v3180_v26, %v3179_v40  ;;  %v6650_v46 = vpack.c.bf16 %v3212_v5, %v3211_v25  ;;  %v6620_v32 = vpack.c.bf16 %v3198_v15, %v3197_v59  ;;  %v3279_v26 = vld [vmem:[%s11070_s8 + $0x580] sm:$0xff] }
 0x2fc   : > { %v6652_v52 = vpack.c.bf16 %v3230_v12, %v3229_v55  ;;  %v6622_v40 = vpack.c.bf16 %v3182_v45, %v3181_v2  ;;  %v11480_v45 = vld [vmem:[#allocation39_spill] sm:$0xff] }
 0x2fe   : > { %6615 = vmatpush3.bf16.msra.mxu0 %v6614_v34  ;;  %6647 = vmatpush3.bf16.msra.mxu1 %v6646_v50  ;;  %v3247_v34 = vld [vmem:[%s11070_s8 + $0x480] sm:$0xff]  ;;  %v3248_v50 = vld [vmem:[%s11070_s8 + $0x488] sm:$0xff] }
 0x2ff   : > { %6617 = vmatprep.subr.bf16.mxu0 %v6616_v41  ;;  %6649 = vmatprep.subr.bf16.mxu1 %v6648_v17  ;;  %v3280_v41 = vld [vmem:[%s11070_s8 + $0x588] sm:$0xff]  ;;  %v6654_v17 = vpack.c.bf16 %v3214_v27, %v3213_v53  ;;  %v6656_v25 = vpack.c.bf16 %v3248_v50, %v3247_v34  ;;  %v11481_v27 = vld [vmem:[#allocation30_spill] sm:$0xff] }
 0x300   : > { %v6688_v59 = vpack.c.bf16 %v3280_v41, %v3279_v26 }
 0x302   : > { %6619 = vmatpush3.bf16.msra.mxu0 %v6618_v54  ;;  %6651 = vmatpush3.bf16.msra.mxu1 %v6650_v46  ;;  %v11477_v54 = vld [vmem:[#allocation36_spill] sm:$0xff] }
 0x303   : > { %6621 = vmatprep.subr.bf16.mxu0 %v6620_v32  ;;  %6653 = vmatprep.subr.bf16.mxu1 %v6652_v52  ;;  %v11479_v52 = vld [vmem:[#allocation52_spill] sm:$0xff] }
 0x304   : > { %v9447_v5 = vpop.eup %7382 }
 0x305   : > { %v3003_v15 = vmul.f32 %v9447_v5, %v8443_v44  ;;  %v3005_v55 = vmul.f32 %v9447_v5, %v8468_v3  ;;  %v3002_v12 = vmul.f32 %v9447_v5, %v8436_v29  ;;  %v3004_v46 = vmul.f32 %v9447_v5, %v11477_v54  ;;  %3100 = vst.msk [vmem:[%s7482_s18 + $0x8] sm:$0xff] %vm3098_vm1, %v9447_v5  ;;  %v11478_v29 = vld [vmem:[#allocation40_spill] sm:$0xff]  ;;  %v3249_v54 = vld [vmem:[%s11070_s8 + $0x490] sm:$0xff] }
 0x306   : > { %6623 = vmatpush3.bf16.msra.mxu0 %v6622_v40  ;;  %6655 = vmatpush3.bf16.msra.mxu1 %v6654_v17 }
 0x307   : > { %6657 = vmatprep.subr.bf16.mxu0 %v6656_v25  ;;  %3684 = vmatprep.mubr.f32.mxu0 %v3003_v15 }
 0x308   : > { %3769 = vmatprep.mubr.f32.mxu1 %v3005_v55  ;;  %3685 = vmatmul.mubr.f32.gmra.mrb[70].mxu0 %v3002_v12  ;;  %v3264_v12 = vld [vmem:[%s11070_s8 + $0x508] sm:$0xff] }
 0x309   : > { %3770 = vmatmul.mubr.f32.gmra.mrb[62].mxu1 %v3004_v46  ;;  %6689 = vmatprep.subr.bf16.mxu1 %v6688_v59  ;;  %v3231_v59 = vld [vmem:[%s11070_s8 + $0x400] sm:$0xff]  ;;  %v3250_v46 = vld [vmem:[%s11070_s8 + $0x498] sm:$0xff] }
 0x319   : > { %v2932_v44 = vpop.xlane.xlu0 %2931 }
 0x31a   : > { %7384 = vrcp.f32 %v2932_v44  ;;  %v3281_v44 = vld [vmem:[%s11070_s8 + $0x590] sm:$0xff] }
 0x324   : > { %v9460_v3 = vpop.eup %7384 }
 0x325   : > { %v3035_v32 = vmul.f32 %v9460_v3, %v11478_v29  ;;  %v3037_v2 = vmul.f32 %v9460_v3, %v11479_v52  ;;  %v3034_v53 = vmul.f32 %v9460_v3, %v11480_v45  ;;  %v3036_v34 = vmul.f32 %v9460_v3, %v11481_v27  ;;  %3101 = vst.msk [vmem:[%s7482_s18 + $0x10] sm:$0xff] %vm3098_vm1, %v9460_v3  ;;  %v3282_v29 = vld [vmem:[%s11070_s8 + $0x598] sm:$0xff]  ;;  %v11484_v52 = vld [vmem:[#allocation77_spill] sm:$0xff]  ;;  %v11485_v45 = vld [vmem:[#allocation79_spill] sm:$0xff] }
 0x327   : > { %3689 = vmatprep.mubr.f32.mxu0 %v3035_v32  ;;  %3774 = vmatprep.mubr.f32.mxu1 %v3037_v2  ;;  %v3233_v32 = vld [vmem:[%s11070_s8 + $0x410] sm:$0xff]  ;;  %v2974_v2 = vmul.f32 %v9266_v24, %v11484_v52 }
 0x328   : > { %3690 = vmatmul.mubr.f32.gmra.mrb[72].mxu0 %v3034_v53  ;;  %3775 = vmatmul.mubr.f32.gmra.mrb[64].mxu1 %v3036_v34  ;;  %v2976_v53 = vmul.f32 %v9266_v24, %v11485_v45 }
 0x339   : > { %v2965_v50 = vpop.xlane.xlu1 %2964 }
 0x33a   : > { %7386 = vrcp.f32 %v2965_v50  ;;  %v3234_v50 = vld [vmem:[%s11070_s8 + $0x418] sm:$0xff] }
 0x344   : > { %v9473_v40 = vpop.eup %7386 }
 0x345   : > { %v3067_v26 = vmul.f32 %v9473_v40, %v8965_v8  ;;  %v3069_v41 = vmul.f32 %v9473_v40, %v9002_v19  ;;  %v3066_v17 = vmul.f32 %v9473_v40, %v8952_v58  ;;  %v3068_v25 = vmul.f32 %v9473_v40, %v8983_v6  ;;  %3102 = vst.msk [vmem:[%s7482_s18 + $0x18] sm:$0xff] %vm3098_vm1, %v9473_v40  ;;  %v3232_v8 = vld [vmem:[%s11070_s8 + $0x408] sm:$0xff]  ;;  %v11482_v19 = vld [vmem:[#allocation78_spill] sm:$0xff]  ;;  %v3263_v6 = vld [vmem:[%s11070_s8 + $0x500] sm:$0xff] }
 0x346   : > { %v2975_v15 = vmul.f32 %v9266_v24, %v11482_v19  ;;  %v11483_v58 = vld [vmem:[#allocation80_spill] sm:$0xff]  ;;  %v6658_v27 = vpack.c.bf16 %v3232_v8, %v3231_v59  ;;  %v6690_v34 = vpack.c.bf16 %v3264_v12, %v3263_v6  ;;  %v11487_v19 = vld [vmem:[#allocation49_spill] sm:$0xff]  ;;  %v6660_v59 = vpack.c.bf16 %v3250_v46, %v3249_v54  ;;  %v3283_v6 = vld [vmem:[%s11070_s8 + $0x5a0] sm:$0xff] }
 0x347   : > { %3694 = vmatprep.mubr.f32.mxu0 %v3067_v26  ;;  %3779 = vmatprep.mubr.f32.mxu1 %v3069_v41  ;;  %v2977_v55 = vmul.f32 %v9266_v24, %v11483_v58  ;;  %v3265_v26 = vld [vmem:[%s11070_s8 + $0x510] sm:$0xff]  ;;  %v3266_v41 = vld [vmem:[%s11070_s8 + $0x518] sm:$0xff]  ;;  %v6692_v8 = vpack.c.bf16 %v3282_v29, %v3281_v44  ;;  %v3251_v58 = vld [vmem:[%s11070_s8 + $0x4a0] sm:$0xff]  ;;  %v6662_v54 = vpack.c.bf16 %v3234_v50, %v3233_v32 }
 0x348   : > { %3695 = vmatmul.mubr.f32.gmra.mrb[74].mxu0 %v3066_v17  ;;  %3780 = vmatmul.mubr.f32.gmra.mrb[66].mxu1 %v3068_v25  ;;  %v11486_v17 = vld [vmem:[#allocation37_spill] sm:$0xff]  ;;  %v3284_v12 = vld [vmem:[%s11070_s8 + $0x5a8] sm:$0xff]  ;;  %v6694_v46 = vpack.c.bf16 %v3266_v41, %v3265_v26  ;;  %v3235_v44 = vld [vmem:[%s11070_s8 + $0x420] sm:$0xff] }
 0x349   : > { %3849 = vmatprep.mubr.f32.mxu0 %v2975_v15  ;;  %3934 = vmatprep.mubr.f32.mxu1 %v2977_v55  ;;  %v3007_v25 = vmul.f32 %v9447_v5, %v11486_v17  ;;  %v3009_v15 = vmul.f32 %v9447_v5, %v11487_v19  ;;  %v3252_v55 = vld [vmem:[%s11070_s8 + $0x4a8] sm:$0xff]  ;;  %v11488_v29 = vld [vmem:[#allocation47_spill] sm:$0xff]  ;;  %v11491_v26 = vld [vmem:[#allocation74_spill] sm:$0xff] }
 0x34a   : > { %v3006_v52 = vmul.f32 %v9447_v5, %v11488_v29  ;;  %v3236_v17 = vld [vmem:[%s11070_s8 + $0x428] sm:$0xff]  ;;  %v3267_v32 = vld [vmem:[%s11070_s8 + $0x520] sm:$0xff]  ;;  %v3041_v41 = vmul.f32 %v9460_v3, %v11491_v26  ;;  %v3253_v19 = vld [vmem:[%s11070_s8 + $0x4b0] sm:$0xff] }
 0x34c   : > { %3850 = vmatmul.mubr.f32.vlgmr.msra.gmra.mrb[76].mxu0 %v2974_v2  ;;  %3935 = vmatmul.mubr.f32.vlgmr.msra.gmra.mrb[68].mxu1 %v2976_v53  ;;  %v11489_v2 = vld [vmem:[#allocation59_spill] sm:$0xff]  ;;  %v6664_v53 = vpack.c.bf16 %v3252_v55, %v3251_v58  ;;  %v6666_v58 = vpack.c.bf16 %v3236_v17, %v3235_v44  ;;  %v3269_v44 = vld [vmem:[%s11070_s8 + $0x530] sm:$0xff]  ;;  %v3073_v17 = vmul.f32 %v9473_v40, %v9050_v13 }
 0x34d   : > { %3854 = vmatprep.mubr.f32.mxu0 %v3007_v25  ;;  %3939 = vmatprep.mubr.f32.mxu1 %v3009_v15  ;;  %v3008_v45 = vmul.f32 %v9447_v5, %v11489_v2  ;;  %v6696_v25 = vpack.c.bf16 %v3284_v12, %v3283_v6  ;;  %v3254_v15 = vld [vmem:[%s11070_s8 + $0x4b8] sm:$0xff]  ;;  %v3237_v6 = vld [vmem:[%s11070_s8 + $0x430] sm:$0xff] }
 0x34e   : > { %6659 = vmatpush3.bf16.msra.mxu0 %v6658_v27  ;;  %6691 = vmatpush3.bf16.msra.mxu1 %v6690_v34  ;;  %v3268_v27 = vld [vmem:[%s11070_s8 + $0x528] sm:$0xff]  ;;  %v11492_v12 = vld [vmem:[#allocation42_spill] sm:$0xff] }
 0x34f   : > { %6661 = vmatprep.subr.bf16.mxu0 %v6660_v59  ;;  %6693 = vmatprep.subr.bf16.mxu1 %v6692_v8  ;;  %v11490_v34 = vld [vmem:[#allocation64_spill] sm:$0xff]  ;;  %v3285_v59 = vld [vmem:[%s11070_s8 + $0x5b0] sm:$0xff]  ;;  %v3286_v8 = vld [vmem:[%s11070_s8 + $0x5b8] sm:$0xff]  ;;  %v6698_v55 = vpack.c.bf16 %v3268_v27, %v3267_v32  ;;  %v3038_v29 = vmul.f32 %v9460_v3, %v11492_v12 }
 0x350   : > { %v3039_v50 = vmul.f32 %v9460_v3, %v11490_v34  ;;  %3855 = vmatmul.mubr.f32.gmra.mrb[78].mxu0 %v3006_v52  ;;  %3940 = vmatmul.mubr.f32.gmra.mrb[70].mxu1 %v3008_v45  ;;  %v11493_v52 = vld [vmem:[#allocation54_spill] sm:$0xff]  ;;  %v6668_v45 = vpack.c.bf16 %v3254_v15, %v3253_v19  ;;  %v6700_v32 = vpack.c.bf16 %v3286_v8, %v3285_v59  ;;  %v3255_v27 = vld [vmem:[%s11070_s8 + $0x4c0] sm:$0xff]  ;;  %v3240_v59 = vld [vmem:[%s11070_s8 + $0x448] sm:$0xff] }
 0x351   : > { %3944 = vmatprep.mubr.f32.mxu1 %v3041_v41  ;;  %v3040_v2 = vmul.f32 %v9460_v3, %v11493_v52  ;;  %v3238_v34 = vld [vmem:[%s11070_s8 + $0x438] sm:$0xff]  ;;  %v3070_v41 = vmul.f32 %v9473_v40, %v9016_v18  ;;  %v3239_v15 = vld [vmem:[%s11070_s8 + $0x440] sm:$0xff]  ;;  %v3272_v12 = vld [vmem:[%s11070_s8 + $0x548] sm:$0xff] }
 0x352   : > { %3859 = vmatprep.mubr.f32.mxu0 %v3039_v50  ;;  %6663 = vmatpush3.bf16.msra.mxu0 %v6662_v54  ;;  %v3270_v54 = vld [vmem:[%s11070_s8 + $0x538] sm:$0xff]  ;;  %v3256_v50 = vld [vmem:[%s11070_s8 + $0x4c8] sm:$0xff]  ;;  %v6670_v13 = vpack.c.bf16 %v3238_v34, %v3237_v6  ;;  %v6674_v34 = vpack.c.bf16 %v3240_v59, %v3239_v15 }
 0x353   : > { %6695 = vmatpush3.bf16.msra.mxu1 %v6694_v46  ;;  %6665 = vmatprep.subr.bf16.mxu0 %v6664_v53  ;;  %v3071_v46 = vmul.f32 %v9473_v40, %v9026_v21  ;;  %v3287_v53 = vld [vmem:[%s11070_s8 + $0x5c0] sm:$0xff]  ;;  %v3288_v21 = vld [vmem:[%s11070_s8 + $0x5c8] sm:$0xff]  ;;  %v6702_v26 = vpack.c.bf16 %v3270_v54, %v3269_v44  ;;  %v6672_v19 = vpack.c.bf16 %v3256_v50, %v3255_v27  ;;  %v11494_v8 = vld [vmem:[#allocation82_spill] sm:$0xff] }
 0x354   : > { %6697 = vmatprep.subr.bf16.mxu1 %v6696_v25  ;;  %3860 = vmatmul.mubr.f32.gmra.mrb[80].mxu0 %v3038_v29  ;;  %v3072_v25 = vmul.f32 %v9473_v40, %v9039_v11  ;;  %v6704_v6 = vpack.c.bf16 %v3288_v21, %v3287_v53  ;;  %v3271_v11 = vld [vmem:[%s11070_s8 + $0x540] sm:$0xff]  ;;  %v3257_v29 = vld [vmem:[%s11070_s8 + $0x4d0] sm:$0xff]  ;;  %v3258_v52 = vld [vmem:[%s11070_s8 + $0x4d8] sm:$0xff] }
 0x355   : > { %3945 = vmatmul.mubr.f32.gmra.mrb[72].mxu1 %v3040_v2  ;;  %3864 = vmatprep.mubr.f32.mxu0 %v3071_v46  ;;  %v3289_v2 = vld [vmem:[%s11070_s8 + $0x5d0] sm:$0xff]  ;;  %v6706_v44 = vpack.c.bf16 %v3272_v12, %v3271_v11  ;;  %v3242_v46 = vld [vmem:[%s11070_s8 + $0x458] sm:$0xff]  ;;  %v3259_v53 = vld [vmem:[%s11070_s8 + $0x4e0] sm:$0xff] }
 0x356   : > { %3949 = vmatprep.mubr.f32.mxu1 %v3073_v17  ;;  %6667 = vmatpush3.bf16.msra.mxu0 %v6666_v58  ;;  %v2979_v58 = vmul.f32 %v9266_v24, %v11494_v8  ;;  %v3241_v54 = vld [vmem:[%s11070_s8 + $0x450] sm:$0xff]  ;;  %v6676_v17 = vpack.c.bf16 %v3258_v52, %v3257_v29  ;;  %v3274_v50 = vld [vmem:[%s11070_s8 + $0x558] sm:$0xff]  ;;  %v3260_v21 = vld [vmem:[%s11070_s8 + $0x4e8] sm:$0xff] }
 0x357   : > { %6699 = vmatpush3.bf16.msra.mxu1 %v6698_v55  ;;  %6669 = vmatprep.subr.bf16.mxu0 %v6668_v45  ;;  %v11495_v55 = vld [vmem:[#allocation84_spill] sm:$0xff]  ;;  %v3290_v45 = vld [vmem:[%s11070_s8 + $0x5d8] sm:$0xff]  ;;  %v3273_v27 = vld [vmem:[%s11070_s8 + $0x550] sm:$0xff]  ;;  %v6680_v59 = vpack.c.bf16 %v3260_v21, %v3259_v53 }
 0x358   : > { %6701 = vmatprep.subr.bf16.mxu1 %v6700_v32  ;;  %v2981_v18 = vmul.f32 %v9266_v24, %v11495_v55  ;;  %3865 = vmatmul.mubr.f32.gmra.mrb[82].mxu0 %v3070_v41  ;;  %v6708_v32 = vpack.c.bf16 %v3290_v45, %v3289_v2  ;;  %v6678_v41 = vpack.c.bf16 %v3242_v46, %v3241_v54  ;;  %v3244_v15 = vld [vmem:[%s11070_s8 + $0x468] sm:$0xff]  ;;  %v3293_v11 = vld [vmem:[%s11070_s8 + $0x5f0] sm:$0xff]  ;;  %v3294_v12 = vld [vmem:[%s11070_s8 + $0x5f8] sm:$0xff] }
 0x359   : > { %3950 = vmatmul.mubr.f32.gmra.mrb[74].mxu1 %v3072_v25  ;;  %4019 = vmatprep.mubr.f32.mxu0 %v2979_v58  ;;  %v6710_v25 = vpack.c.bf16 %v3274_v50, %v3273_v27  ;;  %v3275_v58 = vld [vmem:[%s11070_s8 + $0x560] sm:$0xff]  ;;  %v3276_v55 = vld [vmem:[%s11070_s8 + $0x568] sm:$0xff]  ;;  %v3245_v2 = vld [vmem:[%s11070_s8 + $0x470] sm:$0xff] }
 0x35a   : > { %4104 = vmatprep.mubr.f32.mxu1 %v2981_v18  ;;  %6671 = vmatpush3.bf16.msra.mxu0 %v6670_v13  ;;  %v3291_v13 = vld [vmem:[%s11070_s8 + $0x5e0] sm:$0xff]  ;;  %v3261_v18 = vld [vmem:[%s11070_s8 + $0x4f0] sm:$0xff]  ;;  %v6714_v52 = vpack.c.bf16 %v3276_v55, %v3275_v58  ;;  %v3246_v45 = vld [vmem:[%s11070_s8 + $0x478] sm:$0xff] }
 0x35b   : > { %6703 = vmatpush3.bf16.msra.mxu1 %v6702_v26  ;;  %6673 = vmatprep.subr.bf16.mxu0 %v6672_v19  ;;  %v3292_v26 = vld [vmem:[%s11070_s8 + $0x5e8] sm:$0xff]  ;;  %v3243_v19 = vld [vmem:[%s11070_s8 + $0x460] sm:$0xff]  ;;  %v3277_v54 = vld [vmem:[%s11070_s8 + $0x570] sm:$0xff]  ;;  %v6686_v53 = vpack.c.bf16 %v3246_v45, %v3245_v2 }
 0x35c   : > { %6705 = vmatprep.subr.bf16.mxu1 %v6704_v6  ;;  %v6712_v8 = vpack.c.bf16 %v3292_v26, %v3291_v13  ;;  %v3262_v6 = vld [vmem:[%s11070_s8 + $0x4f8] sm:$0xff]  ;;  %v6682_v29 = vpack.c.bf16 %v3244_v15, %v3243_v19  ;;  %v3343_v27 = vld [vmem:[%s11070_s8 + $0x780] sm:$0xff]  ;;  %v3344_v50 = vld [vmem:[%s11070_s8 + $0x788] sm:$0xff] }
 0x35d   : > { %v3278_v46 = vld [vmem:[%s11070_s8 + $0x578] sm:$0xff]  ;;  %v6752_v26 = vpack.c.bf16 %v3344_v50, %v3343_v27  ;;  %v3327_v19 = vld [vmem:[%s11070_s8 + $0x700] sm:$0xff]  ;;  %v3328_v15 = vld [vmem:[%s11070_s8 + $0x708] sm:$0xff] }
 0x35e   : > { %6675 = vmatpush3.bf16.msra.mxu0 %v6674_v34  ;;  %v6684_v34 = vpack.c.bf16 %v3262_v6, %v3261_v18  ;;  %v6718_v21 = vpack.c.bf16 %v3278_v46, %v3277_v54  ;;  %v3345_v58 = vld [vmem:[%s11070_s8 + $0x790] sm:$0xff]  ;;  %v3346_v55 = vld [vmem:[%s11070_s8 + $0x798] sm:$0xff]  ;;  %v6754_v2 = vpack.c.bf16 %v3328_v15, %v3327_v19  ;;  %v3299_v19 = vld [vmem:[%s11070_s8 + $0x620] sm:$0xff] }
 0x35f   : > { %6707 = vmatpush3.bf16.msra.mxu1 %v6706_v44  ;;  %6677 = vmatprep.subr.bf16.mxu0 %v6676_v17  ;;  %v6716_v44 = vpack.c.bf16 %v3294_v12, %v3293_v11  ;;  %v3311_v17 = vld [vmem:[%s11070_s8 + $0x680] sm:$0xff]  ;;  %v11496_v18 = vld [vmem:[#allocation81_spill] sm:$0xff]  ;;  %v3298_v45 = vld [vmem:[%s11070_s8 + $0x618] sm:$0xff]  ;;  %v6756_v50 = vpack.c.bf16 %v3346_v55, %v3345_v58 }
 0x360   : > { %6709 = vmatprep.subr.bf16.mxu1 %v6708_v32  ;;  %v3312_v32 = vld [vmem:[%s11070_s8 + $0x688] sm:$0xff]  ;;  %v2978_v6 = vmul.f32 %v9266_v24, %v11496_v18  ;;  %v3297_v11 = vld [vmem:[%s11070_s8 + $0x610] sm:$0xff]  ;;  %v11497_v12 = vld [vmem:[#allocation83_spill] sm:$0xff] }
 0x361   : > { %v6720_v13 = vpack.c.bf16 %v3312_v32, %v3311_v17  ;;  %v11498_v54 = vld [vmem:[#allocation61_spill] sm:$0xff]  ;;  %v11499_v17 = vld [vmem:[#allocation3_spill] sm:$0xff]  ;;  %v3300_v18 = vld [vmem:[%s11070_s8 + $0x628] sm:$0xff] }
 0x362   : > { %6679 = vmatpush3.bf16.msra.mxu0 %v6678_v41  ;;  %v3295_v41 = vld [vmem:[%s11070_s8 + $0x600] sm:$0xff]  ;;  %v3011_v46 = vmul.f32 %v9447_v5, %v11498_v54  ;;  %v3013_v32 = vmul.f32 %v9447_v5, %v11499_v17  ;;  %v3350_v54 = vld [vmem:[%s11070_s8 + $0x7b8] sm:$0xff] }
 0x363   : > { %6711 = vmatpush3.bf16.msra.mxu1 %v6710_v25  ;;  %6681 = vmatprep.subr.bf16.mxu0 %v6680_v59  ;;  %v3296_v25 = vld [vmem:[%s11070_s8 + $0x608] sm:$0xff]  ;;  %v3313_v59 = vld [vmem:[%s11070_s8 + $0x690] sm:$0xff]  ;;  %v11500_v15 = vld [vmem:[#allocation71_spill] sm:$0xff] }
 0x364   : > { %6713 = vmatprep.subr.bf16.mxu1 %v6712_v8  ;;  %v3314_v8 = vld [vmem:[%s11070_s8 + $0x698] sm:$0xff] }
 0x365   : > { %v6724_v27 = vpack.c.bf16 %v3314_v8, %v3313_v59  ;;  %v3010_v59 = vmul.f32 %v9447_v5, %v11500_v15  ;;  %v11501_v8 = vld [vmem:[#allocation7_spill] sm:$0xff]  ;;  %v11503_v17 = vld [vmem:[#allocation66_spill] sm:$0xff] }
 0x366   : > { %6683 = vmatpush3.bf16.msra.mxu0 %v6682_v29  ;;  %v2980_v29 = vmul.f32 %v9266_v24, %v11497_v12  ;;  %v3012_v58 = vmul.f32 %v9447_v5, %v11501_v8  ;;  %v11502_v12 = vld [vmem:[#allocation9_spill] sm:$0xff]  ;;  %v3334_v15 = vld [vmem:[%s11070_s8 + $0x738] sm:$0xff]  ;;  %v3352_v8 = vld [vmem:[%s11070_s8 + $0x7c8] sm:$0xff] }
 0x367   : > { %6715 = vmatpush3.bf16.msra.mxu1 %v6714_v52  ;;  %6685 = vmatprep.subr.bf16.mxu0 %v6684_v34  ;;  %v6722_v52 = vpack.c.bf16 %v3296_v25, %v3295_v41  ;;  %v3329_v34 = vld [vmem:[%s11070_s8 + $0x710] sm:$0xff]  ;;  %v6726_v41 = vpack.c.bf16 %v3298_v45, %v3297_v11  ;;  %v3332_v11 = vld [vmem:[%s11070_s8 + $0x728] sm:$0xff] }
 0x368   : > { %6717 = vmatprep.subr.bf16.mxu1 %v6716_v44  ;;  %v3330_v44 = vld [vmem:[%s11070_s8 + $0x718] sm:$0xff]  ;;  %v3317_v45 = vld [vmem:[%s11070_s8 + $0x6b0] sm:$0xff] }
 0x369   : > { %v6758_v25 = vpack.c.bf16 %v3330_v44, %v3329_v34  ;;  %v3318_v34 = vld [vmem:[%s11070_s8 + $0x6b8] sm:$0xff]  ;;  %v3349_v44 = vld [vmem:[%s11070_s8 + $0x7b0] sm:$0xff] }
 0x36a   : > { %6687 = vmatpush3.bf16.msra.mxu0 %v6686_v53  ;;  %v3315_v53 = vld [vmem:[%s11070_s8 + $0x6a0] sm:$0xff] }
 0x36b   : > { %6719 = vmatpush3.bf16.msra.mxu1 %v6718_v21  ;;  %6721 = vmatprep.subr.bf16.mxu0 %v6720_v13  ;;  %v3316_v21 = vld [vmem:[%s11070_s8 + $0x6a8] sm:$0xff]  ;;  %v3347_v13 = vld [vmem:[%s11070_s8 + $0x7a0] sm:$0xff] }
 0x36c   : > { %6753 = vmatprep.subr.bf16.mxu1 %v6752_v26  ;;  %v3348_v26 = vld [vmem:[%s11070_s8 + $0x7a8] sm:$0xff]  ;;  %v6728_v55 = vpack.c.bf16 %v3316_v21, %v3315_v53  ;;  %v6732_v53 = vpack.c.bf16 %v3318_v34, %v3317_v45  ;;  %v3301_v21 = vld [vmem:[%s11070_s8 + $0x630] sm:$0xff] }
 0x36d   : > { %4020 = vmatmul.mubr.f32.vlgmr.msra.gmra.mrb[84].mxu0 %v2978_v6  ;;  %v3331_v6 = vld [vmem:[%s11070_s8 + $0x720] sm:$0xff] }
 0x36e   : > { %4105 = vmatmul.mubr.f32.vlgmr.msra.gmra.mrb[76].mxu1 %v2980_v29  ;;  %4024 = vmatprep.mubr.f32.mxu0 %v3011_v46  ;;  %v3043_v29 = vmul.f32 %v9460_v3, %v11502_v12  ;;  %v6762_v46 = vpack.c.bf16 %v3332_v11, %v3331_v6  ;;  %v3074_v6 = vmul.f32 %v9473_v40, %v9069_v60  ;;  %v3335_v60 = vld [vmem:[%s11070_s8 + $0x740] sm:$0xff] }
 0x36f   : > { %4109 = vmatprep.mubr.f32.mxu1 %v3013_v32  ;;  %6723 = vmatpush3.bf16.msra.mxu0 %v6722_v52  ;;  %v3045_v52 = vmul.f32 %v9460_v3, %v8839_v47  ;;  %v6730_v47 = vpack.c.bf16 %v3300_v18, %v3299_v19  ;;  %v3042_v32 = vmul.f32 %v9460_v3, %v11503_v17  ;;  %v3333_v19 = vld [vmem:[%s11070_s8 + $0x730] sm:$0xff]  ;;  %v3354_v17 = vld [vmem:[%s11070_s8 + $0x7d8] sm:$0xff] }
 0x370   : > { %6755 = vmatpush3.bf16.msra.mxu1 %v6754_v2  ;;  %6725 = vmatprep.subr.bf16.mxu0 %v6724_v27  ;;  %v6760_v2 = vpack.c.bf16 %v3348_v26, %v3347_v13  ;;  %v11504_v27 = vld [vmem:[#allocation5_spill] sm:$0xff]  ;;  %v3302_v13 = vld [vmem:[%s11070_s8 + $0x638] sm:$0xff]  ;;  %v3075_v26 = vmul.f32 %v9473_v40, %v9092_v1  ;;  %v3320_v1 = vld [vmem:[%s11070_s8 + $0x6c8] sm:$0xff]  ;;  %v3076_v11 = vmul.f32 %v9473_v40, %v9098_v42 }
 0x371   : > { %6757 = vmatprep.subr.bf16.mxu1 %v6756_v50  ;;  %4025 = vmatmul.mubr.f32.gmra.mrb[86].mxu0 %v3010_v59  ;;  %v3044_v50 = vmul.f32 %v9460_v3, %v11504_v27  ;;  %v3319_v59 = vld [vmem:[%s11070_s8 + $0x6c0] sm:$0xff]  ;;  %v6766_v12 = vpack.c.bf16 %v3334_v15, %v3333_v19  ;;  %v3336_v42 = vld [vmem:[%s11070_s8 + $0x748] sm:$0xff] }
 0x372   : > { %4110 = vmatmul.mubr.f32.gmra.mrb[78].mxu1 %v3012_v58  ;;  %4029 = vmatprep.mubr.f32.mxu0 %v3043_v29  ;;  %v6734_v58 = vpack.c.bf16 %v3302_v13, %v3301_v21  ;;  %v3303_v29 = vld [vmem:[%s11070_s8 + $0x640] sm:$0xff]  ;;  %v6736_v34 = vpack.c.bf16 %v3320_v1, %v3319_v59  ;;  %v6770_v27 = vpack.c.bf16 %v3336_v42, %v3335_v60  ;;  %v3324_v19 = vld [vmem:[%s11070_s8 + $0x6e8] sm:$0xff]  ;;  %v3310_v60 = vld [vmem:[%s11070_s8 + $0x678] sm:$0xff] }
 0x373   : > { %4114 = vmatprep.mubr.f32.mxu1 %v3045_v52  ;;  %6727 = vmatpush3.bf16.msra.mxu0 %v6726_v41  ;;  %v3077_v41 = vmul.f32 %v9473_v40, %v9106_v10  ;;  %v3351_v10 = vld [vmem:[%s11070_s8 + $0x7c0] sm:$0xff]  ;;  %v3304_v52 = vld [vmem:[%s11070_s8 + $0x648] sm:$0xff] }
 0x374   : > { %6759 = vmatpush3.bf16.msra.mxu1 %v6758_v25  ;;  %6729 = vmatprep.subr.bf16.mxu0 %v6728_v55  ;;  %v6764_v25 = vpack.c.bf16 %v3350_v54, %v3349_v44  ;;  %v11505_v55 = vld [vmem:[#allocation86_spill] sm:$0xff]  ;;  %v6768_v44 = vpack.c.bf16 %v3352_v8, %v3351_v10  ;;  %v3321_v54 = vld [vmem:[%s11070_s8 + $0x6d0] sm:$0xff]  ;;  %v3355_v15 = vld [vmem:[%s11070_s8 + $0x7e0] sm:$0xff] }
 0x375   : > { %6761 = vmatprep.subr.bf16.mxu1 %v6760_v2  ;;  %4030 = vmatmul.mubr.f32.gmra.mrb[88].mxu0 %v3042_v32  ;;  %v2983_v18 = vmul.f32 %v9266_v24, %v11505_v55  ;;  %v11506_v2 = vld [vmem:[#allocation88_spill] sm:$0xff]  ;;  %v6738_v32 = vpack.c.bf16 %v3304_v52, %v3303_v29  ;;  %v3307_v8 = vld [vmem:[%s11070_s8 + $0x660] sm:$0xff]  ;;  %v3326_v29 = vld [vmem:[%s11070_s8 + $0x6f8] sm:$0xff] }
 0x376   : > { %4115 = vmatmul.mubr.f32.gmra.mrb[80].mxu1 %v3044_v50  ;;  %4034 = vmatprep.mubr.f32.mxu0 %v3075_v26  ;;  %v2985_v45 = vmul.f32 %v9266_v24, %v11506_v2  ;;  %v3305_v50 = vld [vmem:[%s11070_s8 + $0x650] sm:$0xff]  ;;  %v3356_v59 = vld [vmem:[%s11070_s8 + $0x7e8] sm:$0xff]  ;;  %v3358_v2 = vld [vmem:[%s11070_s8 + $0x7f8] sm:$0xff] }
 0x377   : > { %4119 = vmatprep.mubr.f32.mxu1 %v3077_v41  ;;  %6731 = vmatpush3.bf16.msra.mxu0 %v6730_v47  ;;  %v3322_v47 = vld [vmem:[%s11070_s8 + $0x6d8] sm:$0xff]  ;;  %v3337_v26 = vld [vmem:[%s11070_s8 + $0x750] sm:$0xff] }
 0x378   : > { %6763 = vmatpush3.bf16.msra.mxu1 %v6762_v46  ;;  %6733 = vmatprep.subr.bf16.mxu0 %v6732_v53  ;;  %v3353_v46 = vld [vmem:[%s11070_s8 + $0x7d0] sm:$0xff]  ;;  %v3306_v53 = vld [vmem:[%s11070_s8 + $0x658] sm:$0xff]  ;;  %v6740_v21 = vpack.c.bf16 %v3322_v47, %v3321_v54 }
 0x379   : > { %6765 = vmatprep.subr.bf16.mxu1 %v6764_v25  ;;  %4035 = vmatmul.mubr.f32.gmra.mrb[90].mxu0 %v3074_v6  ;;  %v6772_v13 = vpack.c.bf16 %v3354_v17, %v3353_v46  ;;  %v3338_v41 = vld [vmem:[%s11070_s8 + $0x758] sm:$0xff]  ;;  %v3323_v25 = vld [vmem:[%s11070_s8 + $0x6e0] sm:$0xff]  ;;  %v6742_v1 = vpack.c.bf16 %v3306_v53, %v3305_v50  ;;  %v3357_v52 = vld [vmem:[%s11070_s8 + $0x7f0] sm:$0xff] }
 0x37a   : > { %4120 = vmatmul.mubr.f32.gmra.mrb[82].mxu1 %v3076_v11  ;;  %4189 = vmatprep.mubr.f32.mxu0 %v2983_v18  ;;  %v6774_v10 = vpack.c.bf16 %v3338_v41, %v3337_v26  ;;  %v6744_v55 = vpack.c.bf16 %v3324_v19, %v3323_v25  ;;  %v6776_v18 = vpack.c.bf16 %v3356_v59, %v3355_v15  ;;  %v3339_v6 = vld [vmem:[%s11070_s8 + $0x760] sm:$0xff]  ;;  %v3340_v11 = vld [vmem:[%s11070_s8 + $0x768] sm:$0xff]  ;;  %v3341_v47 = vld [vmem:[%s11070_s8 + $0x770] sm:$0xff] }
 0x37b   : > { %4274 = vmatprep.mubr.f32.mxu1 %v2985_v45  ;;  %6735 = vmatpush3.bf16.msra.mxu0 %v6734_v58  ;;  %v3308_v58 = vld [vmem:[%s11070_s8 + $0x668] sm:$0xff]  ;;  %v6780_v54 = vpack.c.bf16 %v3358_v2, %v3357_v52  ;;  %v3342_v46 = vld [vmem:[%s11070_s8 + $0x778] sm:$0xff]  ;;  %v3375_v17 = vld [vmem:[%s11070_s8 + $0x880] sm:$0xff] }
 0x37c   : > { %6767 = vmatpush3.bf16.msra.mxu1 %v6766_v12  ;;  %6737 = vmatprep.subr.bf16.mxu0 %v6736_v34  ;;  %v3325_v12 = vld [vmem:[%s11070_s8 + $0x6f0] sm:$0xff]  ;;  %v6746_v45 = vpack.c.bf16 %v3308_v58, %v3307_v8  ;;  %v6778_v34 = vpack.c.bf16 %v3340_v11, %v3339_v6  ;;  %v3408_v50 = vld [vmem:[%s11070_s8 + $0x988] sm:$0xff]  ;;  %v3359_v41 = vld [vmem:[%s11070_s8 + $0x800] sm:$0xff] }
 0x37d   : > { %6769 = vmatprep.subr.bf16.mxu1 %v6768_v44  ;;  %v3309_v44 = vld [vmem:[%s11070_s8 + $0x670] sm:$0xff]  ;;  %v6748_v42 = vpack.c.bf16 %v3326_v29, %v3325_v12  ;;  %v3360_v25 = vld [vmem:[%s11070_s8 + $0x808] sm:$0xff]  ;;  %v3391_v19 = vld [vmem:[%s11070_s8 + $0x900] sm:$0xff] }
 0x37e   : > { %v6750_v53 = vpack.c.bf16 %v3310_v60, %v3309_v44  ;;  %v3392_v15 = vld [vmem:[%s11070_s8 + $0x908] sm:$0xff]  ;;  %v3377_v59 = vld [vmem:[%s11070_s8 + $0x890] sm:$0xff]  ;;  %v3410_v8 = vld [vmem:[%s11070_s8 + $0x998] sm:$0xff]  ;;  %v6786_v11 = vpack.c.bf16 %v3360_v25, %v3359_v41 }
 0x37f   : > { %6739 = vmatpush3.bf16.msra.mxu0 %v6738_v32  ;;  %v3376_v32 = vld [vmem:[%s11070_s8 + $0x888] sm:$0xff]  ;;  %v11507_v58 = vld [vmem:[#allocation85_spill] sm:$0xff]  ;;  %v6818_v12 = vpack.c.bf16 %v3392_v15, %v3391_v19  ;;  %v3362_v52 = vld [vmem:[%s11070_s8 + $0x818] sm:$0xff] }
 0x380   : > { %6771 = vmatpush3.bf16.msra.mxu1 %v6770_v27  ;;  %6741 = vmatprep.subr.bf16.mxu0 %v6740_v21  ;;  %v3407_v27 = vld [vmem:[%s11070_s8 + $0x980] sm:$0xff]  ;;  %v6782_v21 = vpack.c.bf16 %v3342_v46, %v3341_v47  ;;  %v3361_v29 = vld [vmem:[%s11070_s8 + $0x810] sm:$0xff]  ;;  %v11510_v44 = vld [vmem:[#allocation12_spill] sm:$0xff] }
 0x381   : > { %6773 = vmatprep.subr.bf16.mxu1 %v6772_v13  ;;  %v6784_v13 = vpack.c.bf16 %v3376_v32, %v3375_v17  ;;  %v6816_v26 = vpack.c.bf16 %v3408_v50, %v3407_v27  ;;  %v3393_v2 = vld [vmem:[%s11070_s8 + $0x910] sm:$0xff]  ;;  %v3017_v60 = vmul.f32 %v9447_v5, %v11510_v44  ;;  %v3394_v47 = vld [vmem:[%s11070_s8 + $0x918] sm:$0xff]  ;;  %v3379_v46 = vld [vmem:[%s11070_s8 + $0x8a0] sm:$0xff]  ;;  %v6790_v41 = vpack.c.bf16 %v3362_v52, %v3361_v29 }
 0x382   : > { %v3380_v17 = vld [vmem:[%s11070_s8 + $0x8a8] sm:$0xff]  ;;  %v3411_v32 = vld [vmem:[%s11070_s8 + $0x9a0] sm:$0xff]  ;;  %v11511_v50 = vld [vmem:[#allocation17_spill] sm:$0xff]  ;;  %v6822_v25 = vpack.c.bf16 %v3394_v47, %v3393_v2  ;;  %v3048_v29 = vmul.f32 %v9460_v3, %v8898_v0 }
 0x383   : > { %6743 = vmatpush3.bf16.msra.mxu0 %v6742_v1  ;;  %v3378_v1 = vld [vmem:[%s11070_s8 + $0x898] sm:$0xff]  ;;  %v3412_v27 = vld [vmem:[%s11070_s8 + $0x9a8] sm:$0xff]  ;;  %v6792_v19 = vpack.c.bf16 %v3380_v17, %v3379_v46  ;;  %v3365_v2 = vld [vmem:[%s11070_s8 + $0x830] sm:$0xff] }
 0x384   : > { %6775 = vmatpush3.bf16.msra.mxu1 %v6774_v10  ;;  %6745 = vmatprep.subr.bf16.mxu0 %v6744_v55  ;;  %v3409_v10 = vld [vmem:[%s11070_s8 + $0x990] sm:$0xff]  ;;  %v2982_v55 = vmul.f32 %v9266_v24, %v11507_v58  ;;  %v3364_v15 = vld [vmem:[%s11070_s8 + $0x828] sm:$0xff]  ;;  %v6824_v58 = vpack.c.bf16 %v3412_v27, %v3411_v32  ;;  %v11513_v46 = vld [vmem:[#allocation90_spill] sm:$0xff]  ;;  %v3078_v32 = vmul.f32 %v9473_v40, %v9114_v48 }
 0x385   : > { %6777 = vmatprep.subr.bf16.mxu1 %v6776_v18  ;;  %v11508_v18 = vld [vmem:[#allocation87_spill] sm:$0xff]  ;;  %v3397_v0 = vld [vmem:[%s11070_s8 + $0x930] sm:$0xff]  ;;  %v2987_v17 = vmul.f32 %v9266_v24, %v11513_v46  ;;  %v3080_v27 = vmul.f32 %v9473_v40, %v9130_v9  ;;  %v3400_v9 = vld [vmem:[%s11070_s8 + $0x948] sm:$0xff] }
 0x386   : > { %v2984_v6 = vmul.f32 %v9266_v24, %v11508_v18  ;;  %v3382_v18 = vld [vmem:[%s11070_s8 + $0x8b8] sm:$0xff]  ;;  %v3399_v48 = vld [vmem:[%s11070_s8 + $0x940] sm:$0xff] }
 0x387   : > { %6747 = vmatpush3.bf16.msra.mxu0 %v6746_v45  ;;  %v11509_v45 = vld [vmem:[#allocation91_spill] sm:$0xff] }
 0x388   : > { %6779 = vmatpush3.bf16.msra.mxu1 %v6778_v34  ;;  %6749 = vmatprep.subr.bf16.mxu0 %v6748_v42  ;;  %v3015_v34 = vmul.f32 %v9447_v5, %v11509_v45  ;;  %v6788_v42 = vpack.c.bf16 %v3378_v1, %v3377_v59  ;;  %v3395_v59 = vld [vmem:[%s11070_s8 + $0x920] sm:$0xff]  ;;  %v3396_v1 = vld [vmem:[%s11070_s8 + $0x928] sm:$0xff]  ;;  %v3366_v45 = vld [vmem:[%s11070_s8 + $0x838] sm:$0xff] }
 0x389   : > { %6781 = vmatprep.subr.bf16.mxu1 %v6780_v54  ;;  %v6820_v54 = vpack.c.bf16 %v3410_v8, %v3409_v10  ;;  %v3047_v10 = vmul.f32 %v9460_v3, %v8870_v16  ;;  %v3049_v8 = vmul.f32 %v9460_v3, %v8921_v14  ;;  %v3414_v16 = vld [vmem:[%s11070_s8 + $0x9b8] sm:$0xff]  ;;  %v6798_v47 = vpack.c.bf16 %v3366_v45, %v3365_v2 }
 0x38b   : > { %6751 = vmatpush3.bf16.msra.mxu0 %v6750_v53  ;;  %v3014_v53 = vmul.f32 %v9447_v5, %v11511_v50 }
 0x38c   : > { %6783 = vmatpush3.bf16.msra.mxu1 %v6782_v21  ;;  %6785 = vmatprep.subr.bf16.mxu0 %v6784_v13  ;;  %v11512_v21 = vld [vmem:[#allocation11_spill] sm:$0xff] }
 0x38d   : > { %6817 = vmatprep.subr.bf16.mxu1 %v6816_v26  ;;  %v3016_v13 = vmul.f32 %v9447_v5, %v11512_v21  ;;  %v3363_v26 = vld [vmem:[%s11070_s8 + $0x820] sm:$0xff]  ;;  %v3368_v21 = vld [vmem:[%s11070_s8 + $0x848] sm:$0xff] }
 0x38e   : > { %4190 = vmatmul.mubr.f32.vlgmr.msra.gmra.mrb[92].mxu0 %v2982_v55  ;;  %v3381_v55 = vld [vmem:[%s11070_s8 + $0x8b0] sm:$0xff]  ;;  %v6794_v14 = vpack.c.bf16 %v3364_v15, %v3363_v26  ;;  %v3386_v15 = vld [vmem:[%s11070_s8 + $0x8d8] sm:$0xff] }
 0x38f   : > { %4275 = vmatmul.mubr.f32.vlgmr.msra.gmra.mrb[84].mxu1 %v2984_v6  ;;  %4194 = vmatprep.mubr.f32.mxu0 %v3015_v34  ;;  %v3413_v6 = vld [vmem:[%s11070_s8 + $0x9b0] sm:$0xff]  ;;  %v6796_v52 = vpack.c.bf16 %v3382_v18, %v3381_v55  ;;  %v3079_v34 = vmul.f32 %v9473_v40, %v9122_v49  ;;  %v3384_v49 = vld [vmem:[%s11070_s8 + $0x8c8] sm:$0xff]  ;;  %v3370_v55 = vld [vmem:[%s11070_s8 + $0x858] sm:$0xff] }
 0x390   : > { %4279 = vmatprep.mubr.f32.mxu1 %v3017_v60  ;;  %6787 = vmatpush3.bf16.msra.mxu0 %v6786_v11  ;;  %v6826_v11 = vpack.c.bf16 %v3396_v1, %v3395_v59  ;;  %v6828_v44 = vpack.c.bf16 %v3414_v16, %v3413_v6  ;;  %v3398_v60 = vld [vmem:[%s11070_s8 + $0x938] sm:$0xff]  ;;  %v3417_v59 = vld [vmem:[%s11070_s8 + $0x9d0] sm:$0xff] }
 0x391   : > { %6819 = vmatpush3.bf16.msra.mxu1 %v6818_v12  ;;  %6789 = vmatprep.subr.bf16.mxu0 %v6788_v42  ;;  %v3046_v12 = vmul.f32 %v9460_v3, %v8852_v43  ;;  %v3081_v43 = vmul.f32 %v9473_v40, %v9138_v62  ;;  %v3383_v42 = vld [vmem:[%s11070_s8 + $0x8c0] sm:$0xff]  ;;  %v6830_v50 = vpack.c.bf16 %v3398_v60, %v3397_v0  ;;  %v3418_v1 = vld [vmem:[%s11070_s8 + $0x9d8] sm:$0xff]  ;;  %v3401_v16 = vld [vmem:[%s11070_s8 + $0x950] sm:$0xff] }
 0x392   : > { %6821 = vmatprep.subr.bf16.mxu1 %v6820_v54  ;;  %4195 = vmatmul.mubr.f32.gmra.mrb[94].mxu0 %v3014_v53  ;;  %v3415_v62 = vld [vmem:[%s11070_s8 + $0x9c0] sm:$0xff]  ;;  %v3416_v54 = vld [vmem:[%s11070_s8 + $0x9c8] sm:$0xff]  ;;  %v6836_v6 = vpack.c.bf16 %v3418_v1, %v3417_v59 }
 0x393   : > { %4280 = vmatmul.mubr.f32.gmra.mrb[86].mxu1 %v3016_v13  ;;  %4199 = vmatprep.mubr.f32.mxu0 %v3047_v10  ;;  %v3367_v53 = vld [vmem:[%s11070_s8 + $0x840] sm:$0xff]  ;;  %v11514_v13 = vld [vmem:[#allocation16_spill] sm:$0xff] }
 0x394   : > { %4284 = vmatprep.mubr.f32.mxu1 %v3049_v8  ;;  %6791 = vmatpush3.bf16.msra.mxu0 %v6790_v41  ;;  %v2989_v26 = vmul.f32 %v9266_v24, %v11514_v13  ;;  %v6800_v41 = vpack.c.bf16 %v3384_v49, %v3383_v42  ;;  %v6802_v10 = vpack.c.bf16 %v3368_v21, %v3367_v53  ;;  %v3403_v60 = vld [vmem:[%s11070_s8 + $0x960] sm:$0xff]  ;;  %v3404_v42 = vld [vmem:[%s11070_s8 + $0x968] sm:$0xff]  ;;  %v3389_v49 = vld [vmem:[%s11070_s8 + $0x8f0] sm:$0xff] }
 0x395   : > { %6823 = vmatpush3.bf16.msra.mxu1 %v6822_v25  ;;  %6793 = vmatprep.subr.bf16.mxu0 %v6792_v19  ;;  %v6832_v25 = vpack.c.bf16 %v3416_v54, %v3415_v62  ;;  %v3385_v19 = vld [vmem:[%s11070_s8 + $0x8d0] sm:$0xff]  ;;  %v6834_v8 = vpack.c.bf16 %v3400_v9, %v3399_v48  ;;  %v3390_v62 = vld [vmem:[%s11070_s8 + $0x8f8] sm:$0xff]  ;;  %v3472_v48 = vld [vmem:[%s11070_s8 + $0xb88] sm:$0xff] }
 0x396   : > { %6825 = vmatprep.subr.bf16.mxu1 %v6824_v58  ;;  %4200 = vmatmul.mubr.f32.gmra.mrb[96].mxu0 %v3046_v12  ;;  %v3369_v58 = vld [vmem:[%s11070_s8 + $0x850] sm:$0xff]  ;;  %v6804_v18 = vpack.c.bf16 %v3386_v15, %v3385_v19  ;;  %v3388_v12 = vld [vmem:[%s11070_s8 + $0x8e8] sm:$0xff]  ;;  %v3406_v13 = vld [vmem:[%s11070_s8 + $0x978] sm:$0xff] }
 0x397   : > { %4285 = vmatmul.mubr.f32.gmra.mrb[88].mxu1 %v3048_v29  ;;  %4204 = vmatprep.mubr.f32.mxu0 %v3079_v34  ;;  %v3419_v29 = vld [vmem:[%s11070_s8 + $0x9e0] sm:$0xff]  ;;  %v6806_v2 = vpack.c.bf16 %v3370_v55, %v3369_v58  ;;  %v3421_v54 = vld [vmem:[%s11070_s8 + $0x9f0] sm:$0xff]  ;;  %v3456_v58 = vld [vmem:[%s11070_s8 + $0xb08] sm:$0xff] }
 0x398   : > { %4289 = vmatprep.mubr.f32.mxu1 %v3081_v43  ;;  %6795 = vmatpush3.bf16.msra.mxu0 %v6794_v14  ;;  %v3402_v14 = vld [vmem:[%s11070_s8 + $0x958] sm:$0xff]  ;;  %v3371_v34 = vld [vmem:[%s11070_s8 + $0x860] sm:$0xff]  ;;  %v3372_v43 = vld [vmem:[%s11070_s8 + $0x868] sm:$0xff] }
 0x399   : > { %6827 = vmatpush3.bf16.msra.mxu1 %v6826_v11  ;;  %6797 = vmatprep.subr.bf16.mxu0 %v6796_v52  ;;  %v3387_v11 = vld [vmem:[%s11070_s8 + $0x8e0] sm:$0xff]  ;;  %v3420_v52 = vld [vmem:[%s11070_s8 + $0x9e8] sm:$0xff]  ;;  %v6838_v45 = vpack.c.bf16 %v3402_v14, %v3401_v16  ;;  %v6810_v46 = vpack.c.bf16 %v3372_v43, %v3371_v34  ;;  %v3405_v21 = vld [vmem:[%s11070_s8 + $0x970] sm:$0xff] }
 0x39a   : > { %6829 = vmatprep.subr.bf16.mxu1 %v6828_v44  ;;  %4205 = vmatmul.mubr.f32.gmra.mrb[98].mxu0 %v3078_v32  ;;  %v6808_v44 = vpack.c.bf16 %v3388_v12, %v3387_v11  ;;  %v6840_v0 = vpack.c.bf16 %v3420_v52, %v3419_v29  ;;  %v3373_v32 = vld [vmem:[%s11070_s8 + $0x870] sm:$0xff]  ;;  %v6846_v19 = vpack.c.bf16 %v3406_v13, %v3405_v21  ;;  %v3423_v1 = vld [vmem:[%s11070_s8 + $0xa00] sm:$0xff]  ;;  %v3474_v16 = vld [vmem:[%s11070_s8 + $0xb98] sm:$0xff] }
 0x39b   : > { %4290 = vmatmul.mubr.f32.gmra.mrb[90].mxu1 %v3080_v27  ;;  %4359 = vmatprep.mubr.f32.mxu0 %v2987_v17  ;;  %v6842_v17 = vpack.c.bf16 %v3404_v42, %v3403_v60  ;;  %v3374_v27 = vld [vmem:[%s11070_s8 + $0x878] sm:$0xff]  ;;  %v3441_v55 = vld [vmem:[%s11070_s8 + $0xa90] sm:$0xff]  ;;  %v11516_v12 = vld [vmem:[#allocation15_spill] sm:$0xff]  ;;  %v3051_v13 = vmul.f32 %v9460_v3, %v8941_v30 }
 0x39c   : > { %4444 = vmatprep.mubr.f32.mxu1 %v2989_v26  ;;  %6799 = vmatpush3.bf16.msra.mxu0 %v6798_v47  ;;  %v3422_v47 = vld [vmem:[%s11070_s8 + $0x9f8] sm:$0xff]  ;;  %v3439_v26 = vld [vmem:[%s11070_s8 + $0xa80] sm:$0xff]  ;;  %v6814_v9 = vpack.c.bf16 %v3374_v27, %v3373_v32  ;;  %v11515_v14 = vld [vmem:[#allocation89_spill] sm:$0xff]  ;;  %v2988_v29 = vmul.f32 %v9266_v24, %v11516_v12 }
 0x39d   : > { %6831 = vmatpush3.bf16.msra.mxu1 %v6830_v50  ;;  %6801 = vmatprep.subr.bf16.mxu0 %v6800_v41  ;;  %v6812_v50 = vpack.c.bf16 %v3390_v62, %v3389_v49  ;;  %v6844_v53 = vpack.c.bf16 %v3422_v47, %v3421_v54  ;;  %v3440_v41 = vld [vmem:[%s11070_s8 + $0xa88] sm:$0xff]  ;;  %v2986_v11 = vmul.f32 %v9266_v24, %v11515_v14  ;;  %v3426_v34 = vld [vmem:[%s11070_s8 + $0xa18] sm:$0xff]  ;;  %v3457_v62 = vld [vmem:[%s11070_s8 + $0xb10] sm:$0xff] }
 0x39e   : > { %6833 = vmatprep.subr.bf16.mxu1 %v6832_v25  ;;  %v3471_v25 = vld [vmem:[%s11070_s8 + $0xb80] sm:$0xff]  ;;  %v6848_v15 = vpack.c.bf16 %v3440_v41, %v3439_v26  ;;  %v11517_v43 = vld [vmem:[#allocation28_spill] sm:$0xff]  ;;  %v3458_v54 = vld [vmem:[%s11070_s8 + $0xb18] sm:$0xff] }
 0x39f   : > { %v6880_v59 = vpack.c.bf16 %v3472_v48, %v3471_v25  ;;  %v3443_v47 = vld [vmem:[%s11070_s8 + $0xaa0] sm:$0xff]  ;;  %v3476_v32 = vld [vmem:[%s11070_s8 + $0xba8] sm:$0xff]  ;;  %v6886_v41 = vpack.c.bf16 %v3458_v54, %v3457_v62  ;;  %v3429_v14 = vld [vmem:[%s11070_s8 + $0xa30] sm:$0xff] }
 0x3a0   : > { %6803 = vmatpush3.bf16.msra.mxu0 %v6802_v10  ;;  %v3424_v10 = vld [vmem:[%s11070_s8 + $0xa08] sm:$0xff]  ;;  %v11519_v27 = vld [vmem:[#allocation27_spill] sm:$0xff] }
 0x3a1   : > { %6835 = vmatpush3.bf16.msra.mxu1 %v6834_v8  ;;  %6805 = vmatprep.subr.bf16.mxu0 %v6804_v18  ;;  %v3455_v8 = vld [vmem:[%s11070_s8 + $0xb00] sm:$0xff]  ;;  %v3442_v18 = vld [vmem:[%s11070_s8 + $0xa98] sm:$0xff]  ;;  %v6850_v52 = vpack.c.bf16 %v3424_v10, %v3423_v1  ;;  %v3428_v48 = vld [vmem:[%s11070_s8 + $0xa28] sm:$0xff] }
 0x3a2   : > { %6837 = vmatprep.subr.bf16.mxu1 %v6836_v6  ;;  %v3473_v6 = vld [vmem:[%s11070_s8 + $0xb90] sm:$0xff]  ;;  %v6852_v42 = vpack.c.bf16 %v3442_v18, %v3441_v55  ;;  %v3427_v25 = vld [vmem:[%s11070_s8 + $0xa20] sm:$0xff]  ;;  %v3446_v10 = vld [vmem:[%s11070_s8 + $0xab8] sm:$0xff]  ;;  %v3052_v55 = vmul.f32 %v9460_v3, %v8977_v23  ;;  %v3085_v23 = vmul.f32 %v9473_v40, %v9159_v22 }
 0x3a3   : > { %v6884_v49 = vpack.c.bf16 %v3474_v16, %v3473_v6  ;;  %v3445_v1 = vld [vmem:[%s11070_s8 + $0xab0] sm:$0xff]  ;;  %v6858_v18 = vpack.c.bf16 %v3428_v48, %v3427_v25  ;;  %v3479_v22 = vld [vmem:[%s11070_s8 + $0xbc0] sm:$0xff]  ;;  %v3432_v62 = vld [vmem:[%s11070_s8 + $0xa48] sm:$0xff] }
 0x3a4   : > { %6807 = vmatpush3.bf16.msra.mxu0 %v6806_v2  ;;  %v6882_v2 = vpack.c.bf16 %v3456_v58, %v3455_v8  ;;  %v3478_v8 = vld [vmem:[%s11070_s8 + $0xbb8] sm:$0xff]  ;;  %v3050_v58 = vmul.f32 %v9460_v3, %v8934_v35  ;;  %v6860_v16 = vpack.c.bf16 %v3446_v10, %v3445_v1  ;;  %v3083_v35 = vmul.f32 %v9473_v40, %v9149_v57  ;;  %v3448_v57 = vld [vmem:[%s11070_s8 + $0xac8] sm:$0xff]  ;;  %v3465_v10 = vld [vmem:[%s11070_s8 + $0xb50] sm:$0xff] }
 0x3a5   : > { %6839 = vmatpush3.bf16.msra.mxu1 %v6838_v45  ;;  %6809 = vmatprep.subr.bf16.mxu0 %v6808_v44  ;;  %v3425_v45 = vld [vmem:[%s11070_s8 + $0xa10] sm:$0xff]  ;;  %v3019_v44 = vmul.f32 %v9447_v5, %v11517_v43  ;;  %v11522_v54 = vld [vmem:[#allocation48_spill] sm:$0xff] }
 0x3a6   : > { %6841 = vmatprep.subr.bf16.mxu1 %v6840_v0  ;;  %v11518_v0 = vld [vmem:[#allocation20_spill] sm:$0xff]  ;;  %v6854_v26 = vpack.c.bf16 %v3426_v34, %v3425_v45  ;;  %v11521_v43 = vld [vmem:[#allocation25_spill] sm:$0xff] }
 0x3a7   : > { %v3021_v60 = vmul.f32 %v9447_v5, %v11518_v0  ;;  %v3480_v45 = vld [vmem:[%s11070_s8 + $0xbc8] sm:$0xff]  ;;  %v3082_v0 = vmul.f32 %v9473_v40, %v9144_v7  ;;  %v3463_v7 = vld [vmem:[%s11070_s8 + $0xb40] sm:$0xff] }
 0x3a8   : > { %6811 = vmatpush3.bf16.msra.mxu0 %v6810_v46  ;;  %v3444_v46 = vld [vmem:[%s11070_s8 + $0xaa8] sm:$0xff] }
 0x3a9   : > { %6843 = vmatpush3.bf16.msra.mxu1 %v6842_v17  ;;  %6813 = vmatprep.subr.bf16.mxu0 %v6812_v50  ;;  %v3475_v17 = vld [vmem:[%s11070_s8 + $0xba0] sm:$0xff]  ;;  %v3018_v50 = vmul.f32 %v9447_v5, %v11519_v27  ;;  %v6856_v30 = vpack.c.bf16 %v3444_v46, %v3443_v47  ;;  %v2993_v47 = vmul.f32 %v9266_v24, %v11522_v54  ;;  %v3450_v27 = vld [vmem:[%s11070_s8 + $0xad8] sm:$0xff] }
 0x3aa   : > { %6845 = vmatprep.subr.bf16.mxu1 %v6844_v53  ;;  %v11520_v53 = vld [vmem:[#allocation19_spill] sm:$0xff] }
 0x3ab   : > { %v3020_v21 = vmul.f32 %v9447_v5, %v11520_v53  ;;  %v3482_v53 = vld [vmem:[%s11070_s8 + $0xbd8] sm:$0xff]  ;;  %v3503_v54 = vld [vmem:[%s11070_s8 + $0xc80] sm:$0xff] }
 0x3ac   : > { %6815 = vmatpush3.bf16.msra.mxu0 %v6814_v9  ;;  %v3459_v9 = vld [vmem:[%s11070_s8 + $0xb20] sm:$0xff] }
 0x3ad   : > { %6847 = vmatpush3.bf16.msra.mxu1 %v6846_v19  ;;  %6849 = vmatprep.subr.bf16.mxu0 %v6848_v15  ;;  %v3053_v19 = vmul.f32 %v9460_v3, %v8988_v4  ;;  %v6888_v15 = vpack.c.bf16 %v3476_v32, %v3475_v17  ;;  %v3477_v4 = vld [vmem:[%s11070_s8 + $0xbb0] sm:$0xff]  ;;  %v6896_v17 = vpack.c.bf16 %v3480_v45, %v3479_v22  ;;  %v3486_v45 = vld [vmem:[%s11070_s8 + $0xbf8] sm:$0xff] }
 0x3ae   : > { %6881 = vmatprep.subr.bf16.mxu1 %v6880_v59  ;;  %v3460_v59 = vld [vmem:[%s11070_s8 + $0xb28] sm:$0xff]  ;;  %v6892_v12 = vpack.c.bf16 %v3478_v8, %v3477_v4  ;;  %v3449_v32 = vld [vmem:[%s11070_s8 + $0xad0] sm:$0xff]  ;;  %v3466_v4 = vld [vmem:[%s11070_s8 + $0xb58] sm:$0xff] }
 0x3af   : > { %4360 = vmatmul.mubr.f32.vlgmr.msra.gmra.mrb[100].mxu0 %v2986_v11  ;;  %v6890_v6 = vpack.c.bf16 %v3460_v59, %v3459_v9  ;;  %v3430_v11 = vld [vmem:[%s11070_s8 + $0xa38] sm:$0xff]  ;;  %v3433_v9 = vld [vmem:[%s11070_s8 + $0xa50] sm:$0xff]  ;;  %v6868_v59 = vpack.c.bf16 %v3450_v27, %v3449_v32  ;;  %v3451_v8 = vld [vmem:[%s11070_s8 + $0xae0] sm:$0xff] }
 0x3b0   : > { %4445 = vmatmul.mubr.f32.vlgmr.msra.gmra.mrb[92].mxu1 %v2988_v29  ;;  %4364 = vmatprep.mubr.f32.mxu0 %v3019_v44  ;;  %v3461_v29 = vld [vmem:[%s11070_s8 + $0xb30] sm:$0xff]  ;;  %v6862_v34 = vpack.c.bf16 %v3430_v11, %v3429_v14  ;;  %v2991_v44 = vmul.f32 %v9266_v24, %v11521_v43  ;;  %v6902_v14 = vpack.c.bf16 %v3466_v4, %v3465_v10  ;;  %v3435_v11 = vld [vmem:[%s11070_s8 + $0xa60] sm:$0xff]  ;;  %v3490_v4 = vld [vmem:[%s11070_s8 + $0xc18] sm:$0xff] }
 0x3b1   : > { %4449 = vmatprep.mubr.f32.mxu1 %v3021_v60  ;;  %6851 = vmatpush3.bf16.msra.mxu0 %v6850_v52  ;;  %v3462_v52 = vld [vmem:[%s11070_s8 + $0xb38] sm:$0xff]  ;;  %v3084_v60 = vmul.f32 %v9473_v40, %v9154_v61  ;;  %v3464_v61 = vld [vmem:[%s11070_s8 + $0xb48] sm:$0xff]  ;;  %v3485_v22 = vld [vmem:[%s11070_s8 + $0xbf0] sm:$0xff] }
 0x3b2   : > { %6883 = vmatpush3.bf16.msra.mxu1 %v6882_v2  ;;  %6853 = vmatprep.subr.bf16.mxu0 %v6852_v42  ;;  %v3447_v2 = vld [vmem:[%s11070_s8 + $0xac0] sm:$0xff]  ;;  %v6894_v42 = vpack.c.bf16 %v3462_v52, %v3461_v29  ;;  %v6898_v48 = vpack.c.bf16 %v3464_v61, %v3463_v7  ;;  %v3468_v52 = vld [vmem:[%s11070_s8 + $0xb68] sm:$0xff]  ;;  %v3489_v10 = vld [vmem:[%s11070_s8 + $0xc10] sm:$0xff] }
 0x3b3   : > { %6885 = vmatprep.subr.bf16.mxu1 %v6884_v49  ;;  %4365 = vmatmul.mubr.f32.gmra.mrb[102].mxu0 %v3018_v50  ;;  %v3431_v49 = vld [vmem:[%s11070_s8 + $0xa40] sm:$0xff]  ;;  %v6864_v46 = vpack.c.bf16 %v3448_v57, %v3447_v2  ;;  %v3481_v50 = vld [vmem:[%s11070_s8 + $0xbd0] sm:$0xff]  ;;  %v3454_v57 = vld [vmem:[%s11070_s8 + $0xaf8] sm:$0xff] }
 0x3b4   : > { %4450 = vmatmul.mubr.f32.gmra.mrb[94].mxu1 %v3020_v21  ;;  %4369 = vmatprep.mubr.f32.mxu0 %v3051_v13  ;;  %v6900_v1 = vpack.c.bf16 %v3482_v53, %v3481_v50  ;;  %v3467_v29 = vld [vmem:[%s11070_s8 + $0xb60] sm:$0xff]  ;;  %v3453_v2 = vld [vmem:[%s11070_s8 + $0xaf0] sm:$0xff]  ;;  %v3488_v53 = vld [vmem:[%s11070_s8 + $0xc08] sm:$0xff] }
 0x3b5   : > { %4454 = vmatprep.mubr.f32.mxu1 %v3053_v19  ;;  %6855 = vmatpush3.bf16.msra.mxu0 %v6854_v26  ;;  %v6866_v26 = vpack.c.bf16 %v3432_v62, %v3431_v49  ;;  %v3434_v19 = vld [vmem:[%s11070_s8 + $0xa58] sm:$0xff]  ;;  %v6906_v43 = vpack.c.bf16 %v3468_v52, %v3467_v29  ;;  %v3469_v49 = vld [vmem:[%s11070_s8 + $0xb70] sm:$0xff]  ;;  %v3487_v50 = vld [vmem:[%s11070_s8 + $0xc00] sm:$0xff] }
 0x3b6   : > { %6887 = vmatpush3.bf16.msra.mxu1 %v6886_v41  ;;  %6857 = vmatprep.subr.bf16.mxu0 %v6856_v30  ;;  %v3470_v62 = vld [vmem:[%s11070_s8 + $0xb78] sm:$0xff]  ;;  %v3539_v29 = vld [vmem:[%s11070_s8 + $0xda0] sm:$0xff]  ;;  %v3540_v52 = vld [vmem:[%s11070_s8 + $0xda8] sm:$0xff] }
 0x3b7   : > { %6889 = vmatprep.subr.bf16.mxu1 %v6888_v15  ;;  %4370 = vmatmul.mubr.f32.gmra.mrb[104].mxu0 %v3050_v58  ;;  %v3452_v58 = vld [vmem:[%s11070_s8 + $0xae8] sm:$0xff]  ;;  %v6910_v61 = vpack.c.bf16 %v3470_v62, %v3469_v49  ;;  %v6952_v62 = vpack.c.bf16 %v3540_v52, %v3539_v29 }
 0x3b8   : > { %4455 = vmatmul.mubr.f32.gmra.mrb[96].mxu1 %v3052_v55  ;;  %4374 = vmatprep.mubr.f32.mxu0 %v3083_v35  ;;  %v3483_v55 = vld [vmem:[%s11070_s8 + $0xbe0] sm:$0xff]  ;;  %v3436_v35 = vld [vmem:[%s11070_s8 + $0xa68] sm:$0xff] }
 0x3b9   : > { %4459 = vmatprep.mubr.f32.mxu1 %v3085_v23  ;;  %6859 = vmatpush3.bf16.msra.mxu0 %v6858_v18  ;;  %v3484_v18 = vld [vmem:[%s11070_s8 + $0xbe8] sm:$0xff]  ;;  %v6872_v23 = vpack.c.bf16 %v3452_v58, %v3451_v8  ;;  %v11525_v8 = vld [vmem:[#allocation51_spill] sm:$0xff] }
 0x3ba   : > { %6891 = vmatpush3.bf16.msra.mxu1 %v6890_v6  ;;  %6861 = vmatprep.subr.bf16.mxu0 %v6860_v16  ;;  %v6870_v16 = vpack.c.bf16 %v3434_v19, %v3433_v9  ;;  %v11523_v9 = vld [vmem:[#allocation35_spill] sm:$0xff]  ;;  %v3023_v58 = vmul.f32 %v9447_v5, %v11525_v8 }
 0x3bb   : > { %6893 = vmatprep.subr.bf16.mxu1 %v6892_v12  ;;  %4375 = vmatmul.mubr.f32.gmra.mrb[106].mxu0 %v3082_v0  ;;  %v6904_v12 = vpack.c.bf16 %v3484_v18, %v3483_v55  ;;  %v3438_v0 = vld [vmem:[%s11070_s8 + $0xa78] sm:$0xff]  ;;  %v2990_v19 = vmul.f32 %v9266_v24, %v11523_v9  ;;  %v11526_v55 = vld [vmem:[#allocation63_spill] sm:$0xff]  ;;  %v3086_v9 = vmul.f32 %v9473_v40, %v9164_v63  ;;  %v11530_v63 = vld [vmem:[#allocation72_spill] sm:$0xff] }
 0x3bc   : > { %4460 = vmatmul.mubr.f32.gmra.mrb[98].mxu1 %v3084_v60  ;;  %v5625_v21 = vpop.f32.mrb[68].mxu0  ;;  %v5669_v13 = vpop.f32.mrb[60].mxu1  ;;  %4529 = vmatprep.mubr.f32.mxu0 %v2991_v44  ;;  %v3437_v44 = vld [vmem:[%s11070_s8 + $0xa70] sm:$0xff]  ;;  %v6876_v60 = vpack.c.bf16 %v3454_v57, %v3453_v2  ;;  %v3025_v18 = vmul.f32 %v9447_v5, %v11526_v55  ;;  %v2997_v8 = vmul.f32 %v9266_v24, %v11530_v63 }
 0x3bd   : > { %4614 = vmatprep.mubr.f32.mxu1 %v2993_v47  ;;  %v5626_v41 = vpop.f32.mrb[69].mxu0  ;;  %v5670_v25 = vpop.f32.mrb[61].mxu1  ;;  %6863 = vmatpush3.bf16.msra.mxu0 %v6862_v34  ;;  %v6874_v34 = vpack.c.bf16 %v3436_v35, %v3435_v11  ;;  %v3504_v47 = vld [vmem:[%s11070_s8 + $0xc88] sm:$0xff]  ;;  %v6878_v7 = vpack.c.bf16 %v3438_v0, %v3437_v44  ;;  %v3521_v11 = vld [vmem:[%s11070_s8 + $0xd10] sm:$0xff]  ;;  %v3522_v35 = vld [vmem:[%s11070_s8 + $0xd18] sm:$0xff] }
 0x3be   : > { %6895 = vmatpush3.bf16.msra.mxu1 %v6894_v42  ;;  %v5627_v30 = vadd.f32 %v5626_v41, %v5625_v21  ;;  %v5671_v15 = vadd.f32 %v5670_v25, %v5669_v13  ;;  %6865 = vmatprep.subr.bf16.mxu0 %v6864_v46  ;;  %v6908_v42 = vpack.c.bf16 %v3486_v45, %v3485_v22  ;;  %v3535_v46 = vld [vmem:[%s11070_s8 + $0xd80] sm:$0xff]  ;;  %v3520_v13 = vld [vmem:[%s11070_s8 + $0xd08] sm:$0xff]  ;;  %v3506_v41 = vld [vmem:[%s11070_s8 + $0xc98] sm:$0xff] }
 0x3bf   : > { %6897 = vmatprep.subr.bf16.mxu1 %v6896_v17  ;;  %v3536_v17 = vld [vmem:[%s11070_s8 + $0xd88] sm:$0xff]  ;;  %v6912_v32 = vpack.c.bf16 %v3504_v47, %v3503_v54  ;;  %v3519_v21 = vld [vmem:[%s11070_s8 + $0xd00] sm:$0xff]  ;;  %v3537_v25 = vld [vmem:[%s11070_s8 + $0xd90] sm:$0xff]  ;;  %v6950_v44 = vpack.c.bf16 %v3522_v35, %v3521_v11 }
 0x3c0   : > { %v10338_v6 = vadd.f32 %v5671_v15, %v5627_v30  ;;  %v6944_v27 = vpack.c.bf16 %v3536_v17, %v3535_v46  ;;  %v11524_v30 = vld [vmem:[#allocation26_spill] sm:$0xff]  ;;  %v11527_v2 = vld [vmem:[#allocation29_spill] sm:$0xff]  ;;  %v3491_v0 = vld [vmem:[%s11070_s8 + $0xc20] sm:$0xff] }
 0x3c1   : > { %6867 = vmatpush3.bf16.msra.mxu0 %v6866_v26  ;;  %v3505_v26 = vld [vmem:[%s11070_s8 + $0xc90] sm:$0xff]  ;;  %v2992_v15 = vmul.f32 %v9266_v24, %v11524_v30  ;;  %v3022_v57 = vmul.f32 %v9447_v5, %v11527_v2  ;;  %v3524_v54 = vld [vmem:[%s11070_s8 + $0xd28] sm:$0xff]  ;;  %v3542_v17 = vld [vmem:[%s11070_s8 + $0xdb8] sm:$0xff] }
 0x3c2   : > { %6899 = vmatpush3.bf16.msra.mxu1 %v6898_v48  ;;  %6869 = vmatprep.subr.bf16.mxu0 %v6868_v59  ;;  %v3538_v48 = vld [vmem:[%s11070_s8 + $0xd98] sm:$0xff]  ;;  %v6914_v59 = vpack.c.bf16 %v3488_v53, %v3487_v50  ;;  %v11528_v22 = vld [vmem:[#allocation41_spill] sm:$0xff] }
 0x3c3   : > { %6901 = vmatprep.subr.bf16.mxu1 %v6900_v1  ;;  %v6946_v1 = vpack.c.bf16 %v3520_v13, %v3519_v21  ;;  %v3024_v45 = vmul.f32 %v9447_v5, %v11528_v22  ;;  %v3509_v47 = vld [vmem:[%s11070_s8 + $0xcb0] sm:$0xff]  ;;  %v3494_v21 = vld [vmem:[%s11070_s8 + $0xc38] sm:$0xff] }
 0x3c4   : > { %v3541_v46 = vld [vmem:[%s11070_s8 + $0xdb0] sm:$0xff]  ;;  %v3514_v35 = vld [vmem:[%s11070_s8 + $0xcd8] sm:$0xff] }
 0x3c5   : > { %6871 = vmatpush3.bf16.msra.mxu0 %v6870_v16  ;;  %v6916_v16 = vpack.c.bf16 %v3506_v41, %v3505_v26  ;;  %v3493_v53 = vld [vmem:[%s11070_s8 + $0xc30] sm:$0xff]  ;;  %v6956_v13 = vpack.c.bf16 %v3542_v17, %v3541_v46  ;;  %v3526_v26 = vld [vmem:[%s11070_s8 + $0xd38] sm:$0xff]  ;;  %v3511_v41 = vld [vmem:[%s11070_s8 + $0xcc0] sm:$0xff] }
 0x3c6   : > { %6903 = vmatpush3.bf16.msra.mxu1 %v6902_v14  ;;  %6873 = vmatprep.subr.bf16.mxu0 %v6872_v23  ;;  %v6948_v14 = vpack.c.bf16 %v3538_v48, %v3537_v25  ;;  %v3507_v23 = vld [vmem:[%s11070_s8 + $0xca0] sm:$0xff]  ;;  %v3544_v48 = vld [vmem:[%s11070_s8 + $0xdc8] sm:$0xff] }
 0x3c7   : > { %6905 = vmatprep.subr.bf16.mxu1 %v6904_v12  ;;  %v3508_v12 = vld [vmem:[%s11070_s8 + $0xca8] sm:$0xff]  ;;  %v3543_v25 = vld [vmem:[%s11070_s8 + $0xdc0] sm:$0xff] }
 0x3c8   : > { %v6920_v49 = vpack.c.bf16 %v3508_v12, %v3507_v23  ;;  %v6960_v55 = vpack.c.bf16 %v3544_v48, %v3543_v25  ;;  %v3545_v23 = vld [vmem:[%s11070_s8 + $0xdd0] sm:$0xff]  ;;  %v3546_v12 = vld [vmem:[%s11070_s8 + $0xdd8] sm:$0xff]  ;;  %v3499_v17 = vld [vmem:[%s11070_s8 + $0xc60] sm:$0xff] }
 0x3c9   : > { %6875 = vmatpush3.bf16.msra.mxu0 %v6874_v34  ;;  %v3055_v34 = vmul.f32 %v9460_v3, %v9018_v36  ;;  %v3523_v36 = vld [vmem:[%s11070_s8 + $0xd20] sm:$0xff]  ;;  %v3533_v48 = vld [vmem:[%s11070_s8 + $0xd70] sm:$0xff] }
 0x3ca   : > { %6907 = vmatpush3.bf16.msra.mxu1 %v6906_v43  ;;  %6877 = vmatprep.subr.bf16.mxu0 %v6876_v60  ;;  %v6918_v43 = vpack.c.bf16 %v3490_v4, %v3489_v10  ;;  %v3492_v60 = vld [vmem:[%s11070_s8 + $0xc28] sm:$0xff]  ;;  %v6954_v50 = vpack.c.bf16 %v3524_v54, %v3523_v36  ;;  %v3495_v10 = vld [vmem:[%s11070_s8 + $0xc40] sm:$0xff] }
 0x3cb   : > { %6909 = vmatprep.subr.bf16.mxu1 %v6908_v42  ;;  %v3057_v42 = vmul.f32 %v9460_v3, %v9043_v51  ;;  %v3510_v51 = vld [vmem:[%s11070_s8 + $0xcb8] sm:$0xff]  ;;  %v3496_v4 = vld [vmem:[%s11070_s8 + $0xc48] sm:$0xff]  ;;  %v3547_v54 = vld [vmem:[%s11070_s8 + $0xde0] sm:$0xff] }
 0x3cc   : > { %v6930_v22 = vpack.c.bf16 %v3496_v4, %v3495_v10  ;;  %v3516_v36 = vld [vmem:[%s11070_s8 + $0xce8] sm:$0xff] }
 0x3cd   : > { %6879 = vmatpush3.bf16.msra.mxu0 %v6878_v7  ;;  %v3054_v7 = vmul.f32 %v9460_v3, %v9009_v37  ;;  %v3089_v37 = vmul.f32 %v9473_v40, %v9179_v31  ;;  %v3512_v31 = vld [vmem:[%s11070_s8 + $0xcc8] sm:$0xff] }
 0x3ce   : > { %6911 = vmatpush3.bf16.msra.mxu1 %v6910_v61  ;;  %6913 = vmatprep.subr.bf16.mxu0 %v6912_v32  ;;  %v3056_v61 = vmul.f32 %v9460_v3, %v9032_v28  ;;  %v3087_v32 = vmul.f32 %v9473_v40, %v9169_v33  ;;  %v6924_v28 = vpack.c.bf16 %v3510_v51, %v3509_v47  ;;  %v3525_v33 = vld [vmem:[%s11070_s8 + $0xd30] sm:$0xff]  ;;  %v3548_v47 = vld [vmem:[%s11070_s8 + $0xde8] sm:$0xff] }
 0x3cf   : > { %6945 = vmatprep.subr.bf16.mxu1 %v6944_v27  ;;  %v6922_v27 = vpack.c.bf16 %v3492_v60, %v3491_v0  ;;  %v6964_v0 = vpack.c.bf16 %v3546_v12, %v3545_v23  ;;  %v3529_v60 = vld [vmem:[%s11070_s8 + $0xd50] sm:$0xff]  ;;  %v11532_v12 = vld [vmem:[#allocation50_spill] sm:$0xff] }
 0x3d0   : > { %4530 = vmatmul.mubr.f32.vlgmr.msra.gmra.mrb[108].mxu0 %v2990_v19  ;;  %v11529_v19 = vld [vmem:[#allocation60_spill] sm:$0xff] }
 0x3d1   : > { %4615 = vmatmul.mubr.f32.vlgmr.msra.gmra.mrb[100].mxu1 %v2992_v15  ;;  %4534 = vmatprep.mubr.f32.mxu0 %v3023_v58  ;;  %v2995_v30 = vmul.f32 %v9266_v24, %v11529_v19  ;;  %v3088_v15 = vmul.f32 %v9473_v40, %v9174_v38  ;;  %v6928_v58 = vpack.c.bf16 %v3512_v31, %v3511_v41  ;;  %v3527_v38 = vld [vmem:[%s11070_s8 + $0xd40] sm:$0xff]  ;;  %v3502_v41 = vld [vmem:[%s11070_s8 + $0xc78] sm:$0xff] }
 0x3d2   : > { %4619 = vmatprep.mubr.f32.mxu1 %v3025_v18  ;;  %6915 = vmatpush3.bf16.msra.mxu0 %v6914_v59  ;;  %v6926_v59 = vpack.c.bf16 %v3494_v21, %v3493_v53  ;;  %v3528_v18 = vld [vmem:[%s11070_s8 + $0xd48] sm:$0xff]  ;;  %v3517_v53 = vld [vmem:[%s11070_s8 + $0xcf0] sm:$0xff]  ;;  %v3518_v21 = vld [vmem:[%s11070_s8 + $0xcf8] sm:$0xff] }
 0x3d3   : > { %6947 = vmatpush3.bf16.msra.mxu1 %v6946_v1  ;;  %6917 = vmatprep.subr.bf16.mxu0 %v6916_v16  ;;  %v6958_v1 = vpack.c.bf16 %v3526_v26, %v3525_v33  ;;  %v3513_v16 = vld [vmem:[%s11070_s8 + $0xcd0] sm:$0xff]  ;;  %v6940_v31 = vpack.c.bf16 %v3518_v21, %v3517_v53  ;;  %v3567_v19 = vld [vmem:[%s11070_s8 + $0xe80] sm:$0xff]  ;;  %v3061_v53 = vmul.f32 %v9460_v3, %v9102_v20  ;;  %v3574_v20 = vld [vmem:[%s11070_s8 + $0xeb8] sm:$0xff] }
 0x3d4   : > { %6949 = vmatprep.subr.bf16.mxu1 %v6948_v14  ;;  %4535 = vmatmul.mubr.f32.gmra.mrb[110].mxu0 %v3022_v57  ;;  %v3501_v26 = vld [vmem:[%s11070_s8 + $0xc70] sm:$0xff] }
 0x3d5   : > { %4620 = vmatmul.mubr.f32.gmra.mrb[102].mxu1 %v3024_v45  ;;  %4539 = vmatprep.mubr.f32.mxu0 %v3055_v34  ;;  %v6962_v45 = vpack.c.bf16 %v3528_v18, %v3527_v38  ;;  %v3497_v34 = vld [vmem:[%s11070_s8 + $0xc50] sm:$0xff]  ;;  %v3584_v38 = vld [vmem:[%s11070_s8 + $0xf08] sm:$0xff] }
 0x3d6   : > { %4624 = vmatprep.mubr.f32.mxu1 %v3057_v42  ;;  %6919 = vmatpush3.bf16.msra.mxu0 %v6918_v43  ;;  %v3498_v43 = vld [vmem:[%s11070_s8 + $0xc58] sm:$0xff]  ;;  %v3569_v18 = vld [vmem:[%s11070_s8 + $0xe90] sm:$0xff] }
 0x3d7   : > { %6951 = vmatpush3.bf16.msra.mxu1 %v6950_v44  ;;  %6921 = vmatprep.subr.bf16.mxu0 %v6920_v49  ;;  %v6932_v44 = vpack.c.bf16 %v3514_v35, %v3513_v16  ;;  %v3530_v42 = vld [vmem:[%s11070_s8 + $0xd58] sm:$0xff]  ;;  %v3515_v49 = vld [vmem:[%s11070_s8 + $0xce0] sm:$0xff]  ;;  %v6934_v51 = vpack.c.bf16 %v3498_v43, %v3497_v34  ;;  %v3029_v43 = vmul.f32 %v9447_v5, %v8764_v56  ;;  %v3572_v56 = vld [vmem:[%s11070_s8 + $0xea8] sm:$0xff] }
 0x3d8   : > { %6953 = vmatprep.subr.bf16.mxu1 %v6952_v62  ;;  %4540 = vmatmul.mubr.f32.gmra.mrb[112].mxu0 %v3054_v7  ;;  %v6966_v46 = vpack.c.bf16 %v3530_v42, %v3529_v60  ;;  %v3500_v7 = vld [vmem:[%s11070_s8 + $0xc68] sm:$0xff]  ;;  %v3570_v16 = vld [vmem:[%s11070_s8 + $0xe98] sm:$0xff]  ;;  %v3585_v60 = vld [vmem:[%s11070_s8 + $0xf10] sm:$0xff] }
 0x3d9   : > { %4625 = vmatmul.mubr.f32.gmra.mrb[104].mxu1 %v3056_v61  ;;  %4544 = vmatprep.mubr.f32.mxu0 %v3087_v32  ;;  %v6936_v61 = vpack.c.bf16 %v3516_v36, %v3515_v49  ;;  %v6968_v32 = vpack.c.bf16 %v3548_v47, %v3547_v54  ;;  %v11531_v35 = vld [vmem:[#allocation38_spill] sm:$0xff]  ;;  %v3571_v49 = vld [vmem:[%s11070_s8 + $0xea0] sm:$0xff]  ;;  %v3604_v54 = vld [vmem:[%s11070_s8 + $0xfa8] sm:$0xff] }
 0x3da   : > { %4629 = vmatprep.mubr.f32.mxu1 %v3089_v37  ;;  %6923 = vmatpush3.bf16.msra.mxu0 %v6922_v27  ;;  %v3531_v27 = vld [vmem:[%s11070_s8 + $0xd60] sm:$0xff]  ;;  %v3549_v37 = vld [vmem:[%s11070_s8 + $0xdf0] sm:$0xff]  ;;  %v2994_v23 = vmul.f32 %v9266_v24, %v11531_v35  ;;  %v3586_v42 = vld [vmem:[%s11070_s8 + $0xf18] sm:$0xff]  ;;  %v6984_v21 = vpack.c.bf16 %v3572_v56, %v3571_v49 }
 0x3db   : > { %6955 = vmatpush3.bf16.msra.mxu1 %v6954_v50  ;;  %6925 = vmatprep.subr.bf16.mxu0 %v6924_v28  ;;  %v5628_v14 = vpop.f32.mrb[70].mxu0  ;;  %v3532_v50 = vld [vmem:[%s11070_s8 + $0xd68] sm:$0xff]  ;;  %v3550_v28 = vld [vmem:[%s11070_s8 + $0xdf8] sm:$0xff]  ;;  %v3603_v36 = vld [vmem:[%s11070_s8 + $0xfa0] sm:$0xff] }
 0x3dc   : > { %6957 = vmatprep.subr.bf16.mxu1 %v6956_v13  ;;  %v5672_v11 = vpop.f32.mrb[62].mxu1  ;;  %4545 = vmatmul.mubr.f32.gmra.mrb[114].mxu0 %v3086_v9  ;;  %v5629_v29 = vpop.f32.mrb[71].mxu0  ;;  %v6938_v13 = vpack.c.bf16 %v3500_v7, %v3499_v17  ;;  %v6970_v33 = vpack.c.bf16 %v3532_v50, %v3531_v27  ;;  %v6972_v25 = vpack.c.bf16 %v3550_v28, %v3549_v37  ;;  %v3534_v9 = vld [vmem:[%s11070_s8 + $0xd78] sm:$0xff]  ;;  %v11534_v47 = vld [vmem:[#allocation53_spill] sm:$0xff]  ;;  %v3555_v27 = vld [vmem:[%s11070_s8 + $0xe20] sm:$0xff] }
 0x3dd   : > { %4630 = vmatmul.mubr.f32.gmra.mrb[106].mxu1 %v3088_v15  ;;  %v5673_v52 = vpop.f32.mrb[63].mxu1  ;;  %4699 = vmatprep.mubr.f32.mxu0 %v2995_v30  ;;  %v5630_v2 = vadd.f32 %v5629_v29, %v5628_v14  ;;  %v3568_v30 = vld [vmem:[%s11070_s8 + $0xe88] sm:$0xff]  ;;  %v3599_v15 = vld [vmem:[%s11070_s8 + $0xf80] sm:$0xff]  ;;  %v6974_v10 = vpack.c.bf16 %v3534_v9, %v3533_v48  ;;  %v3601_v14 = vld [vmem:[%s11070_s8 + $0xf90] sm:$0xff]  ;;  %v2996_v29 = vmul.f32 %v9266_v24, %v11532_v12 }
 0x3de   : > { %4784 = vmatprep.mubr.f32.mxu1 %v2997_v8  ;;  %v5674_v57 = vadd.f32 %v5673_v52, %v5672_v11  ;;  %6927 = vmatpush3.bf16.msra.mxu0 %v6926_v59  ;;  %v3600_v59 = vld [vmem:[%s11070_s8 + $0xf88] sm:$0xff]  ;;  %v6976_v4 = vpack.c.bf16 %v3568_v30, %v3567_v19  ;;  %v3551_v8 = vld [vmem:[%s11070_s8 + $0xe00] sm:$0xff]  ;;  %v3602_v11 = vld [vmem:[%s11070_s8 + $0xf98] sm:$0xff]  ;;  %v3059_v7 = vmul.f32 %v9460_v3, %v9082_v39 }
 0x3df   : > { %6959 = vmatpush3.bf16.msra.mxu1 %v6958_v1  ;;  %6929 = vmatprep.subr.bf16.mxu0 %v6928_v58  ;;  %v6942_v1 = vpack.c.bf16 %v3502_v41, %v3501_v26  ;;  %v7008_v63 = vpack.c.bf16 %v3600_v59, %v3599_v15  ;;  %v3552_v58 = vld [vmem:[%s11070_s8 + $0xe08] sm:$0xff]  ;;  %v7016_v37 = vpack.c.bf16 %v3604_v54, %v3603_v36  ;;  %v3587_v39 = vld [vmem:[%s11070_s8 + $0xf20] sm:$0xff]  ;;  %v3606_v26 = vld [vmem:[%s11070_s8 + $0xfb8] sm:$0xff] }
 0x3e0   : > { %6961 = vmatprep.subr.bf16.mxu1 %v6960_v55  ;;  %v10555_v62 = vadd.f32 %v5674_v57, %v5630_v2  ;;  %v3583_v55 = vld [vmem:[%s11070_s8 + $0xf00] sm:$0xff]  ;;  %v6978_v52 = vpack.c.bf16 %v3552_v58, %v3551_v8  ;;  %v3553_v57 = vld [vmem:[%s11070_s8 + $0xe10] sm:$0xff]  ;;  %v3556_v50 = vld [vmem:[%s11070_s8 + $0xe28] sm:$0xff] }
 0x3e1   : > { %v7010_v2 = vpack.c.bf16 %v3584_v38, %v3583_v55  ;;  %v3588_v28 = vld [vmem:[%s11070_s8 + $0xf28] sm:$0xff]  ;;  %v11536_v41 = vld [vmem:[#allocation13_spill] sm:$0xff]  ;;  %v6986_v30 = vpack.c.bf16 %v3556_v50, %v3555_v27  ;;  %v3590_v55 = vld [vmem:[%s11070_s8 + $0xf38] sm:$0xff] }
 0x3e2   : > { %6931 = vmatpush3.bf16.msra.mxu0 %v6930_v22  ;;  %v3554_v22 = vld [vmem:[%s11070_s8 + $0xe18] sm:$0xff]  ;;  %v11538_v9 = vld [vmem:[#allocation44_spill] sm:$0xff]  ;;  %v7018_v15 = vpack.c.bf16 %v3588_v28, %v3587_v39  ;;  %v3557_v59 = vld [vmem:[%s11070_s8 + $0xe30] sm:$0xff] }
 0x3e3   : > { %6963 = vmatpush3.bf16.msra.mxu1 %v6962_v45  ;;  %6933 = vmatprep.subr.bf16.mxu0 %v6932_v44  ;;  %v11533_v45 = vld [vmem:[#allocation73_spill] sm:$0xff]  ;;  %v6980_v44 = vpack.c.bf16 %v3570_v16, %v3569_v18  ;;  %v3091_v19 = vmul.f32 %v9473_v40, %v11538_v9  ;;  %v3575_v38 = vld [vmem:[%s11070_s8 + $0xec0] sm:$0xff]  ;;  %v3576_v18 = vld [vmem:[%s11070_s8 + $0xec8] sm:$0xff] }
 0x3e4   : > { %6965 = vmatprep.subr.bf16.mxu1 %v6964_v0  ;;  %v3027_v34 = vmul.f32 %v9447_v5, %v11533_v45  ;;  %v7012_v0 = vpack.c.bf16 %v3602_v11, %v3601_v14  ;;  %v3589_v58 = vld [vmem:[%s11070_s8 + $0xf30] sm:$0xff]  ;;  %v3607_v16 = vld [vmem:[%s11070_s8 + $0xfc0] sm:$0xff]  ;;  %v3608_v14 = vld [vmem:[%s11070_s8 + $0xfc8] sm:$0xff] }
 0x3e5   : > { %v11540_v11 = vld [vmem:[#allocation43_spill] sm:$0xff]  ;;  %v3560_v45 = vld [vmem:[%s11070_s8 + $0xe48] sm:$0xff]  ;;  %v3577_v36 = vld [vmem:[%s11070_s8 + $0xed0] sm:$0xff] }
 0x3e6   : > { %6935 = vmatpush3.bf16.msra.mxu0 %v6934_v51  ;;  %v3026_v51 = vmul.f32 %v9447_v5, %v11534_v47  ;;  %v3090_v35 = vmul.f32 %v9473_v40, %v11540_v11  ;;  %v3591_v49 = vld [vmem:[%s11070_s8 + $0xf40] sm:$0xff]  ;;  %v3592_v56 = vld [vmem:[%s11070_s8 + $0xf48] sm:$0xff]  ;;  %v3561_v50 = vld [vmem:[%s11070_s8 + $0xe50] sm:$0xff] }
 0x3e7   : > { %6967 = vmatpush3.bf16.msra.mxu1 %v6966_v46  ;;  %6937 = vmatprep.subr.bf16.mxu0 %v6936_v61  ;;  %v11535_v46 = vld [vmem:[#allocation65_spill] sm:$0xff]  ;;  %v6982_v61 = vpack.c.bf16 %v3554_v22, %v3553_v57  ;;  %v7022_v57 = vpack.c.bf16 %v3590_v55, %v3589_v58  ;;  %v3559_v22 = vld [vmem:[%s11070_s8 + $0xe40] sm:$0xff]  ;;  %v7026_v27 = vpack.c.bf16 %v3592_v56, %v3591_v49  ;;  %v3564_v9 = vld [vmem:[%s11070_s8 + $0xe68] sm:$0xff] }
 0x3e8   : > { %6969 = vmatprep.subr.bf16.mxu1 %v6968_v32  ;;  %v3028_v17 = vmul.f32 %v9447_v5, %v11535_v46  ;;  %v7014_v32 = vpack.c.bf16 %v3586_v42, %v3585_v60  ;;  %v6992_v60 = vpack.c.bf16 %v3576_v18, %v3575_v38  ;;  %v7024_v42 = vpack.c.bf16 %v3608_v14, %v3607_v16  ;;  %v3609_v46 = vld [vmem:[%s11070_s8 + $0xfd0] sm:$0xff]  ;;  %v3566_v16 = vld [vmem:[%s11070_s8 + $0xe78] sm:$0xff] }
 0x3e9   : > { %v3593_v28 = vld [vmem:[%s11070_s8 + $0xf50] sm:$0xff]  ;;  %v3598_v11 = vld [vmem:[%s11070_s8 + $0xf78] sm:$0xff] }
 0x3ea   : > { %6939 = vmatpush3.bf16.msra.mxu0 %v6938_v13  ;;  %v3573_v13 = vld [vmem:[%s11070_s8 + $0xeb0] sm:$0xff]  ;;  %v11547_v56 = vld [vmem:[#allocation22_spill] sm:$0xff] }
 0x3eb   : > { %6971 = vmatpush3.bf16.msra.mxu1 %v6970_v33  ;;  %6941 = vmatprep.subr.bf16.mxu0 %v6940_v31  ;;  %v3605_v33 = vld [vmem:[%s11070_s8 + $0xfb0] sm:$0xff]  ;;  %v3058_v31 = vmul.f32 %v9460_v3, %v11536_v41  ;;  %v3612_v41 = vld [vmem:[%s11070_s8 + $0xfe8] sm:$0xff] }
 0x3ec   : > { %6973 = vmatprep.subr.bf16.mxu1 %v6972_v25  ;;  %v11537_v25 = vld [vmem:[#allocation14_spill] sm:$0xff]  ;;  %v7020_v8 = vpack.c.bf16 %v3606_v26, %v3605_v33  ;;  %v3580_v33 = vld [vmem:[%s11070_s8 + $0xee8] sm:$0xff]  ;;  %v3611_v26 = vld [vmem:[%s11070_s8 + $0xfe0] sm:$0xff] }
 0x3ed   : > { %v3060_v48 = vmul.f32 %v9460_v3, %v11537_v25  ;;  %v3565_v55 = vld [vmem:[%s11070_s8 + $0xe70] sm:$0xff] }
 0x3ee   : > { %6943 = vmatpush3.bf16.msra.mxu0 %v6942_v1  ;;  %v3558_v1 = vld [vmem:[%s11070_s8 + $0xe38] sm:$0xff]  ;;  %v3597_v14 = vld [vmem:[%s11070_s8 + $0xf70] sm:$0xff] }
 0x3ef   : > { %6975 = vmatpush3.bf16.msra.mxu1 %v6974_v10  ;;  %6977 = vmatprep.subr.bf16.mxu0 %v6976_v4  ;;  %v11539_v10 = vld [vmem:[#allocation34_spill] sm:$0xff] }
 0x3f0   : > { %7009 = vmatprep.subr.bf16.mxu1 %v7008_v63  ;;  %v3093_v4 = vmul.f32 %v9473_v40, %v11539_v10  ;;  %v6988_v63 = vpack.c.bf16 %v3574_v20, %v3573_v13  ;;  %v3594_v13 = vld [vmem:[%s11070_s8 + $0xf58] sm:$0xff]  ;;  %v3579_v20 = vld [vmem:[%s11070_s8 + $0xee0] sm:$0xff] }
 0x3f1   : > { %4700 = vmatmul.mubr.f32.vlgmr.msra.gmra.mrb[116].mxu0 %v2994_v23  ;;  %v11541_v23 = vld [vmem:[#allocation8_spill] sm:$0xff]  ;;  %v7030_v25 = vpack.c.bf16 %v3594_v13, %v3593_v28  ;;  %v3582_v10 = vld [vmem:[%s11070_s8 + $0xef8] sm:$0xff]  ;;  %v4988_v13 = vld [vmem:[%s10820_s13 + $0x20] sm:$0xff] }
 0x3f2   : > { %4785 = vmatmul.mubr.f32.vlgmr.msra.gmra.mrb[108].mxu1 %v2996_v29  ;;  %4704 = vmatprep.mubr.f32.mxu0 %v3027_v34  ;;  %v2999_v12 = vmul.f32 %v9266_v24, %v11541_v23  ;;  %v11542_v29 = vld [vmem:[#allocation33_spill] sm:$0xff]  ;;  %v5001_v23 = vld [vmem:[%s10820_s13 + $0x88] sm:$0xff] }
 0x3f3   : > { %4789 = vmatprep.mubr.f32.mxu1 %v3029_v43  ;;  %6979 = vmatpush3.bf16.msra.mxu0 %v6978_v52  ;;  %v3092_v52 = vmul.f32 %v9473_v40, %v11542_v29  ;;  %v7038_v29 = vpack.c.bf16 %v3598_v11, %v3597_v14 }
 0x3f4   : > { %7011 = vmatpush3.bf16.msra.mxu1 %v7010_v2  ;;  %6981 = vmatprep.subr.bf16.mxu0 %v6980_v44  ;;  %v6990_v2 = vpack.c.bf16 %v3558_v1, %v3557_v59  ;;  %v11543_v44 = vld [vmem:[#allocation18_spill] sm:$0xff]  ;;  %v3596_v59 = vld [vmem:[%s11070_s8 + $0xf68] sm:$0xff]  ;;  %v3581_v1 = vld [vmem:[%s11070_s8 + $0xef0] sm:$0xff] }
 0x3f5   : > { %7013 = vmatprep.subr.bf16.mxu1 %v7012_v0  ;;  %4705 = vmatmul.mubr.f32.gmra.mrb[118].mxu0 %v3026_v51  ;;  %v3001_v0 = vmul.f32 %v9266_v24, %v11543_v44  ;;  %v3578_v51 = vld [vmem:[%s11070_s8 + $0xed8] sm:$0xff]  ;;  %v7004_v38 = vpack.c.bf16 %v3582_v10, %v3581_v1  ;;  %v11545_v44 = vld [vmem:[#allocation4_spill] sm:$0xff]  ;;  %v4990_v1 = vld [vmem:[%s10820_s13 + $0x30] sm:$0xff] }
 0x3f6   : > { %4790 = vmatmul.mubr.f32.gmra.mrb[110].mxu1 %v3028_v17  ;;  %4709 = vmatprep.mubr.f32.mxu0 %v3059_v7  ;;  %v3610_v17 = vld [vmem:[%s11070_s8 + $0xfd8] sm:$0xff] }
 0x3f7   : > { %4794 = vmatprep.mubr.f32.mxu1 %v3061_v53  ;;  %6983 = vmatpush3.bf16.msra.mxu0 %v6982_v61  ;;  %v3562_v53 = vld [vmem:[%s11070_s8 + $0xe58] sm:$0xff]  ;;  %v7028_v39 = vpack.c.bf16 %v3610_v17, %v3609_v46  ;;  %v5004_v46 = vld [vmem:[%s10820_s13 + $0xa0] sm:$0xff]  ;;  %v5005_v17 = vld [vmem:[%s10820_s13 + $0xa8] sm:$0xff] }
 0x3f8   : > { %7015 = vmatpush3.bf16.msra.mxu1 %v7014_v32  ;;  %6985 = vmatprep.subr.bf16.mxu0 %v6984_v21  ;;  %v6994_v32 = vpack.c.bf16 %v3560_v45, %v3559_v22  ;;  %v5002_v22 = vld [vmem:[%s10820_s13 + $0x90] sm:$0xff]  ;;  %v5003_v45 = vld [vmem:[%s10820_s13 + $0x98] sm:$0xff]  ;;  %v7048_v28 = vpack.c.bf16 %v5005_v17, %v5004_v46 }
 0x3f9   : > { %7017 = vmatprep.subr.bf16.mxu1 %v7016_v37  ;;  %4710 = vmatmul.mubr.f32.gmra.mrb[120].mxu0 %v3058_v31  ;;  %v6996_v37 = vpack.c.bf16 %v3578_v51, %v3577_v36  ;;  %v6998_v31 = vpack.c.bf16 %v3562_v53, %v3561_v50  ;;  %v3033_v36 = vmul.f32 %v9447_v5, %v11547_v56  ;;  %v4987_v51 = vld [vmem:[%s10820_s13 + $0x18] sm:$0xff]  ;;  %v11550_v50 = vld [vmem:[#allocation32_spill] sm:$0xff]  ;;  %v4994_v56 = vld [vmem:[%s10820_s13 + $0x50] sm:$0xff] }
 0x3fa   : > { %4795 = vmatmul.mubr.f32.gmra.mrb[112].mxu1 %v3060_v48  ;;  %4714 = vmatprep.mubr.f32.mxu0 %v3091_v19  ;;  %v3563_v48 = vld [vmem:[%s11070_s8 + $0xe60] sm:$0xff]  ;;  %v7000_v19 = vpack.c.bf16 %v3580_v33, %v3579_v20  ;;  %v3063_v53 = vmul.f32 %v9460_v3, %v11550_v50  ;;  %v4989_v20 = vld [vmem:[%s10820_s13 + $0x28] sm:$0xff]  ;;  %v5006_v33 = vld [vmem:[%s10820_s13 + $0xb0] sm:$0xff] }
 0x3fb   : > { %4799 = vmatprep.mubr.f32.mxu1 %v3093_v4  ;;  %6987 = vmatpush3.bf16.msra.mxu0 %v6986_v30  ;;  %v5631_v34 = vpop.f32.mrb[72].mxu0  ;;  %v5675_v43 = vpop.f32.mrb[64].mxu1  ;;  %v7032_v30 = vpack.c.bf16 %v3612_v41, %v3611_v26  ;;  %v3613_v4 = vld [vmem:[%s11070_s8 + $0xff0] sm:$0xff]  ;;  %v5007_v26 = vld [vmem:[%s10820_s13 + $0xb8] sm:$0xff] }
 0x3fc   : > { %7019 = vmatpush3.bf16.msra.mxu1 %v7018_v15  ;;  %6989 = vmatprep.subr.bf16.mxu0 %v6988_v63  ;;  %v5632_v54 = vpop.f32.mrb[73].mxu0  ;;  %v5676_v47 = vpop.f32.mrb[65].mxu1  ;;  %v3595_v15 = vld [vmem:[%s11070_s8 + $0xf60] sm:$0xff]  ;;  %v3614_v63 = vld [vmem:[%s11070_s8 + $0xff8] sm:$0xff] }
 0x3fd   : > { %7021 = vmatprep.subr.bf16.mxu1 %v7020_v8  ;;  %4715 = vmatmul.mubr.f32.gmra.mrb[122].mxu0 %v3090_v35  ;;  %v5633_v7 = vadd.f32 %v5632_v54, %v5631_v34  ;;  %v5677_v61 = vadd.f32 %v5676_v47, %v5675_v43  ;;  %v7002_v8 = vpack.c.bf16 %v3564_v9, %v3563_v48  ;;  %v5000_v35 = vld [vmem:[%s10820_s13 + $0x80] sm:$0xff]  ;;  %v11544_v34 = vld [vmem:[#allocation62_spill] sm:$0xff]  ;;  %v4986_v47 = vld [vmem:[%s10820_s13 + $0x10] sm:$0xff] }
 0x3fe   : > { %4800 = vmatmul.mubr.f32.gmra.mrb[114].mxu1 %v3092_v52  ;;  %4869 = vmatprep.mubr.f32.mxu0 %v2999_v12  ;;  %v7034_v58 = vpack.c.bf16 %v3596_v59, %v3595_v15  ;;  %v7036_v18 = vpack.c.bf16 %v3614_v63, %v3613_v4  ;;  %v7006_v12 = vpack.c.bf16 %v3566_v16, %v3565_v55  ;;  %v11554_v9 = vld [vmem:[#allocation56_spill] sm:$0xff]  ;;  %v4991_v10 = vld [vmem:[%s10820_s13 + $0x38] sm:$0xff]  ;;  %v5008_v4 = vld [vmem:[%s10820_s13 + $0xc0] sm:$0xff] }
 0x3ff   : > { %4954 = vmatprep.mubr.f32.mxu1 %v3001_v0  ;;  %6991 = vmatpush3.bf16.msra.mxu0 %v6990_v2  ;;  %v10772_v21 = vadd.f32 %v5677_v61, %v5633_v7  ;;  %v7040_v52 = vpack.c.bf16 %v5001_v23, %v5000_v35  ;;  %v4984_v2 = vld [vmem:[%s10820_s13] sm:$0xff]  ;;  %v2998_v43 = vmul.f32 %v9266_v24, %v11544_v34  ;;  %v11549_v61 = vld [vmem:[#allocation21_spill] sm:$0xff]  ;;  %v5009_v63 = vld [vmem:[%s10820_s13 + $0xc8] sm:$0xff] }
 0x400   : > { %7023 = vmatpush3.bf16.msra.mxu1 %v7022_v57  ;;  %6993 = vmatprep.subr.bf16.mxu0 %v6992_v60  ;;  %v4985_v57 = vld [vmem:[%s10820_s13 + $0x8] sm:$0xff]  ;;  %v3000_v0 = vmul.f32 %v9266_v24, %v11545_v44  ;;  %v7044_v54 = vpack.c.bf16 %v5003_v45, %v5002_v22  ;;  %v11548_v24 = vld [vmem:[#allocation10_spill] sm:$0xff]  ;;  %v7050_v48 = vpack.c.bf16 %v4989_v20, %v4988_v13  ;;  %v11557_v16 = vld [vmem:[#allocation45_spill] sm:$0xff] }
 0x401   : > { %7025 = vmatprep.subr.bf16.mxu1 %v7024_v42  ;;  %v7042_v60 = vpack.c.bf16 %v4985_v57, %v4984_v2  ;;  %v11546_v42 = vld [vmem:[#allocation6_spill] sm:$0xff]  ;;  %v3030_v7 = vmul.f32 %v9447_v5, %v11548_v24  ;;  %v7052_v59 = vpack.c.bf16 %v5007_v26, %v5006_v33  ;;  %v3096_v14 = vmul.f32 %v9473_v40, %v11557_v16  ;;  %v5010_v2 = vld [vmem:[%s10820_s13 + $0xd0] sm:$0xff] }
 0x402   : > { %v3031_v49 = vmul.f32 %v9447_v5, %v11546_v42  ;;  %v7054_v11 = vpack.c.bf16 %v4991_v10, %v4990_v1  ;;  %v5011_v57 = vld [vmem:[%s10820_s13 + $0xd8] sm:$0xff] }
 0x403   : > { %6995 = vmatpush3.bf16.msra.mxu0 %v6994_v32  ;;  %v3032_v32 = vmul.f32 %v9447_v5, %v11549_v61  ;;  %v11552_v5 = vld [vmem:[#allocation31_spill] sm:$0xff]  ;;  %v5015_v13 = vld [vmem:[%s10820_s13 + $0xf8] sm:$0xff] }
 0x404   : > { %7027 = vmatpush3.bf16.msra.mxu1 %v7026_v27  ;;  %6997 = vmatprep.subr.bf16.mxu0 %v6996_v37  ;;  %v7046_v27 = vpack.c.bf16 %v4987_v51, %v4986_v47  ;;  %v11551_v37 = vld [vmem:[#allocation24_spill] sm:$0xff]  ;;  %v3062_v41 = vmul.f32 %v9460_v3, %v11552_v5 }
 0x405   : > { %7029 = vmatprep.subr.bf16.mxu1 %v7028_v39  ;;  %v3065_v39 = vmul.f32 %v9460_v3, %v11551_v37  ;;  %v5013_v47 = vld [vmem:[%s10820_s13 + $0xe8] sm:$0xff]  ;;  %v4996_v37 = vld [vmem:[%s10820_s13 + $0x60] sm:$0xff] }
 0x407   : > { %6999 = vmatpush3.bf16.msra.mxu0 %v6998_v31  ;;  %v11553_v31 = vld [vmem:[#allocation23_spill] sm:$0xff] }
 0x408   : > { %7031 = vmatpush3.bf16.msra.mxu1 %v7030_v25  ;;  %7001 = vmatprep.subr.bf16.mxu0 %v7000_v19  ;;  %v3064_v25 = vmul.f32 %v9460_v3, %v11553_v31  ;;  %v3095_v19 = vmul.f32 %v9473_v40, %v11554_v9 }
 0x409   : > { %7033 = vmatprep.subr.bf16.mxu1 %v7032_v30  ;;  %v11555_v30 = vld [vmem:[#allocation46_spill] sm:$0xff] }
 0x40a   : > { %v3097_v15 = vmul.f32 %v9473_v40, %v11555_v30  ;;  %v4999_v30 = vld [vmem:[%s10820_s13 + $0x78] sm:$0xff] }
 0x40b   : > { %7003 = vmatpush3.bf16.msra.mxu0 %v7002_v8 }
 0x40c   : > { %7035 = vmatpush3.bf16.msra.mxu1 %v7034_v58  ;;  %7005 = vmatprep.subr.bf16.mxu0 %v7004_v38  ;;  %v11556_v38 = vld [vmem:[#allocation55_spill] sm:$0xff] }
 0x40d   : > { %7037 = vmatprep.subr.bf16.mxu1 %v7036_v18  ;;  %v3094_v18 = vmul.f32 %v9473_v40, %v11556_v38 }
 0x40f   : > { %7007 = vmatpush3.bf16.msra.mxu0 %v7006_v12  ;;  %v7056_v12 = vpack.c.bf16 %v5009_v63, %v5008_v4 }
 0x410   : > { %7039 = vmatpush3.bf16.msra.mxu1 %v7038_v29  ;;  %7041 = vmatprep.subr.bf16.mxu0 %v7040_v52  ;;  %v4992_v29 = vld [vmem:[%s10820_s13 + $0x40] sm:$0xff]  ;;  %v4993_v52 = vld [vmem:[%s10820_s13 + $0x48] sm:$0xff] }
 0x411   : > { %v7058_v40 = vpack.c.bf16 %v4993_v52, %v4992_v29 }
 0x412   : > { %4870 = vmatmul.mubr.f32.vlgmr.msra.gmra.mrb[124].mxu0 %v2998_v43  ;;  %v7404_v43 = vmov 0.00390625  }
 0x413   : > { %4955 = vmatmul.mubr.f32.vlgmr.msra.gmra.mrb[116].mxu1 %v3000_v0  ;;  %4874 = vmatprep.mubr.f32.mxu0 %v3031_v49  ;;  %v7060_v49 = vpack.c.bf16 %v5011_v57, %v5010_v2 }
 0x414   : > { %4959 = vmatprep.mubr.f32.mxu1 %v3033_v36  ;;  %7043 = vmatpush3.bf16.msra.mxu0 %v7042_v60  ;;  %v4995_v36 = vld [vmem:[%s10820_s13 + $0x58] sm:$0xff] }
 0x415   : > { %7045 = vmatprep.subr.bf16.mxu0 %v7044_v54  ;;  %v5012_v54 = vld [vmem:[%s10820_s13 + $0xe0] sm:$0xff]  ;;  %v7062_v24 = vpack.c.bf16 %v4995_v36, %v4994_v56 }
 0x416   : > { %4875 = vmatmul.mubr.f32.gmra.mrb[126].mxu0 %v3030_v7 }
 0x417   : > { %4960 = vmatmul.mubr.f32.gmra.mrb[118].mxu1 %v3032_v32  ;;  %4879 = vmatprep.mubr.f32.mxu0 %v3063_v53  ;;  %v7064_v53 = vpack.c.bf16 %v5013_v47, %v5012_v54 }
 0x418   : > { %4964 = vmatprep.mubr.f32.mxu1 %v3065_v39  ;;  %7047 = vmatpush3.bf16.msra.mxu0 %v7046_v27  ;;  %v4997_v39 = vld [vmem:[%s10820_s13 + $0x68] sm:$0xff] }
 0x419   : > { %7049 = vmatprep.subr.bf16.mxu0 %v7048_v28  ;;  %v5014_v28 = vld [vmem:[%s10820_s13 + $0xf0] sm:$0xff]  ;;  %v7066_v26 = vpack.c.bf16 %v4997_v39, %v4996_v37 }
 0x41a   : > { %4880 = vmatmul.mubr.f32.gmra.mrb[128].mxu0 %v3062_v41  ;;  %v7068_v9 = vpack.c.bf16 %v5015_v13, %v5014_v28 }
 0x41b   : > { %4965 = vmatmul.mubr.f32.gmra.mrb[120].mxu1 %v3064_v25  ;;  %v5634_v8 = vpop.f32.mrb[74].mxu0  ;;  %v5678_v58 = vpop.f32.mrb[66].mxu1  ;;  %4884 = vmatprep.mubr.f32.mxu0 %v3095_v19  ;;  %v4998_v19 = vld [vmem:[%s10820_s13 + $0x70] sm:$0xff] }
 0x41c   : > { %4969 = vmatprep.mubr.f32.mxu1 %v3097_v15  ;;  %v5635_v3 = vpop.f32.mrb[75].mxu0  ;;  %v5679_v55 = vpop.f32.mrb[67].mxu1  ;;  %7051 = vmatpush3.bf16.msra.mxu0 %v7050_v48  ;;  %v7070_v10 = vpack.c.bf16 %v4999_v30, %v4998_v19 }
 0x41d   : > { %v5636_v35 = vadd.f32 %v5635_v3, %v5634_v8  ;;  %v5680_v23 = vadd.f32 %v5679_v55, %v5678_v58  ;;  %7053 = vmatprep.subr.bf16.mxu0 %v7052_v59 }
 0x41e   : > { %4885 = vmatmul.mubr.f32.gmra.mrb[130].mxu0 %v3094_v18 }
 0x41f   : > { %4970 = vmatmul.mubr.f32.gmra.mrb[122].mxu1 %v3096_v14  ;;  %v3782_v22 = vadd.f32 %v5680_v23, %v5636_v35  ;;  %v5713_v45 = vpop.f32.mrb[76].mxu0  ;;  %v5757_v34 = vpop.f32.mrb[68].mxu1  ;;  %5080 = vmatprep.mubr.f32.mxu0 %v7404_v43 }
 0x420   : > { %7055 = vmatpush3.bf16.msra.mxu0 %v7054_v11  ;;  %v5714_v44 = vpop.f32.mrb[77].mxu0  ;;  %v5758_v0 = vpop.f32.mrb[69].mxu1 }
 0x421   : > { %7057 = vmatprep.subr.bf16.mxu0 %v7056_v12  ;;  %v5715_v60 = vadd.f32 %v5714_v44, %v5713_v45  ;;  %v5759_v42 = vadd.f32 %v5758_v0, %v5757_v34 }
 0x423   : > { %v3852_v51 = vadd.f32 %v5715_v60, %v10338_v6  ;;  %v5716_v46 = vpop.f32.mrb[78].mxu0  ;;  %v5760_v17 = vpop.f32.mrb[70].mxu1 }
 0x424   : > { %7059 = vmatpush3.bf16.msra.mxu0 %v7058_v40  ;;  %v5717_v7 = vpop.f32.mrb[79].mxu0  ;;  %v5761_v61 = vpop.f32.mrb[71].mxu1 }
 0x425   : > { %v3937_v32 = vadd.f32 %v5759_v42, %v3852_v51  ;;  %7061 = vmatprep.subr.bf16.mxu0 %v7060_v49  ;;  %v5718_v27 = vadd.f32 %v5717_v7, %v5716_v46  ;;  %v5762_v50 = vadd.f32 %v5761_v61, %v5760_v17 }
 0x427   : > { %v3857_v20 = vadd.f32 %v5718_v27, %v10555_v62  ;;  %v5719_v6 = vpop.f32.mrb[80].mxu0 }
 0x428   : > { %v5763_v33 = vpop.f32.mrb[72].mxu1  ;;  %7063 = vmatpush3.bf16.msra.mxu0 %v7062_v24  ;;  %v5720_v5 = vpop.f32.mrb[81].mxu0 }
 0x429   : > { %v5764_v41 = vpop.f32.mrb[73].mxu1  ;;  %v3942_v31 = vadd.f32 %v5762_v50, %v3857_v20  ;;  %7065 = vmatprep.subr.bf16.mxu0 %v7064_v53  ;;  %v5721_v25 = vadd.f32 %v5720_v5, %v5719_v6 }
 0x42a   : > { %v5765_v48 = vadd.f32 %v5764_v41, %v5763_v33 }
 0x42b   : > { %v3862_v15 = vadd.f32 %v5721_v25, %v10772_v21  ;;  %v5722_v59 = vpop.f32.mrb[82].mxu0 }
 0x42c   : > { %v5766_v1 = vpop.f32.mrb[74].mxu1  ;;  %7067 = vmatpush3.bf16.msra.mxu0 %v7066_v26  ;;  %v5723_v62 = vpop.f32.mrb[83].mxu0 }
 0x42d   : > { %v5767_v4 = vpop.f32.mrb[75].mxu1  ;;  %v3947_v63 = vadd.f32 %v5765_v48, %v3862_v15  ;;  %7069 = vmatprep.subr.bf16.mxu0 %v7068_v9  ;;  %v5724_v8 = vadd.f32 %v5723_v62, %v5722_v59 }
 0x42e   : > { %v5768_v58 = vadd.f32 %v5767_v4, %v5766_v1 }
 0x42f   : > { %v3867_v3 = vadd.f32 %v5724_v8, %v3782_v22 }
 0x430   : > { %7071 = vmatpush3.bf16.msra.mxu0 %v7070_v10 }
 0x431   : > { %v3952_v55 = vadd.f32 %v5768_v58, %v3867_v3 }
 0x433   : > { %5081 = vmatmul.mubr.f32.vlgmr.msra.gmra.mrb[132].mxu0 %v7404_v43 }
 0x440   : > { %v5801_v38 = vpop.f32.mrb[84].mxu0 }
 0x441   : > { %v5845_v18 = vpop.f32.mrb[76].mxu1  ;;  %v5802_v16 = vpop.f32.mrb[85].mxu0 }
 0x442   : > { %v5846_v14 = vpop.f32.mrb[77].mxu1  ;;  %v5803_v11 = vadd.f32 %v5802_v16, %v5801_v38  ;;  %v5086_v38 = vld [vmem:[%s11065_s3] sm:$0xff]  ;;  %v5088_v16 = vld [vmem:[%s11065_s3 + $0x10] sm:$0xff] }
 0x443   : > { %v5847_v21 = vadd.f32 %v5846_v14, %v5845_v18  ;;  %v5087_v18 = vld [vmem:[%s11065_s3 + $0x8] sm:$0xff]  ;;  %v7405_v14 = vmov 0.0|0.0  }
 0x444   : > { %v4022_v35 = vadd.f32 %v5803_v11, %v3937_v32  ;;  %v5804_v23 = vpop.f32.mrb[86].mxu0  ;;  %7072 = vmatprep.subr.bf16.mxu1 %v7405_v14  ;;  %v7073_v11 = vpack.c.bf16 %v5087_v18, %v5086_v38 }
 0x445   : > { %v5848_v12 = vpop.f32.mrb[78].mxu1  ;;  %v5805_v29 = vpop.f32.mrb[87].mxu0 }
 0x446   : > { %v5849_v52 = vpop.f32.mrb[79].mxu1  ;;  %v4107_v2 = vadd.f32 %v5847_v21, %v4022_v35  ;;  %v5806_v57 = vadd.f32 %v5805_v29, %v5804_v23  ;;  %v5089_v21 = vld [vmem:[%s11065_s3 + $0x18] sm:$0xff]  ;;  %7074 = vmatpush3.bf16.msra.mxu1 %v7073_v11 }
 0x447   : > { %v5850_v45 = vadd.f32 %v5849_v52, %v5848_v12  ;;  %v7076_v35 = vpack.c.bf16 %v5089_v21, %v5088_v16  ;;  %7075 = vmatprep.subr.bf16.mxu1 %v7405_v14 }
 0x448   : > { %v4027_v34 = vadd.f32 %v5806_v57, %v3942_v31  ;;  %v5807_v40 = vpop.f32.mrb[88].mxu0 }
 0x449   : > { %v5851_v22 = vpop.f32.mrb[80].mxu1  ;;  %v5808_v44 = vpop.f32.mrb[89].mxu0 }
 0x44a   : > { %v5852_v0 = vpop.f32.mrb[81].mxu1  ;;  %v4112_v43 = vadd.f32 %v5850_v45, %v4027_v34  ;;  %v5809_v60 = vadd.f32 %v5808_v44, %v5807_v40  ;;  %7077 = vmatpush3.bf16.msra.mxu1 %v7076_v35 }
 0x44b   : > { %v5853_v42 = vadd.f32 %v5852_v0, %v5851_v22  ;;  %7078 = vmatprep.subr.bf16.mxu1 %v7405_v14 }
 0x44c   : > { %v4032_v49 = vadd.f32 %v5809_v60, %v3947_v63  ;;  %v5810_v56 = vpop.f32.mrb[90].mxu0 }
 0x44d   : > { %v5854_v36 = vpop.f32.mrb[82].mxu1  ;;  %v5811_v54 = vpop.f32.mrb[91].mxu0 }
 0x44e   : > { %v5855_v47 = vpop.f32.mrb[83].mxu1  ;;  %v4117_v51 = vadd.f32 %v5853_v42, %v4032_v49  ;;  %v5812_v46 = vadd.f32 %v5811_v54, %v5810_v56  ;;  %v10913_v42 = vld [vmem:[%s7482_s18 + $0x20] sm:$0xff] }
 0x44f   : > { %v5856_v17 = vadd.f32 %v5855_v47, %v5854_v36  ;;  %6362 = vmatprep.mubr.msk.f32.mxu1 %vm7406_vm2, %v10913_v42 }
 0x450   : > { %v4037_v24 = vadd.f32 %v5812_v46, %v3952_v55 }
 0x452   : > { %v4122_v7 = vadd.f32 %v5856_v17, %v4037_v24 }
 0x461   : > { %v5889_v61 = vpop.f32.mrb[92].mxu0 }
 0x462   : > { %v5933_v32 = vpop.f32.mrb[84].mxu1  ;;  %v5890_v27 = vpop.f32.mrb[93].mxu0 }
 0x463   : > { %v5934_v50 = vpop.f32.mrb[85].mxu1  ;;  %v5891_v53 = vadd.f32 %v5890_v27, %v5889_v61 }
 0x464   : > { %v5935_v37 = vadd.f32 %v5934_v50, %v5933_v32 }
 0x465   : > { %v4192_v39 = vadd.f32 %v5891_v53, %v4107_v2  ;;  %v5892_v28 = vpop.f32.mrb[94].mxu0 }
 0x466   : > { %v5936_v13 = vpop.f32.mrb[86].mxu1  ;;  %v5893_v20 = vpop.f32.mrb[95].mxu0 }
 0x467   : > { %v5937_v6 = vpop.f32.mrb[87].mxu1  ;;  %v4277_v33 = vadd.f32 %v5935_v37, %v4192_v39  ;;  %v5894_v26 = vadd.f32 %v5893_v20, %v5892_v28 }
 0x468   : > { %v5938_v5 = vadd.f32 %v5937_v6, %v5936_v13 }
 0x469   : > { %v4197_v41 = vadd.f32 %v5894_v26, %v4112_v43  ;;  %v5895_v31 = vpop.f32.mrb[96].mxu0 }
 0x46a   : > { %v5939_v25 = vpop.f32.mrb[88].mxu1  ;;  %v5896_v48 = vpop.f32.mrb[97].mxu0 }
 0x46b   : > { %v5940_v9 = vpop.f32.mrb[89].mxu1  ;;  %v4282_v19 = vadd.f32 %v5938_v5, %v4197_v41  ;;  %v5897_v30 = vadd.f32 %v5896_v48, %v5895_v31 }
 0x46c   : > { %v5941_v15 = vadd.f32 %v5940_v9, %v5939_v25 }
 0x46d   : > { %v4202_v59 = vadd.f32 %v5897_v30, %v4117_v51  ;;  %v5898_v1 = vpop.f32.mrb[98].mxu0 }
 0x46e   : > { %v5942_v10 = vpop.f32.mrb[90].mxu1  ;;  %v5899_v62 = vpop.f32.mrb[99].mxu0 }
 0x46f   : > { %v5943_v4 = vpop.f32.mrb[91].mxu1  ;;  %v4287_v63 = vadd.f32 %v5941_v15, %v4202_v59  ;;  %v5900_v8 = vadd.f32 %v5899_v62, %v5898_v1 }
 0x470   : > { %v5944_v58 = vadd.f32 %v5943_v4, %v5942_v10 }
 0x471   : > { %v4207_v3 = vadd.f32 %v5900_v8, %v4122_v7 }
 0x473   : > { %v4292_v55 = vadd.f32 %v5944_v58, %v4207_v3 }
 0x482   : > { %v5977_v23 = vpop.f32.mrb[100].mxu0 }
 0x483   : > { %v6021_v12 = vpop.f32.mrb[92].mxu1  ;;  %v5978_v29 = vpop.f32.mrb[101].mxu0 }
 0x484   : > { %v6022_v52 = vpop.f32.mrb[93].mxu1  ;;  %v5979_v2 = vadd.f32 %v5978_v29, %v5977_v23 }
 0x485   : > { %v6023_v57 = vadd.f32 %v6022_v52, %v6021_v12 }
 0x486   : > { %v4362_v45 = vadd.f32 %v5979_v2, %v4277_v33  ;;  %v5980_v34 = vpop.f32.mrb[102].mxu0 }
 0x487   : > { %v6024_v40 = vpop.f32.mrb[94].mxu1  ;;  %v5981_v22 = vpop.f32.mrb[103].mxu0 }
 0x488   : > { %v6025_v44 = vpop.f32.mrb[95].mxu1  ;;  %v4447_v0 = vadd.f32 %v6023_v57, %v4362_v45  ;;  %v5982_v43 = vadd.f32 %v5981_v22, %v5980_v34 }
 0x489   : > { %v6026_v60 = vadd.f32 %v6025_v44, %v6024_v40 }
 0x48a   : > { %v4367_v49 = vadd.f32 %v5982_v43, %v4282_v19  ;;  %v5983_v56 = vpop.f32.mrb[104].mxu0 }
 0x48b   : > { %v6027_v36 = vpop.f32.mrb[96].mxu1  ;;  %v5984_v54 = vpop.f32.mrb[105].mxu0 }
 0x48c   : > { %v6028_v47 = vpop.f32.mrb[97].mxu1  ;;  %v4452_v51 = vadd.f32 %v6026_v60, %v4367_v49  ;;  %v5985_v46 = vadd.f32 %v5984_v54, %v5983_v56 }
 0x48d   : > { %v6029_v17 = vadd.f32 %v6028_v47, %v6027_v36 }
 0x48e   : > { %v4372_v24 = vadd.f32 %v5985_v46, %v4287_v63  ;;  %v5986_v7 = vpop.f32.mrb[106].mxu0 }
 0x48f   : > { %v6030_v61 = vpop.f32.mrb[98].mxu1  ;;  %v5987_v32 = vpop.f32.mrb[107].mxu0 }
 0x490   : > { %v6031_v27 = vpop.f32.mrb[99].mxu1  ;;  %v4457_v50 = vadd.f32 %v6029_v17, %v4372_v24  ;;  %v5988_v53 = vadd.f32 %v5987_v32, %v5986_v7 }
 0x491   : > { %v6032_v37 = vadd.f32 %v6031_v27, %v6030_v61 }
 0x492   : > { %v4377_v39 = vadd.f32 %v5988_v53, %v4292_v55 }
 0x494   : > { %v4462_v28 = vadd.f32 %v6032_v37, %v4377_v39 }
 0x4a3   : > { %v6065_v13 = vpop.f32.mrb[108].mxu0 }
 0x4a4   : > { %v6109_v20 = vpop.f32.mrb[100].mxu1  ;;  %v6066_v6 = vpop.f32.mrb[109].mxu0 }
 0x4a5   : > { %v6110_v33 = vpop.f32.mrb[101].mxu1  ;;  %v6067_v26 = vadd.f32 %v6066_v6, %v6065_v13 }
 0x4a6   : > { %v6111_v5 = vadd.f32 %v6110_v33, %v6109_v20 }
 0x4a7   : > { %v4532_v41 = vadd.f32 %v6067_v26, %v4447_v0  ;;  %v6068_v31 = vpop.f32.mrb[110].mxu0 }
 0x4a8   : > { %v6112_v25 = vpop.f32.mrb[102].mxu1  ;;  %v6069_v48 = vpop.f32.mrb[111].mxu0 }
 0x4a9   : > { %v6113_v9 = vpop.f32.mrb[103].mxu1  ;;  %v4617_v19 = vadd.f32 %v6111_v5, %v4532_v41  ;;  %v6070_v30 = vadd.f32 %v6069_v48, %v6068_v31  ;;  %v5275_v41 = vlaneseq }
 0x4aa   : > { %v6114_v15 = vadd.f32 %v6113_v9, %v6112_v25 }
 0x4ab   : > { %v4537_v59 = vadd.f32 %v6070_v30, %v4452_v51  ;;  %v6071_v1 = vpop.f32.mrb[112].mxu0 }
 0x4ac   : > { %v6115_v10 = vpop.f32.mrb[104].mxu1  ;;  %v6072_v62 = vpop.f32.mrb[113].mxu0 }
 0x4ad   : > { %v6116_v4 = vpop.f32.mrb[105].mxu1  ;;  %v4622_v63 = vadd.f32 %v6114_v15, %v4537_v59  ;;  %v6073_v8 = vadd.f32 %v6072_v62, %v6071_v1  ;;  %v5276_v59 = vshrl.u32 %v5275_v41, 7  ;;  %v5179_v41 = vld [vmem:[%s11067_s5 + $0x70] sm:$0xff] }
 0x4ae   : > { %v6117_v58 = vadd.f32 %v6116_v4, %v6115_v10 }
 0x4af   : > { %v4542_v3 = vadd.f32 %v6073_v8, %v4457_v50  ;;  %v6074_v55 = vpop.f32.mrb[114].mxu0 }
 0x4b0   : > { %v6118_v38 = vpop.f32.mrb[106].mxu1  ;;  %v6075_v18 = vpop.f32.mrb[115].mxu0 }
 0x4b1   : > { %v6119_v16 = vpop.f32.mrb[107].mxu1  ;;  %v4627_v11 = vadd.f32 %v6117_v58, %v4542_v3  ;;  %v6076_v21 = vadd.f32 %v6075_v18, %v6074_v55 }
 0x4b2   : > { %v6120_v35 = vadd.f32 %v6119_v16, %v6118_v38  ;;  %v10919_v38 = vsub.s32 0, %v5276_v59  ;;  %v5252_v59 = vld [vmem:[%s11069_s7] sm:$0x1] }
 0x4b3   : > { %v4547_v23 = vadd.f32 %v6076_v21, %v4462_v28 }
 0x4b5   : > { %v4632_v12 = vadd.f32 %v6120_v35, %v4547_v23 }
 0x4c4   : > { %v6153_v29 = vpop.f32.mrb[116].mxu0 }
 0x4c5   : > { %v6197_v52 = vpop.f32.mrb[108].mxu1  ;;  %v6154_v2 = vpop.f32.mrb[117].mxu0 }
 0x4c6   : > { %v6198_v57 = vpop.f32.mrb[109].mxu1  ;;  %v6155_v45 = vadd.f32 %v6154_v2, %v6153_v29 }
 0x4c7   : > { %v6199_v34 = vadd.f32 %v6198_v57, %v6197_v52 }
 0x4c8   : > { %v4702_v40 = vadd.f32 %v6155_v45, %v4617_v19  ;;  %v6156_v22 = vpop.f32.mrb[118].mxu0 }
 0x4c9   : > { %v6200_v44 = vpop.f32.mrb[110].mxu1  ;;  %v6157_v0 = vpop.f32.mrb[119].mxu0 }
 0x4ca   : > { %v6201_v43 = vpop.f32.mrb[111].mxu1  ;;  %v4787_v60 = vadd.f32 %v6199_v34, %v4702_v40  ;;  %v6158_v49 = vadd.f32 %v6157_v0, %v6156_v22 }
 0x4cb   : > { %v6202_v56 = vadd.f32 %v6201_v43, %v6200_v44 }
 0x4cc   : > { %v4707_v36 = vadd.f32 %v6158_v49, %v4622_v63  ;;  %v6159_v54 = vpop.f32.mrb[120].mxu0 }
 0x4cd   : > { %v6203_v47 = vpop.f32.mrb[112].mxu1  ;;  %v6160_v51 = vpop.f32.mrb[121].mxu0 }
 0x4ce   : > { %v6204_v46 = vpop.f32.mrb[113].mxu1  ;;  %v4792_v17 = vadd.f32 %v6202_v56, %v4707_v36  ;;  %v6161_v24 = vadd.f32 %v6160_v51, %v6159_v54  ;;  %v5165_v56 = vld [vmem:[%s11067_s5] sm:$0xff]  ;;  %v5166_v36 = vld [vmem:[%s11067_s5 + $0x8] sm:$0xff] }
 0x4cf   : > { %v6205_v7 = vadd.f32 %v6204_v46, %v6203_v47  ;;  %v7079_v51 = vpack.c.bf16 %v5166_v36, %v5165_v56 }
 0x4d0   : > { %v4712_v61 = vadd.f32 %v6161_v24, %v4627_v11  ;;  %v6162_v32 = vpop.f32.mrb[122].mxu0  ;;  %v5168_v24 = vld [vmem:[%s11067_s5 + $0x18] sm:$0xff] }
 0x4d1   : > { %v6206_v27 = vpop.f32.mrb[114].mxu1  ;;  %v6163_v50 = vpop.f32.mrb[123].mxu0 }
 0x4d2   : > { %v6207_v53 = vpop.f32.mrb[115].mxu1  ;;  %v4797_v37 = vadd.f32 %v6205_v7, %v4712_v61  ;;  %v6164_v39 = vadd.f32 %v6163_v50, %v6162_v32  ;;  %v5169_v61 = vld [vmem:[%s11067_s5 + $0x20] sm:$0xff]  ;;  %v5170_v32 = vld [vmem:[%s11067_s5 + $0x28] sm:$0xff]  ;;  %v5171_v50 = vld [vmem:[%s11067_s5 + $0x30] sm:$0xff] }
 0x4d3   : > { %v6208_v28 = vadd.f32 %v6207_v53, %v6206_v27  ;;  %v7085_v27 = vpack.c.bf16 %v5170_v32, %v5169_v61 }
 0x4d4   : > { %v4717_v13 = vadd.f32 %v6164_v39, %v4632_v12  ;;  %v5174_v39 = vld [vmem:[%s11067_s5 + $0x48] sm:$0xff] }
 0x4d6   : > { %v4802_v20 = vadd.f32 %v6208_v28, %v4717_v13  ;;  %v5175_v13 = vld [vmem:[%s11067_s5 + $0x50] sm:$0xff] }
 0x4e5   : > { %v6241_v6 = vpop.f32.mrb[124].mxu0 }
 0x4e6   : > { %v6285_v33 = vpop.f32.mrb[116].mxu1  ;;  %v6242_v26 = vpop.f32.mrb[125].mxu0 }
 0x4e7   : > { %v6286_v5 = vpop.f32.mrb[117].mxu1  ;;  %v6243_v31 = vadd.f32 %v6242_v26, %v6241_v6  ;;  %v5178_v26 = vld [vmem:[%s11067_s5 + $0x68] sm:$0xff] }
 0x4e8   : > { %v6287_v25 = vadd.f32 %v6286_v5, %v6285_v33  ;;  %v5177_v33 = vld [vmem:[%s11067_s5 + $0x60] sm:$0xff] }
 0x4e9   : > { %v4872_v48 = vadd.f32 %v6243_v31, %v4787_v60  ;;  %v6244_v9 = vpop.f32.mrb[126].mxu0  ;;  %v7097_v5 = vpack.c.bf16 %v5178_v26, %v5177_v33  ;;  %v5180_v31 = vld [vmem:[%s11067_s5 + $0x78] sm:$0xff] }
 0x4ea   : > { %v6288_v19 = vpop.f32.mrb[118].mxu1  ;;  %v6245_v30 = vpop.f32.mrb[127].mxu0 }
 0x4eb   : > { %v6289_v15 = vpop.f32.mrb[119].mxu1  ;;  %v4957_v1 = vadd.f32 %v6287_v25, %v4872_v48  ;;  %v6246_v10 = vadd.f32 %v6245_v30, %v6244_v9  ;;  %v7100_v25 = vpack.c.bf16 %v5180_v31, %v5179_v41  ;;  %v5090_v48 = vld [vmem:[%s11066_s4] sm:$0x1] }
 0x4ec   : > { %v6290_v62 = vadd.f32 %v6289_v15, %v6288_v19 }
 0x4ed   : > { %v10917_v4 = vadd.f32 -0.5, %v4957_v1  ;;  %v4877_v63 = vadd.f32 %v6246_v10, %v4792_v17  ;;  %v6247_v8 = vpop.f32.mrb[128].mxu0  ;;  %v5167_v17 = vld [vmem:[%s11067_s5 + $0x10] sm:$0xff] }
 0x4ee   : > { %v6291_v58 = vpop.f32.mrb[120].mxu1  ;;  %v6248_v3 = vpop.f32.mrb[129].mxu0  ;;  %v7082_v7 = vpack.c.bf16 %v5168_v24, %v5167_v17 }
 0x4ef   : > { %v6292_v55 = vpop.f32.mrb[121].mxu1  ;;  %v4962_v18 = vadd.f32 %v6290_v62, %v4877_v63  ;;  %v6249_v16 = vadd.f32 %v6248_v3, %v6247_v8  ;;  %4980 = vst.msk [vmem:[%s7482_s18] sm:$0xff] %vm4979_vm3, %v10917_v4  ;;  %v10928_v2 = vrot.slane %v10917_v4, %v10919_v38 }
 0x4f0   : > { %v6293_v11 = vadd.f32 %v6292_v55, %v6291_v58  ;;  %v7407_v55 = vmov 2  }
 0x4f1   : > { %v10924_v21 = vadd.f32 -0.5, %v4962_v18  ;;  %v4882_v35 = vadd.f32 %v6249_v16, %v4797_v37  ;;  %v6250_v23 = vpop.f32.mrb[130].mxu0  ;;  %v5173_v37 = vld [vmem:[%s11067_s5 + $0x40] sm:$0xff]  ;;  %7123 = vset.pattern.permute.xlu0 %v7407_v55  ;;  %7122 = vset.pattern.permute.xlu1 %v7407_v55 }
 0x4f2   : > { %v6294_v12 = vpop.f32.mrb[122].mxu1  ;;  %v6251_v29 = vpop.f32.mrb[131].mxu0  ;;  %v7091_v28 = vpack.c.bf16 %v5174_v39, %v5173_v37 }
 0x4f3   : > { %v6295_v52 = vpop.f32.mrb[123].mxu1  ;;  %v4967_v57 = vadd.f32 %v6293_v11, %v4882_v35  ;;  %v6252_v45 = vadd.f32 %v6251_v29, %v6250_v23  ;;  %4981 = vst.msk [vmem:[%s7482_s18 + $0x8] sm:$0xff] %vm4979_vm3, %v10924_v21  ;;  %v5349_v40 = vsub.f32 %v10924_v21, %v10928_v2  ;;  %v5271_v29 = vmul.f32 2.0, %v10917_v4 }
 0x4f4   : > { %v6296_v34 = vadd.f32 %v6295_v52, %v6294_v12  ;;  %v5268_v61 = vmul.f32 0.256, %v10924_v21 }
 0x4f5   : > { %v10935_v22 = vadd.f32 -0.5, %v4967_v57  ;;  %v4887_v44 = vadd.f32 %v6252_v45, %v4802_v20  ;;  %v5176_v20 = vld [vmem:[%s11067_s5 + $0x58] sm:$0xff] }
 0x4f6   : > { %v7094_v6 = vpack.c.bf16 %v5176_v20, %v5175_v13 }
 0x4f7   : > { %v4972_v0 = vadd.f32 %v6296_v34, %v4887_v44  ;;  %v5350_v43 = vsub.f32 %v10935_v22, %v10928_v2  ;;  %4982 = vst.msk [vmem:[%s7482_s18 + $0x10] sm:$0xff] %vm4979_vm3, %v10935_v22  ;;  %v5272_v44 = vmul.f32 2.0, %v10924_v21  ;;  %v5273_v56 = vmul.f32 2.0, %v10935_v22 }
 0x4f8   : > { %v5269_v39 = vmul.f32 0.256, %v10935_v22 }
 0x4f9   : > { %v10942_v60 = vadd.f32 -0.5, %v4972_v0 }
 0x4fb   : > { %v5351_v49 = vsub.f32 %v10942_v60, %v10928_v2  ;;  %4983 = vst.msk [vmem:[%s7482_s18 + $0x18] sm:$0xff] %vm4979_vm3, %v10942_v60  ;;  %v5274_v52 = vmul.f32 2.0, %v10942_v60 }
 0x506   : > { %v6329_v54 = vpop.f32.mrb[132].mxu0 }
 0x507   : > { %v6330_v47 = vpop.f32.mrb[133].mxu0 }
 0x508   : > { %v6331_v46 = vadd.f32 %v6330_v47, %v6329_v54  ;;  %v5348_v54 = vsub.f32 %v10917_v4, %v10928_v2  ;;  %v5267_v47 = vmul.f32 0.256, %v10917_v4 }
 0x50a   : > { %6363 = vmatmul.mubr.msk.f32.vlgmr.msra.gmra.mrb[124].mxu1 %vm370_vm0, %v6331_v46 }
 0x50b   : > { %7080 = vmatpush3.bf16.msra.mxu1 %v7079_v51  ;;  %6397 = vmatprep.mubr.msk.f32.mxu1 %vm7406_vm2, %v10913_v42  ;;  %v5172_v42 = vld [vmem:[%s11067_s5 + $0x38] sm:$0xff]  ;;  %v5270_v51 = vmul.f32 0.256, %v10942_v60 }
 0x50c   : > { %7081 = vmatprep.subr.bf16.mxu1 %v7405_v14  ;;  %v7088_v53 = vpack.c.bf16 %v5172_v42, %v5171_v50 }
 0x50f   : > { %7083 = vmatpush3.bf16.msra.mxu1 %v7082_v7 }
 0x510   : > { %7084 = vmatprep.subr.bf16.mxu1 %v7405_v14 }
 0x513   : > { %7086 = vmatpush3.bf16.msra.mxu1 %v7085_v27 }
 0x514   : > { %7087 = vmatprep.subr.bf16.mxu1 %v7405_v14 }
 0x517   : > { %7089 = vmatpush3.bf16.msra.mxu1 %v7088_v53 }
 0x518   : > { %7090 = vmatprep.subr.bf16.mxu1 %v7405_v14 }
 0x51b   : > { %7092 = vmatpush3.bf16.msra.mxu1 %v7091_v28 }
 0x51c   : > { %7093 = vmatprep.subr.bf16.mxu1 %v7405_v14 }
 0x51f   : > { %7095 = vmatpush3.bf16.msra.mxu1 %v7094_v6 }
 0x520   : > { %7096 = vmatprep.subr.bf16.mxu1 %v7405_v14 }
 0x523   : > { %7098 = vmatpush3.bf16.msra.mxu1 %v7097_v5 }
 0x524   : > { %7099 = vmatprep.subr.bf16.mxu1 %v7405_v14  ;;  %v5181_v14 = vld [vmem:[%s11068_s6] sm:$0x1] }
 0x527   : > { %7101 = vmatpush3.bf16.msra.mxu1 %v7100_v25 }
 0x5dd   : > { %v5160_v9 = vpop.f32.mrb[124].mxu1 }
 0x5de   : > { %v5161_v19 = vadd.f32 %v5160_v9, %v5090_v48  ;;  %v6364_v30 = vpop.f32.mrb[125].mxu1 }
 0x5e0   : > { %5164 = vst [vmem:[%s7482_s18 + $0x24] sm:$0x1] %v5161_v19  ;;  %6398 = vmatmul.mubr.f32.vlgmr.msra.gmra.mrb[126].mxu1 %v5161_v19 }
 0x6b3   : > { %v5248_v15 = vpop.f32.mrb[126].mxu1 }
 0x6b4   : > { %v5249_v1 = vadd.f32 %v5248_v15, %v5181_v14  ;;  %v6399_v10 = vpop.f32.mrb[127].mxu1 }
 0x6b6   : > { %v5253_v62 = vadd.f32 %v5252_v59, %v5249_v1  ;;  %v5254_v63 = vsub.f32 0.0, %v5249_v1  ;;  %5260 = vst [vmem:[%s7482_s18 + $0x20] sm:$0x1] %v5249_v1 }
 0x6b8   : > { %v5255_v8 = vmul.f32 1.442695, %v5254_v63  ;;  %5261 = vst [vmem:[%s7482_s18 + $0x21] sm:$0x1] %v5253_v62  ;;  %v5263_v58 = vmul.f32 256.0, %v5253_v62 }
 0x6ba   : > { %7388 = vpow2.f32 %v5255_v8  ;;  %v5264_v3 = vadd.f32 1e-09, %v5263_v58 }
 0x6bc   : > { %7390 = vrcp.f32 %v5264_v3 }
 0x6c4   : > { %v7389_v18 = vpop.eup %7388 }
 0x6c5   : > { %v5257_v16 = vadd.f32 1.0, %v7389_v18 }
 0x6c6   : > { %v7391_v11 = vpop.eup %7390 }
 0x6c7   : > { %7392 = vrcp.f32 %v5257_v16  ;;  %v5266_v35 = vmul.f32 1000.0, %v7391_v11 }
 0x6c9   : > { %v5278_v23 = vrot.slane %v5266_v35, %v10919_v38 }
 0x6cb   : > { %5280 = vrot.lane.b32.xlu0 %v5278_v23, %s7408_s29 }
 0x6d1   : > { %v7393_v12 = vpop.eup %7392 }
 0x6d2   : > { %5262 = vst [vmem:[%s7482_s18 + $0x22] sm:$0x1] %v7393_v12 }
 0x73d   : > { %v5281_v57 = vpop.permute.xlu0 %5280 }
 0x73e   : > { %v5283_v45 = vadd.f32 %v5281_v57, %v5271_v29  ;;  %v5286_v34 = vadd.f32 %v5281_v57, %v5274_v52  ;;  %v5284_v0 = vadd.f32 %v5281_v57, %v5272_v44  ;;  %v5285_v36 = vadd.f32 %v5281_v57, %v5273_v56 }
 0x740   : > { %5289 = vperm.xlu1 %7122, %v5283_v45   ;;  %5304 = vperm.xlu0 %7123, %v5286_v34  }
 0x744   : > { %5294 = vperm.xlu1 %7122, %v5284_v0   ;;  %5358 = vrot.lane.b32.xlu0 %v5349_v40, %s7409_s11 }
 0x748   : > { %5299 = vperm.xlu1 %7122, %v5285_v36  }
 0x74c   : > { %5377 = vrot.lane.b32.xlu1 %v5266_v35, %s7408_s29 }
 0x750   : > { %5356 = vrot.lane.b32.xlu1 %v5348_v54, %s7409_s11 }
 0x7bf   : > { %v5290_v46 = vpop.permute.xlu1 %5289  ;;  %v5305_v17 = vpop.permute.xlu0 %5304 }
 0x7c0   : > { %v5307_v24 = vmul.f32 %v5290_v46, %v5267_v47  ;;  %v5310_v7 = vmul.f32 %v5305_v17, %v5270_v51 }
 0x7c2   : > { %v5311_v40 = vmul.f32 0.5, %v5307_v24  ;;  %v5314_v42 = vmul.f32 0.5, %v5310_v7 }
 0x7c3   : > { %v5295_v32 = vpop.permute.xlu1 %5294  ;;  %v5359_v41 = vpop.permute.xlu0 %5358 }
 0x7c4   : > { %v5318_v27 = vrot.slane %v5311_v40, %v10919_v38  ;;  %v5373_v50 = vmul.f32 2.0, %v5311_v40  ;;  %v5308_v53 = vmul.f32 %v5295_v32, %v5268_v61 }
 0x7c6   : > { %v5322_v37 = vsub.f32 %v5314_v42, %v5318_v27  ;;  %v5312_v4 = vmul.f32 0.5, %v5308_v53  ;;  %v5319_v28 = vsub.f32 %v5311_v40, %v5318_v27  ;;  %5375 = vst.msk [vmem:[%s7482_s18 + $0x23] sm:$0x1] %vm5374_vm4, %v5373_v50 }
 0x7c7   : > { %v5300_v13 = vpop.permute.xlu1 %5299 }
 0x7c8   : > { %v5320_v20 = vsub.f32 %v5312_v4, %v5318_v27  ;;  %v5309_v6 = vmul.f32 %v5300_v13, %v5269_v39  ;;  %5327 = vrot.lane.b32.xlu1 %v5319_v28, %s7409_s11 }
 0x7ca   : > { %v5313_v21 = vmul.f32 0.5, %v5309_v6  ;;  %5329 = vrot.lane.b32.xlu0 %v5320_v20, %s7409_s11 }
 0x7cb   : > { %v5378_v38 = vpop.permute.xlu1 %5377 }
 0x7cc   : > { %v5321_v33 = vsub.f32 %v5313_v21, %v5318_v27  ;;  %v5380_v26 = vadd.f32 %v5378_v38, %v5271_v29 }
 0x7ce   : > { %5382 = vst.msk [vmem:[%s7482_s18 + $0x23] sm:$0x1] %vm5381_vm5, %v5380_v26  ;;  %5331 = vrot.lane.b32.xlu1 %v5321_v33, %s7409_s11  ;;  %5333 = vrot.lane.b32.xlu0 %v5322_v37, %s7409_s11 }
 0x7cf   : > { %v5357_v5 = vpop.permute.xlu1 %5356 }
 0x7d2   : > { %5360 = vrot.lane.b32.xlu1 %v5350_v43, %s7409_s11  ;;  %5362 = vrot.lane.b32.xlu0 %v5351_v49, %s7409_s11 }
 0x83a   : > { %v5328_v31 = vpop.permute.xlu1 %5327 }
 0x83b   : > { %5340 = vst.msk [vmem:[%s7482_s18] sm:$0xff] %vm5339_vm6, %v5328_v31 }
 0x83c   : > { %5369 = vst.msk [vmem:[%s7482_s18] sm:$0xff] %vm5368_vm7, %v5357_v5  ;;  %v5330_v25 = vpop.permute.xlu0 %5329 }
 0x83d   : > { %5341 = vst.msk [vmem:[%s7482_s18 + $0x8] sm:$0xff] %vm5339_vm6, %v5330_v25 }
 0x83e   : > { %5370 = vst.msk [vmem:[%s7482_s18 + $0x8] sm:$0xff] %vm5368_vm7, %v5359_v41 }
 0x840   : > { %v5332_v22 = vpop.permute.xlu1 %5331  ;;  %v5334_v48 = vpop.permute.xlu0 %5333 }
 0x841   : > { %5342 = vst.msk [vmem:[%s7482_s18 + $0x10] sm:$0xff] %vm5339_vm6, %v5332_v22  ;;  %5343 = vst.msk [vmem:[%s7482_s18 + $0x18] sm:$0xff] %vm5339_vm6, %v5334_v48 }
 0x844   : > { %v5361_v43 = vpop.permute.xlu1 %5360  ;;  %v5363_v9 = vpop.permute.xlu0 %5362 }
 0x845   : > { %5371 = vst.msk [vmem:[%s7482_s18 + $0x10] sm:$0xff] %vm5368_vm7, %v5361_v43  ;;  %5372 = vst.msk [vmem:[%s7482_s18 + $0x18] sm:$0xff] %vm5368_vm7, %v5363_v9 }
 0x846 PF: > { %s19_s30 = sadd.s32 1, %s7401_s30  }
 0x847   : > { %p16_p4 = scmp.ge.s32.totalorder %s19_s30, 4  }
 0x849   :  { %18 = sbr.rel (!%p16_p4) target bundleno = 1 (0x1), region = 104 }

</bundles_post_ra>
